<compile_context>
chip_gen: v7x
topology: tpu7x:2x2x1
jax: 0.10.0
libtpu: 0.0.40
codegen_flags: <defaults>
</compile_context>

<pallas_src>
import jax
import jax.numpy as jnp
from jax.experimental import pallas as pl
from jax.experimental.pallas import tpu as pltpu

# ---------------- model hyper-parameters (small, shape-consistent) -----------
CONTEXT = 5                       # fixed by fc1: embedding_dim * 5
VOCAB_SIZE = 16
EMBEDDING_DIM = 32
HIDDEN_DIM = 32
IN_DIM = EMBEDDING_DIM * CONTEXT  # 160

# ---------------- padded (hardware-granular) dimensions ----------------------
ONEHOT_PAD = 128                  # CONTEXT * VOCAB_SIZE = 80  -> 128 lanes
HIDDEN_PAD = 128                  # HIDDEN_DIM = 32            -> 128 lanes
OUT_PAD = 128                     # VOCAB_SIZE = 16            -> 128 lanes (lane-dense store)
IDS_PAD = 8                       # CONTEXT = 5                -> 8 sublane-friendly columns

NEG_PAD = -1e30                   # value stored in padded logit lanes (argmax/softmax safe)

BATCH = 1024                      # demo batch (amortizes dispatch overhead)
BATCH_TILE = 512                  # rows per grid step -> 2 parallel steps (dual-TC on v7x)


# ---------------- Pallas kernel: fused (gather+fc1) -> fc2 -> fc3 ------------
def lm_fused_kernel(ids_ref, wef1_ref, b1_ref, w2_ref, b2_ref, w3_ref, b3_ref,
                    o_ref):
    # ids already carry the per-position offset p*VOCAB_SIZE (done in wrapper).
    ids = ids_ref[...]                                              # (BT, 8) int32
    lane = jax.lax.broadcasted_iota(jnp.int32, (BATCH_TILE, ONEHOT_PAD), 1)
    onehot = jnp.zeros((BATCH_TILE, ONEHOT_PAD), jnp.bfloat16)
    for p in range(CONTEXT):                                        # unrolled x5 (VPU filler)
        onehot = onehot + (lane == ids[:, p:p + 1]).astype(jnp.bfloat16)

    # --- fused embedding-gather + fc1 + relu (W_ef1 = blockdiag(emb) @ W1, precomputed)
    h1 = jnp.dot(onehot, wef1_ref[...],
                 preferred_element_type=jnp.float32) + b1_ref[...]  # (BT, 128) f32
    h1 = jnp.maximum(h1, 0.0)
    # dropout: nn.Dropout is identity in eval/inference mode
    # TODO(synk): training-mode dropout (Bernoulli mask via pltpu.prng_*) not emitted.

    # --- fc2 + relu (bf16 inputs, f32 accumulation)
    h2 = jnp.dot(h1.astype(jnp.bfloat16), w2_ref[...],
                 preferred_element_type=jnp.float32) + b2_ref[...]  # (BT, 128) f32
    h2 = jnp.maximum(h2, 0.0)

    # --- fc3 (logits, no activation); padded lanes get NEG_PAD via b3 padding
    out = jnp.dot(h2.astype(jnp.bfloat16), w3_ref[...],
                  preferred_element_type=jnp.float32) + b3_ref[...]
    o_ref[...] = out.astype(o_ref.dtype)                            # unmasked 128-lane store


# ---------------- wrapper: grid over batch, weights VMEM-resident ------------
def _lm_pallas(ids, wef1, b1, w2, b2, w3, b3):
    Bp = ids.shape[0]                        # already a multiple of BATCH_TILE
    grid = (Bp // BATCH_TILE,)
    fixed = lambda shape: pl.BlockSpec(shape, lambda i: (0, 0))   # stays VMEM-resident
    return pl.pallas_call(
        lm_fused_kernel,
        out_shape=jax.ShapeDtypeStruct((Bp, OUT_PAD), jnp.float32),
        grid=grid,
        in_specs=[
            pl.BlockSpec((BATCH_TILE, IDS_PAD), lambda i: (i, 0)),   # offset token ids tile
            fixed((ONEHOT_PAD, HIDDEN_PAD)), fixed((1, HIDDEN_PAD)), # fused emb+fc1 (bf16), b1 (f32)
            fixed((HIDDEN_PAD, HIDDEN_PAD)), fixed((1, HIDDEN_PAD)), # fc2 (bf16), b2 (f32)
            fixed((HIDDEN_PAD, OUT_PAD)),    fixed((1, OUT_PAD)),    # fc3 (bf16), b3 (f32, pad=NEG)
        ],
        out_specs=pl.BlockSpec((BATCH_TILE, OUT_PAD), lambda i: (i, 0)),
        compiler_params=pltpu.CompilerParams(
            dimension_semantics=("parallel",)),                      # megacore split on v7x
        # NOTE: for BATCH_TILE > ~1024 on v5e, add vmem_limit_bytes=64<<20 here.
    )(ids, wef1, b1, w2, b2, w3, b3)


@jax.jit
def language_model_forward_padded(token_ids, padded_params):
    """token_ids: (B, 5) int32 -> lane-dense logits (Bp, 128) f32.

    Lanes >= VOCAB_SIZE hold NEG_PAD (safe for argmax/softmax); rows >= B are
    padding.  Prefer this output downstream to skip the post-kernel slice.
    """
    B = token_ids.shape[0]
    pad_b = (-B) % BATCH_TILE
    # Pre-offset ids so the kernel one-hot needs no per-position adds; pad the
    # id tile 5 -> 8 columns (pad columns are never read by the kernel).
    ids = token_ids + jnp.arange(CONTEXT, dtype=jnp.int32) * VOCAB_SIZE
    ids = jnp.pad(ids, ((0, pad_b), (0, IDS_PAD - CONTEXT)))
    return _lm_pallas(ids, *padded_params)


def language_model_forward(token_ids, padded_params):
    """Spec-matching forward: (B, 5) int32 -> (B, VOCAB_SIZE) f32 logits."""
    B = token_ids.shape[0]
    return language_model_forward_padded(token_ids, padded_params)[:B, :VOCAB_SIZE]


# ---------------- parameter preprocessing (once per model, not per forward) --
def pad_params(p):
    E, H, V, C = EMBEDDING_DIM, HIDDEN_DIM, VOCAB_SIZE, CONTEXT
    # Fused gather+fc1 weight: W_ef1[c*V + v, j] = sum_e embedding[v, e] * w1[c*E + e, j]
    # (== blockdiag(embedding) @ w1, exact because there is no nonlinearity between them).
    wef1 = jnp.zeros((ONEHOT_PAD, HIDDEN_PAD), jnp.float32)
    for c in range(C):
        blk = p["embedding"] @ p["w1"][c * E:(c + 1) * E, :]        # (V, H)
        wef1 = wef1.at[c * V:(c + 1) * V, :H].set(blk)
    w2 = jnp.zeros((HIDDEN_PAD, HIDDEN_PAD), jnp.float32).at[:H, :H].set(p["w2"])
    w3 = jnp.zeros((HIDDEN_PAD, OUT_PAD), jnp.float32).at[:H, :V].set(p["w3"])
    b1 = jnp.zeros((1, HIDDEN_PAD), jnp.float32).at[:, :H].set(p["b1"])
    b2 = jnp.zeros((1, HIDDEN_PAD), jnp.float32).at[:, :H].set(p["b2"])
    # Padded logit lanes get a large negative bias so the padded output is
    # directly safe for argmax/softmax consumers (real lanes keep b3).
    b3 = jnp.full((1, OUT_PAD), NEG_PAD, jnp.float32).at[:, :V].set(p["b3"])
    # Weights in bf16 (f32 accumulation in-kernel); biases stay f32.
    return (wef1.astype(jnp.bfloat16), b1,
            w2.astype(jnp.bfloat16), b2,
            w3.astype(jnp.bfloat16), b3)


# ---------------- deterministic parameter init --------------------------------
def init_params(key):
    ks = jax.random.split(key, 7)
    def linear(kw, kb, fan_in, fan_out):
        bound = 1.0 / jnp.sqrt(jnp.float32(fan_in))
        w = jax.random.uniform(kw, (fan_in, fan_out), jnp.float32, -bound, bound)
        b = jax.random.uniform(kb, (1, fan_out), jnp.float32, -bound, bound)
        return w, b
    embedding = jax.random.normal(ks[0], (VOCAB_SIZE, EMBEDDING_DIM), jnp.float32)
    w1, b1 = linear(ks[1], ks[2], IN_DIM, HIDDEN_DIM)
    w2, b2 = linear(ks[3], ks[4], HIDDEN_DIM, HIDDEN_DIM)
    w3, b3 = linear(ks[5], ks[6], HIDDEN_DIM, VOCAB_SIZE)
    return dict(embedding=embedding, w1=w1, b1=b1, w2=w2, b2=b2, w3=w3, b3=b3)


# ---------------- pure-JAX f32 reference for correctness check ----------------
def reference_forward(token_ids, p):
    emb = jnp.take(p["embedding"], token_ids, axis=0)
    h = emb.reshape(token_ids.shape[0], -1)
    h = jnp.maximum(h @ p["w1"] + p["b1"], 0.0)
    h = jnp.maximum(h @ p["w2"] + p["b2"], 0.0)
    return h @ p["w3"] + p["b3"]


if __name__ == "__main__":
    key = jax.random.PRNGKey(0)
    k_tok, k_par = jax.random.split(key)
    params = init_params(k_par)
    padded = pad_params(params)
    token_ids = jax.random.randint(k_tok, (BATCH, CONTEXT), 0, VOCAB_SIZE, jnp.int32)

    out = language_model_forward(token_ids, padded)
    out = jax.block_until_ready(out)

    ref = reference_forward(token_ids, params)
    assert out.shape == (BATCH, VOCAB_SIZE), out.shape
    # bf16 weights / dot inputs (f32 accumulation) vs. a pure-f32 reference:
    # expect O(1e-2) absolute differences on O(1) logits -> loosened tolerance.
    assert jnp.allclose(out, ref, atol=1e-1, rtol=5e-2), "mismatch vs reference"
    print("KERNEL_OK")
</pallas_src>

<mosaic_0001>
module attributes {stable_mosaic.version = 11 : i64} {
  func.func @lm_fused_kernel(%arg0: i32, %arg1: memref<512x8xi32, #tpu.memory_space<vmem>>, %arg2: memref<128x128xbf16, #tpu.memory_space<vmem>>, %arg3: memref<1x128xf32, #tpu.memory_space<vmem>>, %arg4: memref<128x128xbf16, #tpu.memory_space<vmem>>, %arg5: memref<1x128xf32, #tpu.memory_space<vmem>>, %arg6: memref<128x128xbf16, #tpu.memory_space<vmem>>, %arg7: memref<1x128xf32, #tpu.memory_space<vmem>>, %arg8: memref<512x128xf32, #tpu.memory_space<vmem>>) attributes {dimension_semantics = [#tpu.dimension_semantics<parallel>], iteration_bounds = array<i64: 2>, scalar_prefetch = 0 : i64, scratch_operands = 0 : i64, tpu.core_type = #tpu.core_type<tc>, window_params = [{transform_indices = @transform_0, window_bounds = array<i64: 512, 8>}, {pipeline_mode = #tpu.pipeline_mode<synchronous>, transform_indices = @transform_1, window_bounds = array<i64: 128, 128>}, {pipeline_mode = #tpu.pipeline_mode<synchronous>, transform_indices = @transform_2, window_bounds = array<i64: 1, 128>}, {pipeline_mode = #tpu.pipeline_mode<synchronous>, transform_indices = @transform_3, window_bounds = array<i64: 128, 128>}, {pipeline_mode = #tpu.pipeline_mode<synchronous>, transform_indices = @transform_4, window_bounds = array<i64: 1, 128>}, {pipeline_mode = #tpu.pipeline_mode<synchronous>, transform_indices = @transform_5, window_bounds = array<i64: 128, 128>}, {pipeline_mode = #tpu.pipeline_mode<synchronous>, transform_indices = @transform_6, window_bounds = array<i64: 1, 128>}, {transform_indices = @transform_7, window_bounds = array<i64: 512, 128>}]} {
    %c0 = arith.constant 0 : index
    %c0_0 = arith.constant 0 : index
    %0 = vector.load %arg1[%c0, %c0_0] : memref<512x8xi32, #tpu.memory_space<vmem>>, vector<512x8xi32>
    %1 = tpu.iota {dimensions = array<i32: 1>} : vector<512x128xi32>
    %cst = arith.constant 0.000000e+00 : bf16
    %2 = vector.broadcast %cst : bf16 to vector<512x128xbf16>
    %3 = vector.extract_strided_slice %0 {offsets = [0, 0], sizes = [512, 1], strides = [1, 1]} : vector<512x8xi32> to vector<512x1xi32>
    %4 = vector.broadcast %3 : vector<512x1xi32> to vector<512x128xi32>
    %5 = arith.cmpi eq, %1, %4 : vector<512x128xi32>
    %6 = arith.extui %5 : vector<512x128xi1> to vector<512x128xi32>
    %7 = arith.sitofp %6 : vector<512x128xi32> to vector<512x128xf32>
    %8 = arith.truncf %7 : vector<512x128xf32> to vector<512x128xbf16>
    %9 = arith.addf %2, %8 : vector<512x128xbf16>
    %10 = vector.extract_strided_slice %0 {offsets = [0, 1], sizes = [512, 1], strides = [1, 1]} : vector<512x8xi32> to vector<512x1xi32>
    %11 = vector.broadcast %10 : vector<512x1xi32> to vector<512x128xi32>
    %12 = arith.cmpi eq, %1, %11 : vector<512x128xi32>
    %13 = arith.extui %12 : vector<512x128xi1> to vector<512x128xi32>
    %14 = arith.sitofp %13 : vector<512x128xi32> to vector<512x128xf32>
    %15 = arith.truncf %14 : vector<512x128xf32> to vector<512x128xbf16>
    %16 = arith.addf %9, %15 : vector<512x128xbf16>
    %17 = vector.extract_strided_slice %0 {offsets = [0, 2], sizes = [512, 1], strides = [1, 1]} : vector<512x8xi32> to vector<512x1xi32>
    %18 = vector.broadcast %17 : vector<512x1xi32> to vector<512x128xi32>
    %19 = arith.cmpi eq, %1, %18 : vector<512x128xi32>
    %20 = arith.extui %19 : vector<512x128xi1> to vector<512x128xi32>
    %21 = arith.sitofp %20 : vector<512x128xi32> to vector<512x128xf32>
    %22 = arith.truncf %21 : vector<512x128xf32> to vector<512x128xbf16>
    %23 = arith.addf %16, %22 : vector<512x128xbf16>
    %24 = vector.extract_strided_slice %0 {offsets = [0, 3], sizes = [512, 1], strides = [1, 1]} : vector<512x8xi32> to vector<512x1xi32>
    %25 = vector.broadcast %24 : vector<512x1xi32> to vector<512x128xi32>
    %26 = arith.cmpi eq, %1, %25 : vector<512x128xi32>
    %27 = arith.extui %26 : vector<512x128xi1> to vector<512x128xi32>
    %28 = arith.sitofp %27 : vector<512x128xi32> to vector<512x128xf32>
    %29 = arith.truncf %28 : vector<512x128xf32> to vector<512x128xbf16>
    %30 = arith.addf %23, %29 : vector<512x128xbf16>
    %31 = vector.extract_strided_slice %0 {offsets = [0, 4], sizes = [512, 1], strides = [1, 1]} : vector<512x8xi32> to vector<512x1xi32>
    %32 = vector.broadcast %31 : vector<512x1xi32> to vector<512x128xi32>
    %33 = arith.cmpi eq, %1, %32 : vector<512x128xi32>
    %34 = arith.extui %33 : vector<512x128xi1> to vector<512x128xi32>
    %35 = arith.sitofp %34 : vector<512x128xi32> to vector<512x128xf32>
    %36 = arith.truncf %35 : vector<512x128xf32> to vector<512x128xbf16>
    %37 = arith.addf %30, %36 : vector<512x128xbf16>
    %c0_1 = arith.constant 0 : index
    %c0_2 = arith.constant 0 : index
    %38 = vector.load %arg2[%c0_1, %c0_2] : memref<128x128xbf16, #tpu.memory_space<vmem>>, vector<128x128xbf16>
    %cst_3 = arith.constant dense<0.000000e+00> : vector<512x128xf32>
    %39 = tpu.matmul %37, %38, %cst_3 {dimension_numbers = #tpu.dot_dimension_numbers<[1], [0], [0], [1], [0, 0, 1, 1], [], []>} : vector<512x128xbf16>, vector<128x128xbf16>, vector<512x128xf32> -> vector<512x128xf32>
    %c0_4 = arith.constant 0 : index
    %c0_5 = arith.constant 0 : index
    %40 = vector.load %arg3[%c0_4, %c0_5] : memref<1x128xf32, #tpu.memory_space<vmem>>, vector<1x128xf32>
    %41 = vector.broadcast %40 : vector<1x128xf32> to vector<512x128xf32>
    %42 = arith.addf %39, %41 : vector<512x128xf32>
    %cst_6 = arith.constant 0.000000e+00 : f32
    %43 = vector.broadcast %cst_6 : f32 to vector<512x128xf32>
    %44 = arith.maximumf %42, %43 : vector<512x128xf32>
    %45 = arith.truncf %44 : vector<512x128xf32> to vector<512x128xbf16>
    %c0_7 = arith.constant 0 : index
    %c0_8 = arith.constant 0 : index
    %46 = vector.load %arg4[%c0_7, %c0_8] : memref<128x128xbf16, #tpu.memory_space<vmem>>, vector<128x128xbf16>
    %cst_9 = arith.constant dense<0.000000e+00> : vector<512x128xf32>
    %47 = tpu.matmul %45, %46, %cst_9 {dimension_numbers = #tpu.dot_dimension_numbers<[1], [0], [0], [1], [0, 0, 1, 1], [], []>} : vector<512x128xbf16>, vector<128x128xbf16>, vector<512x128xf32> -> vector<512x128xf32>
    %c0_10 = arith.constant 0 : index
    %c0_11 = arith.constant 0 : index
    %48 = vector.load %arg5[%c0_10, %c0_11] : memref<1x128xf32, #tpu.memory_space<vmem>>, vector<1x128xf32>
    %49 = vector.broadcast %48 : vector<1x128xf32> to vector<512x128xf32>
    %50 = arith.addf %47, %49 : vector<512x128xf32>
    %cst_12 = arith.constant 0.000000e+00 : f32
    %51 = vector.broadcast %cst_12 : f32 to vector<512x128xf32>
    %52 = arith.maximumf %50, %51 : vector<512x128xf32>
    %53 = arith.truncf %52 : vector<512x128xf32> to vector<512x128xbf16>
    %c0_13 = arith.constant 0 : index
    %c0_14 = arith.constant 0 : index
    %54 = vector.load %arg6[%c0_13, %c0_14] : memref<128x128xbf16, #tpu.memory_space<vmem>>, vector<128x128xbf16>
    %cst_15 = arith.constant dense<0.000000e+00> : vector<512x128xf32>
    %55 = tpu.matmul %53, %54, %cst_15 {dimension_numbers = #tpu.dot_dimension_numbers<[1], [0], [0], [1], [0, 0, 1, 1], [], []>} : vector<512x128xbf16>, vector<128x128xbf16>, vector<512x128xf32> -> vector<512x128xf32>
    %c0_16 = arith.constant 0 : index
    %c0_17 = arith.constant 0 : index
    %56 = vector.load %arg7[%c0_16, %c0_17] : memref<1x128xf32, #tpu.memory_space<vmem>>, vector<1x128xf32>
    %57 = vector.broadcast %56 : vector<1x128xf32> to vector<512x128xf32>
    %58 = arith.addf %55, %57 : vector<512x128xf32>
    %c0_18 = arith.constant 0 : index
    %c0_19 = arith.constant 0 : index
    %59 = vector.load %arg8[%c0_18, %c0_19] : memref<512x128xf32, #tpu.memory_space<vmem>>, vector<512x128xf32>
    tpu.vector_store %arg8[%c0_18, %c0_19], %58 {strides = array<i32>} : memref<512x128xf32, #tpu.memory_space<vmem>>, vector<512x128xf32>,
    return
  }
  func.func @transform_0(%arg0: i32) -> (i32, i32) {
    %c0_i32 = arith.constant 0 : i32
    %c0_i32_0 = arith.constant 0 : i32
    return %arg0, %c0_i32 : i32, i32
  }
  func.func @transform_1(%arg0: i32) -> (i32, i32) {
    %c0_i32 = arith.constant 0 : i32
    %c0_i32_0 = arith.constant 0 : i32
    %c0_i32_1 = arith.constant 0 : i32
    return %c0_i32, %c0_i32_0 : i32, i32
  }
  func.func @transform_2(%arg0: i32) -> (i32, i32) {
    %c0_i32 = arith.constant 0 : i32
    %c0_i32_0 = arith.constant 0 : i32
    %c0_i32_1 = arith.constant 0 : i32
    return %c0_i32, %c0_i32_0 : i32, i32
  }
  func.func @transform_3(%arg0: i32) -> (i32, i32) {
    %c0_i32 = arith.constant 0 : i32
    %c0_i32_0 = arith.constant 0 : i32
    %c0_i32_1 = arith.constant 0 : i32
    return %c0_i32, %c0_i32_0 : i32, i32
  }
  func.func @transform_4(%arg0: i32) -> (i32, i32) {
    %c0_i32 = arith.constant 0 : i32
    %c0_i32_0 = arith.constant 0 : i32
    %c0_i32_1 = arith.constant 0 : i32
    return %c0_i32, %c0_i32_0 : i32, i32
  }
  func.func @transform_5(%arg0: i32) -> (i32, i32) {
    %c0_i32 = arith.constant 0 : i32
    %c0_i32_0 = arith.constant 0 : i32
    %c0_i32_1 = arith.constant 0 : i32
    return %c0_i32, %c0_i32_0 : i32, i32
  }
  func.func @transform_6(%arg0: i32) -> (i32, i32) {
    %c0_i32 = arith.constant 0 : i32
    %c0_i32_0 = arith.constant 0 : i32
    %c0_i32_1 = arith.constant 0 : i32
    return %c0_i32, %c0_i32_0 : i32, i32
  }
  func.func @transform_7(%arg0: i32) -> (i32, i32) {
    %c0_i32 = arith.constant 0 : i32
    %c0_i32_0 = arith.constant 0 : i32
    return %arg0, %c0_i32 : i32, i32
  }
}

</mosaic_0001>

<bundles_post_ra>
// kernel: language_model_forward_padded.1
= control target key start
LH: loop header
LB: loop body
LE: loop exit
PB: predicated region body
PF: predicated region fallthrough
CT: control target
= control target key end

     0   :  { %12 = vsyncpa [#allocation3], 0  ;;  %s7822_s0 = inlined_call_operand.vmem [shape: s32[1024,8], index: 0, kind: input, shape index: {}]   ;;  %s7823_s1 = inlined_call_operand.vmem [shape: bf16[128,128], index: 1, kind: input, shape index: {}]   ;;  %s7824_s2 = inlined_call_operand.vmem [shape: f32[1,128], index: 2, kind: input, shape index: {}]   ;;  %s7825_s3 = inlined_call_operand.vmem [shape: bf16[128,128], index: 3, kind: input, shape index: {}]   ;;  %s7826_s4 = inlined_call_operand.vmem [shape: f32[1,128], index: 4, kind: input, shape index: {}]   ;;  %s7827_s5 = inlined_call_operand.vmem [shape: bf16[128,128], index: 5, kind: input, shape index: {}]   ;;  %s7828_s6 = inlined_call_operand.vmem [shape: f32[1,128], index: 6, kind: input, shape index: {}]   ;;  %s7829_s7 = inlined_call_operand.hbm [shape: f32[1024,128], index: 7, kind: output, shape index: {}]  }
   0x1   :  { %14 = vsyncpa [#allocation3 + $0x1], 0  ;;  %s5022_s24 = smov 0   ;;  %s5024_s25 = smov 0  }
   0x2   :  { %s5026_s26 = smov 0   ;;  %s5028_s27 = smov 0  }
   0x3 LB: > { %s5043_s28 = sadd.s32 4294967295, %s4971_s27   ;;  %s3999_s29 = sadd.s32 4294967294, %s4971_s27   ;;  %s4971_s27 = sphi %s5028_s27, %s8247_s27   ;;  %s4967_s26 = sphi %s5026_s26, %s8246_s26   ;;  %s4963_s25 = sphi %s5024_s25, %s8245_s25   ;;  %s4959_s24 = sphi %s5022_s24, %s8244_s24  }
   0x4   : > { %s5047_s30 = sadd.s32 1, %s4971_s27   ;;  %s179_s8 = sadd.s32 1, %s4967_s26 }
   0x5   : > { %s176_s9 = ssub.s32 %s4971_s27, %s5047_s30  ;;  %p189_p0 = scmp.ne.s32.totalorder %s4967_s26, %s4963_s25 }
   0x6   : > { %p177_p1 = scmp.eq.s32.totalorder %s176_s9, 0  ;;  %p190_p2 = scmp.eq.s32.totalorder %s5043_s28, 1 }
   0x7   : > { %p195_p3 = scmp.ne.s32.totalorder %s4963_s25, %s4959_s24  ;;  %p196_p4 = scmp.eq.s32.totalorder %s3999_s29, 1 }
   0x8   : > { %s5058_s10 = scalar_select %p177_p1, %s4967_s26, %s179_s8  }
   0x9   : > { %p5060_p5 = por %p190_p2, %p189_p0  ;;  %p5064_p6 = por %p196_p4, %p195_p3 }
   0xa   : > { %p4002_p7 = scmp.ge.s32.totalorder %s4971_s27, 1  ;;  %p241_p8 = scmp.lt.s32.totalorder %s4971_s27, 3 }
   0xc   : > { %p242_p9 = pnand %p4002_p7, %p241_p8 }
   0xe   : > { %245 = sbr.rel (%p242_p9) target bundleno = 1637 (0x665), region = 48 }
  0x15   : > { %s4004_s13 = sshll.u32 %s5043_s28, 6  ;;  %v4973_v0 = vmov 0   ;;  %s270_s16 = sand.u32 1, %s4963_s25  }
  0x16   : > { %4783 = vset.pattern.permute.xlu1 %v4973_v0  ;;  %4782 = vset.pattern.permute.xlu0 %v4973_v0  ;;  %p274_p10 = scmp.lt.s32.totalorder %s4004_s13, 127  ;;  %s4003_s18 = sshll.u32 %s270_s16, 9 }
  0x17   : > { %s7642_s21 = scalar_lea.vmem [#allocation2], %s4003_s18  ;;  %s4358_s22 = sshll.u32 %s5043_s28, 13 }
  0x18   : > { %s8249_s13 = smov (!%p274_p10, %s4004_s13), 127  ;;  %s7771_s8 = scalar_lea.hbm %s7829_s7, %s4358_s22 }
  0x19   : > { %s4005_s14 = sshll.u32 %s8249_s13, 3  ;;  %s7781_s28 = scalar_lea.sflag [#allocation3], %s270_s16 }
  0x1a   : > { %s5074_s17 = scalar_lea.vmem %s7822_s0, %s4005_s14  ;;  %s4979_s13 = smov [#allocation2]  }
  0x1b   : > { %v5077_v1 = vld [vmem:[%s5074_s17 + $0x10] sm:$0xff]  ;;  %v5080_v2 = vld [vmem:[%s5074_s17] sm:$0xff]  ;;  %v5085_v3 = vld [vmem:[%s5074_s17 + $0x18] sm:$0xff]  ;;  %s4913_s14 = sshll.u32 %s4979_s13, 4  ;;  %s4914_s14 = int_to_ptr.vmem [resolvable:$false] %s4913_s14 }
  0x1c   : > { %354 = vperm.xlu1 %4783, %v5077_v1   ;;  %348 = vperm.xlu0 %4782, %v5080_v2   ;;  %v5088_v4 = vld [vmem:[%s5074_s17 + $0x8] sm:$0xff]  ;;  %v5096_v6 = vld [vmem:[%s5074_s17 + $0x20] sm:$0xff]  ;;  %v5101_v7 = vld [vmem:[%s5074_s17 + $0x38] sm:$0xff]  ;;  %s4915_s15 = scalar_lea.vmem %s4914_s14, 16384 }
  0x1d   : > { %v5093_v5 = vld [vmem:[%s5074_s17 + $0x28] sm:$0xff]  ;;  %v5104_v8 = vld [vmem:[%s5074_s17 + $0x30] sm:$0xff]  ;;  %v5112_v10 = vld [vmem:[%s5074_s17 + $0x40] sm:$0xff] }
  0x1e   : > { %v5109_v9 = vld [vmem:[%s5074_s17 + $0x48] sm:$0xff]  ;;  %v5117_v11 = vld [vmem:[%s5074_s17 + $0x58] sm:$0xff]  ;;  %v5120_v12 = vld [vmem:[%s5074_s17 + $0x50] sm:$0xff] }
  0x1f   : > { %v5123_v13 = vld [vmem:[%s5074_s17 + $0x68] sm:$0xff]  ;;  %v5128_v14 = vld [vmem:[%s5074_s17 + $0x60] sm:$0xff]  ;;  %v5131_v15 = vld [vmem:[%s5074_s17 + $0x78] sm:$0xff] }
  0x20   : > { %357 = vperm.xlu1 %4783, %v5085_v3   ;;  %351 = vperm.xlu0 %4782, %v5088_v4   ;;  %v5134_v16 = vld [vmem:[%s5074_s17 + $0x70] sm:$0xff]  ;;  %v5139_v17 = vld [vmem:[%s5074_s17 + $0x88] sm:$0xff]  ;;  %v5142_v18 = vld [vmem:[%s5074_s17 + $0x80] sm:$0xff] }
  0x21   : > { %v5149_v19 = vld [vmem:[%s5074_s17 + $0x98] sm:$0xff]  ;;  %v5152_v20 = vld [vmem:[%s5074_s17 + $0x90] sm:$0xff]  ;;  %v5157_v21 = vld [vmem:[%s5074_s17 + $0xa8] sm:$0xff] }
  0x22   : > { %v5160_v22 = vld [vmem:[%s5074_s17 + $0xa0] sm:$0xff]  ;;  %v5165_v23 = vld [vmem:[%s5074_s17 + $0xb8] sm:$0xff]  ;;  %v5168_v24 = vld [vmem:[%s5074_s17 + $0xb0] sm:$0xff] }
  0x23   : > { %v5173_v25 = vld [vmem:[%s5074_s17 + $0xc8] sm:$0xff]  ;;  %v5176_v26 = vld [vmem:[%s5074_s17 + $0xc0] sm:$0xff]  ;;  %v5181_v27 = vld [vmem:[%s5074_s17 + $0xd8] sm:$0xff] }
  0x24   : > { %363 = vperm.xlu1 %4783, %v5093_v5   ;;  %360 = vperm.xlu0 %4782, %v5096_v6   ;;  %v5184_v28 = vld [vmem:[%s5074_s17 + $0xd0] sm:$0xff]  ;;  %v5189_v29 = vld [vmem:[%s5074_s17 + $0xe8] sm:$0xff]  ;;  %v5192_v30 = vld [vmem:[%s5074_s17 + $0xe0] sm:$0xff] }
  0x25   : > { %v5197_v31 = vld [vmem:[%s5074_s17 + $0xf8] sm:$0xff]  ;;  %v5200_v32 = vld [vmem:[%s5074_s17 + $0xf0] sm:$0xff]  ;;  %v5205_v33 = vld [vmem:[%s5074_s17 + $0x108] sm:$0xff] }
  0x26   : > { %v5208_v34 = vld [vmem:[%s5074_s17 + $0x100] sm:$0xff]  ;;  %v5213_v35 = vld [vmem:[%s5074_s17 + $0x118] sm:$0xff]  ;;  %v5216_v36 = vld [vmem:[%s5074_s17 + $0x110] sm:$0xff] }
  0x27   : > { %v5221_v37 = vld [vmem:[%s5074_s17 + $0x128] sm:$0xff]  ;;  %v5224_v38 = vld [vmem:[%s5074_s17 + $0x120] sm:$0xff]  ;;  %v5229_v39 = vld [vmem:[%s5074_s17 + $0x138] sm:$0xff] }
  0x28   : > { %369 = vperm.xlu1 %4783, %v5101_v7   ;;  %366 = vperm.xlu0 %4782, %v5104_v8   ;;  %v5232_v40 = vld [vmem:[%s5074_s17 + $0x130] sm:$0xff]  ;;  %v5237_v41 = vld [vmem:[%s5074_s17 + $0x148] sm:$0xff]  ;;  %v5240_v42 = vld [vmem:[%s5074_s17 + $0x140] sm:$0xff] }
  0x29   : > { %v5245_v43 = vld [vmem:[%s5074_s17 + $0x158] sm:$0xff]  ;;  %v5248_v44 = vld [vmem:[%s5074_s17 + $0x150] sm:$0xff]  ;;  %v5253_v45 = vld [vmem:[%s5074_s17 + $0x168] sm:$0xff] }
  0x2a   : > { %v5256_v46 = vld [vmem:[%s5074_s17 + $0x160] sm:$0xff]  ;;  %v5261_v47 = vld [vmem:[%s5074_s17 + $0x178] sm:$0xff]  ;;  %v327_v48 = vld [vmem:[%s5074_s17 + $0x170] sm:$0xff] }
  0x2b   : > { %v5266_v49 = vld [vmem:[%s5074_s17 + $0x188] sm:$0xff]  ;;  %v5269_v50 = vld [vmem:[%s5074_s17 + $0x180] sm:$0xff]  ;;  %v5274_v51 = vld [vmem:[%s5074_s17 + $0x198] sm:$0xff] }
  0x2c   : > { %375 = vperm.xlu1 %4783, %v5109_v9   ;;  %372 = vperm.xlu0 %4782, %v5112_v10   ;;  %v331_v52 = vld [vmem:[%s5074_s17 + $0x190] sm:$0xff]  ;;  %v5279_v53 = vld [vmem:[%s5074_s17 + $0x1a8] sm:$0xff]  ;;  %v5282_v54 = vld [vmem:[%s5074_s17 + $0x1a0] sm:$0xff] }
  0x2d   : > { %v5287_v55 = vld [vmem:[%s5074_s17 + $0x1b8] sm:$0xff]  ;;  %v335_v56 = vld [vmem:[%s5074_s17 + $0x1b0] sm:$0xff]  ;;  %v5292_v57 = vld [vmem:[%s5074_s17 + $0x1c8] sm:$0xff] }
  0x2e   : > { %v5295_v58 = vld [vmem:[%s5074_s17 + $0x1c0] sm:$0xff]  ;;  %v5300_v59 = vld [vmem:[%s5074_s17 + $0x1d8] sm:$0xff]  ;;  %v339_v60 = vld [vmem:[%s5074_s17 + $0x1d0] sm:$0xff] }
  0x2f   : > { %7893 = vst [vmem:[#allocation5_spill] sm:$0xff] %v5300_v59  ;;  %v5305_v61 = vld [vmem:[%s5074_s17 + $0x1e8] sm:$0xff]  ;;  %v5308_v62 = vld [vmem:[%s5074_s17 + $0x1e0] sm:$0xff]  ;;  %v5313_v63 = vld [vmem:[%s5074_s17 + $0x1f8] sm:$0xff] }
  0x30   : > { %381 = vperm.xlu1 %4783, %v5117_v11   ;;  %378 = vperm.xlu0 %4782, %v5120_v12   ;;  %7894 = vst [vmem:[#allocation6_spill] sm:$0xff] %v5308_v62  ;;  %v343_v0 = vld [vmem:[%s5074_s17 + $0x1f0] sm:$0xff] }
  0x34   : > { %387 = vperm.xlu1 %4783, %v5123_v13   ;;  %384 = vperm.xlu0 %4782, %v5128_v14  }
  0x38   : > { %393 = vperm.xlu1 %4783, %v5131_v15   ;;  %390 = vperm.xlu0 %4782, %v5134_v16  }
  0x3c   : > { %399 = vperm.xlu1 %4783, %v5139_v17   ;;  %396 = vperm.xlu0 %4782, %v5142_v18  }
  0x40   : > { %405 = vperm.xlu1 %4783, %v5149_v19   ;;  %402 = vperm.xlu0 %4782, %v5152_v20  }
  0x44   : > { %411 = vperm.xlu1 %4783, %v5157_v21   ;;  %408 = vperm.xlu0 %4782, %v5160_v22  }
  0x48   : > { %417 = vperm.xlu1 %4783, %v5165_v23   ;;  %414 = vperm.xlu0 %4782, %v5168_v24  }
  0x4c   : > { %423 = vperm.xlu1 %4783, %v5173_v25   ;;  %420 = vperm.xlu0 %4782, %v5176_v26  }
  0x50   : > { %429 = vperm.xlu1 %4783, %v5181_v27   ;;  %426 = vperm.xlu0 %4782, %v5184_v28  }
  0x54   : > { %435 = vperm.xlu1 %4783, %v5189_v29   ;;  %432 = vperm.xlu0 %4782, %v5192_v30  }
  0x58   : > { %441 = vperm.xlu1 %4783, %v5197_v31   ;;  %438 = vperm.xlu0 %4782, %v5200_v32  }
  0x5c   : > { %447 = vperm.xlu1 %4783, %v5205_v33   ;;  %444 = vperm.xlu0 %4782, %v5208_v34  }
  0x60   : > { %453 = vperm.xlu1 %4783, %v5213_v35   ;;  %450 = vperm.xlu0 %4782, %v5216_v36  }
  0x64   : > { %459 = vperm.xlu1 %4783, %v5221_v37   ;;  %456 = vperm.xlu0 %4782, %v5224_v38  }
  0x68   : > { %465 = vperm.xlu1 %4783, %v5229_v39   ;;  %462 = vperm.xlu0 %4782, %v5232_v40  }
  0x6c   : > { %471 = vperm.xlu1 %4783, %v5237_v41   ;;  %468 = vperm.xlu0 %4782, %v5240_v42  }
  0x70   : > { %477 = vperm.xlu1 %4783, %v5245_v43   ;;  %474 = vperm.xlu0 %4782, %v5248_v44  }
  0x74   : > { %483 = vperm.xlu1 %4783, %v5253_v45   ;;  %480 = vperm.xlu0 %4782, %v5256_v46  }
  0x78   : > { %489 = vperm.xlu1 %4783, %v5261_v47   ;;  %486 = vperm.xlu0 %4782, %v327_v48  }
  0x7c   : > { %495 = vperm.xlu1 %4783, %v5266_v49   ;;  %492 = vperm.xlu0 %4782, %v5269_v50  }
  0x80   : > { %501 = vperm.xlu1 %4783, %v5274_v51   ;;  %498 = vperm.xlu0 %4782, %v331_v52  }
  0x84   : > { %507 = vperm.xlu1 %4783, %v5279_v53   ;;  %504 = vperm.xlu0 %4782, %v5282_v54  }
  0x88   : > { %513 = vperm.xlu1 %4783, %v5287_v55   ;;  %510 = vperm.xlu0 %4782, %v335_v56   ;;  %v7834_v56 = vmov 1  }
  0x8c   : > { %519 = vperm.xlu1 %4783, %v5292_v57   ;;  %516 = vperm.xlu0 %4782, %v5295_v58  }
  0x90   : > { %525 = vperm.xlu1 %4783, %v5300_v59   ;;  %522 = vperm.xlu0 %4782, %v339_v60   ;;  %v7832_v60 = vmov 4  }
  0x94   : > { %531 = vperm.xlu1 %4783, %v5305_v61   ;;  %528 = vperm.xlu0 %4782, %v5308_v62  }
  0x98   : > { %537 = vperm.xlu1 %4783, %v5313_v63   ;;  %534 = vperm.xlu0 %4782, %v343_v0  }
  0x9b   : > { %v5317_v48 = vpop.permute.xlu1 %354  ;;  %v5319_v52 = vpop.permute.xlu0 %348 }
  0x9c   : > { %7895 = vst [vmem:[#allocation7_spill] sm:$0xff] %v5317_v48  ;;  %7896 = vst [vmem:[#allocation8_spill] sm:$0xff] %v5319_v52  ;;  %4784 = vset.pattern.permute.xlu1 %v7834_v56  ;;  %4788 = vset.pattern.permute.xlu0 %v7832_v60 }
  0x9d   : > { %799 = vperm.xlu1 %4784, %v5088_v4   ;;  %2143 = vperm.xlu0 %4788, %v5088_v4  }
  0x9f   : > { %v5325_v62 = vpop.permute.xlu1 %357  ;;  %v5327_v59 = vpop.permute.xlu0 %351 }
  0xa0   : > { %7897 = vst [vmem:[#allocation9_spill] sm:$0xff] %v5325_v62  ;;  %7898 = vst [vmem:[#allocation10_spill] sm:$0xff] %v5327_v59 }
  0xa1   : > { %802 = vperm.xlu1 %4784, %v5077_v1   ;;  %2152 = vperm.xlu0 %4788, %v5096_v6  }
  0xa3   : > { %v5331_v0 = vpop.permute.xlu1 %363  ;;  %v5333_v52 = vpop.permute.xlu0 %360 }
  0xa4   : > { %7899 = vst [vmem:[#allocation11_spill] sm:$0xff] %v5331_v0  ;;  %7900 = vst [vmem:[#allocation12_spill] sm:$0xff] %v5333_v52 }
  0xa5   : > { %808 = vperm.xlu1 %4784, %v5096_v6   ;;  %2161 = vperm.xlu0 %4788, %v5101_v7  }
  0xa7   : > { %v5337_v60 = vpop.permute.xlu1 %369  ;;  %v5339_v56 = vpop.permute.xlu0 %366 }
  0xa8   : > { %7901 = vst [vmem:[#allocation13_spill] sm:$0xff] %v5337_v60  ;;  %7902 = vst [vmem:[#allocation14_spill] sm:$0xff] %v5339_v56 }
  0xa9   : > { %814 = vperm.xlu1 %4784, %v5104_v8   ;;  %2167 = vperm.xlu0 %4788, %v5109_v9  }
  0xab   : > { %v5343_v59 = vpop.permute.xlu1 %375  ;;  %v5345_v62 = vpop.permute.xlu0 %372 }
  0xac   : > { %7903 = vst [vmem:[#allocation15_spill] sm:$0xff] %v5343_v59  ;;  %7904 = vst [vmem:[#allocation16_spill] sm:$0xff] %v5345_v62 }
  0xad   : > { %820 = vperm.xlu1 %4784, %v5112_v10   ;;  %2176 = vperm.xlu0 %4788, %v5128_v14  }
  0xaf   : > { %v5349_v52 = vpop.permute.xlu1 %381  ;;  %v5351_v0 = vpop.permute.xlu0 %378 }
  0xb0   : > { %7905 = vst [vmem:[#allocation17_spill] sm:$0xff] %v5349_v52  ;;  %7906 = vst [vmem:[#allocation18_spill] sm:$0xff] %v5351_v0 }
  0xb1   : > { %826 = vperm.xlu1 %4784, %v5120_v12   ;;  %2185 = vperm.xlu0 %4788, %v5131_v15  }
  0xb3   : > { %v5355_v56 = vpop.permute.xlu1 %387  ;;  %v5357_v60 = vpop.permute.xlu0 %384 }
  0xb4   : > { %7907 = vst [vmem:[#allocation19_spill] sm:$0xff] %v5355_v56  ;;  %7908 = vst [vmem:[#allocation20_spill] sm:$0xff] %v5357_v60 }
  0xb5   : > { %832 = vperm.xlu1 %4784, %v5128_v14   ;;  %2191 = vperm.xlu0 %4788, %v5139_v17  }
  0xb7   : > { %v5361_v62 = vpop.permute.xlu1 %393  ;;  %v5363_v59 = vpop.permute.xlu0 %390 }
  0xb8   : > { %7909 = vst [vmem:[#allocation21_spill] sm:$0xff] %v5361_v62  ;;  %7910 = vst [vmem:[#allocation22_spill] sm:$0xff] %v5363_v59 }
  0xb9   : > { %838 = vperm.xlu1 %4784, %v5134_v16   ;;  %2200 = vperm.xlu0 %4788, %v5160_v22  }
  0xbb   : > { %v5367_v0 = vpop.permute.xlu1 %399  ;;  %v5369_v52 = vpop.permute.xlu0 %396 }
  0xbc   : > { %7911 = vst [vmem:[#allocation23_spill] sm:$0xff] %v5367_v0  ;;  %7912 = vst [vmem:[#allocation24_spill] sm:$0xff] %v5369_v52 }
  0xbd   : > { %844 = vperm.xlu1 %4784, %v5142_v18   ;;  %2209 = vperm.xlu0 %4788, %v5165_v23  }
  0xbf   : > { %v5373_v60 = vpop.permute.xlu1 %405  ;;  %v5375_v56 = vpop.permute.xlu0 %402 }
  0xc0   : > { %7913 = vst [vmem:[#allocation25_spill] sm:$0xff] %v5373_v60  ;;  %7914 = vst [vmem:[#allocation26_spill] sm:$0xff] %v5375_v56 }
  0xc1   : > { %850 = vperm.xlu1 %4784, %v5152_v20   ;;  %2215 = vperm.xlu0 %4788, %v5173_v25  }
  0xc3   : > { %v5379_v59 = vpop.permute.xlu1 %411  ;;  %v5381_v62 = vpop.permute.xlu0 %408 }
  0xc4   : > { %7915 = vst [vmem:[#allocation27_spill] sm:$0xff] %v5379_v59  ;;  %7916 = vst [vmem:[#allocation28_spill] sm:$0xff] %v5381_v62 }
  0xc5   : > { %856 = vperm.xlu1 %4784, %v5160_v22   ;;  %2224 = vperm.xlu0 %4788, %v5192_v30  }
  0xc7   : > { %v5385_v52 = vpop.permute.xlu1 %417  ;;  %v5387_v0 = vpop.permute.xlu0 %414 }
  0xc8   : > { %7917 = vst [vmem:[#allocation29_spill] sm:$0xff] %v5385_v52  ;;  %7918 = vst [vmem:[#allocation30_spill] sm:$0xff] %v5387_v0  ;;  %v7922_v52 = vmov 1  }
  0xc9   : > { %862 = vperm.xlu1 %4784, %v5168_v24   ;;  %2233 = vperm.xlu0 %4788, %v5197_v31  }
  0xcb   : > { %v5391_v56 = vpop.permute.xlu1 %423  ;;  %v5393_v60 = vpop.permute.xlu0 %420 }
  0xcc   : > { %7919 = vst [vmem:[#allocation31_spill] sm:$0xff] %v5391_v56  ;;  %7920 = vst [vmem:[#allocation32_spill] sm:$0xff] %v5393_v60 }
  0xcd   : > { %868 = vperm.xlu1 %4784, %v5176_v26   ;;  %2239 = vperm.xlu0 %4788, %v5205_v33  }
  0xcf   : > { %v5397_v62 = vpop.permute.xlu1 %429  ;;  %v5399_v59 = vpop.permute.xlu0 %426 }
  0xd0   : > { %7921 = vst [vmem:[#allocation33_spill] sm:$0xff] %v5399_v59 }
  0xd1   : > { %874 = vperm.xlu1 %4784, %v5184_v28   ;;  %4813 = vset.pattern.permute.xlu0 %v7922_v52 }
  0xd2   : > { %796 = vperm.xlu0 %4813, %v5080_v2  }
  0xd3   : > { %v5404_v0 = vpop.permute.xlu1 %435  ;;  %v5406_v48 = vpop.permute.xlu0 %432 }
  0xd4   : > { %7923 = vst [vmem:[#allocation34_spill] sm:$0xff] %v5404_v0  ;;  %7924 = vst [vmem:[#allocation35_spill] sm:$0xff] %v5406_v48 }
  0xd5   : > { %880 = vperm.xlu1 %4784, %v5192_v30  }
  0xd6   : > { %805 = vperm.xlu0 %4813, %v5085_v3  }
  0xd7   : > { %v5410_v60 = vpop.permute.xlu1 %441  ;;  %v5412_v56 = vpop.permute.xlu0 %438 }
  0xd8   : > { %7925 = vst [vmem:[#allocation36_spill] sm:$0xff] %v5410_v60  ;;  %7926 = vst [vmem:[#allocation37_spill] sm:$0xff] %v5412_v56 }
  0xd9   : > { %886 = vperm.xlu1 %4784, %v5200_v32  }
  0xda   : > { %811 = vperm.xlu0 %4813, %v5093_v5  }
  0xdb   : > { %v5416_v59 = vpop.permute.xlu1 %447  ;;  %v5418_v52 = vpop.permute.xlu0 %444 }
  0xdc   : > { %7927 = vst [vmem:[#allocation38_spill] sm:$0xff] %v5416_v59  ;;  %7928 = vst [vmem:[#allocation39_spill] sm:$0xff] %v5418_v52 }
  0xdd   : > { %892 = vperm.xlu1 %4784, %v5208_v34  }
  0xde   : > { %817 = vperm.xlu0 %4813, %v5101_v7  }
  0xdf   : > { %v5422_v48 = vpop.permute.xlu1 %453  ;;  %v5424_v0 = vpop.permute.xlu0 %450 }
  0xe0   : > { %7929 = vst [vmem:[#allocation40_spill] sm:$0xff] %v5422_v48  ;;  %7930 = vst [vmem:[#allocation41_spill] sm:$0xff] %v5424_v0  ;;  %v7843_v48 = vmov 2  }
  0xe1   : > { %898 = vperm.xlu1 %4784, %v5216_v36  }
  0xe2   : > { %823 = vperm.xlu0 %4813, %v5109_v9  }
  0xe3   : > { %v5428_v56 = vpop.permute.xlu1 %459  ;;  %v5430_v60 = vpop.permute.xlu0 %456 }
  0xe4   : > { %7931 = vst [vmem:[#allocation42_spill] sm:$0xff] %v5428_v56  ;;  %7932 = vst [vmem:[#allocation43_spill] sm:$0xff] %v5430_v60 }
  0xe5   : > { %904 = vperm.xlu1 %4784, %v5224_v38  }
  0xe6   : > { %829 = vperm.xlu0 %4813, %v5117_v11  }
  0xe7   : > { %v5434_v52 = vpop.permute.xlu1 %465  ;;  %v5436_v59 = vpop.permute.xlu0 %462 }
  0xe8   : > { %7933 = vst [vmem:[#allocation44_spill] sm:$0xff] %v5434_v52  ;;  %7934 = vst [vmem:[#allocation45_spill] sm:$0xff] %v5436_v59  ;;  %v7958_v59 = vmov 2  }
  0xe9   : > { %910 = vperm.xlu1 %4784, %v5232_v40  }
  0xea   : > { %835 = vperm.xlu0 %4813, %v5123_v13  }
  0xeb   : > { %v5440_v0 = vpop.permute.xlu1 %471  ;;  %v5442_v36 = vpop.permute.xlu0 %468 }
  0xec   : > { %7935 = vst [vmem:[#allocation46_spill] sm:$0xff] %v5440_v0  ;;  %7936 = vst [vmem:[#allocation47_spill] sm:$0xff] %v5442_v36  ;;  %v7845_v36 = vmov 3  }
  0xed   : > { %916 = vperm.xlu1 %4784, %v5240_v42  }
  0xee   : > { %841 = vperm.xlu0 %4813, %v5131_v15  }
  0xef   : > { %v5446_v60 = vpop.permute.xlu1 %477  ;;  %v5448_v56 = vpop.permute.xlu0 %474 }
  0xf0   : > { %7937 = vst [vmem:[#allocation48_spill] sm:$0xff] %v5446_v60  ;;  %7938 = vst [vmem:[#allocation49_spill] sm:$0xff] %v5448_v56 }
  0xf1   : > { %4785 = vset.pattern.permute.xlu1 %v7843_v48 }
  0xf2   : > { %1244 = vperm.xlu1 %4785, %v5080_v2   ;;  %847 = vperm.xlu0 %4813, %v5139_v17  }
  0xf3   : > { %v5453_v40 = vpop.permute.xlu1 %483  ;;  %v5455_v0 = vpop.permute.xlu0 %480 }
  0xf4   : > { %7939 = vst [vmem:[#allocation50_spill] sm:$0xff] %v5453_v40  ;;  %7940 = vst [vmem:[#allocation51_spill] sm:$0xff] %v5455_v0 }
  0xf6   : > { %1250 = vperm.xlu1 %4785, %v5077_v1   ;;  %853 = vperm.xlu0 %4813, %v5149_v19  }
  0xf7   : > { %v5459_v42 = vpop.permute.xlu1 %489  ;;  %v5461_v60 = vpop.permute.xlu0 %486 }
  0xf8   : > { %7941 = vst [vmem:[#allocation52_spill] sm:$0xff] %v5459_v42  ;;  %7942 = vst [vmem:[#allocation53_spill] sm:$0xff] %v5461_v60 }
  0xfa   : > { %1253 = vperm.xlu1 %4785, %v5085_v3   ;;  %859 = vperm.xlu0 %4813, %v5157_v21  }
  0xfb   : > { %v5465_v48 = vpop.permute.xlu1 %495  ;;  %v5467_v56 = vpop.permute.xlu0 %492 }
  0xfc   : > { %7943 = vst [vmem:[#allocation54_spill] sm:$0xff] %v5465_v48  ;;  %7944 = vst [vmem:[#allocation55_spill] sm:$0xff] %v5467_v56 }
  0xfe   : > { %4786 = vset.pattern.permute.xlu1 %v7845_v36  ;;  %865 = vperm.xlu0 %4813, %v5165_v23   ;;  %v7950_v36 = vmov 4  }
  0xff   : > { %v5471_v0 = vpop.permute.xlu1 %501  ;;  %1695 = vperm.xlu1 %4786, %v5088_v4   ;;  %v5474_v42 = vpop.permute.xlu0 %498 }
 0x100   : > { %7945 = vst [vmem:[#allocation56_spill] sm:$0xff] %v5471_v0  ;;  %7946 = vst [vmem:[#allocation57_spill] sm:$0xff] %v5474_v42 }
 0x102   : > { %871 = vperm.xlu0 %4813, %v5173_v25  }
 0x103   : > { %v5477_v60 = vpop.permute.xlu1 %507  ;;  %1698 = vperm.xlu1 %4786, %v5077_v1   ;;  %v5480_v48 = vpop.permute.xlu0 %504 }
 0x104   : > { %7947 = vst [vmem:[#allocation58_spill] sm:$0xff] %v5477_v60  ;;  %7948 = vst [vmem:[#allocation59_spill] sm:$0xff] %v5480_v48 }
 0x106   : > { %877 = vperm.xlu0 %4813, %v5181_v27  }
 0x107   : > { %v5483_v56 = vpop.permute.xlu1 %513  ;;  %4787 = vset.pattern.permute.xlu1 %v7950_v36  ;;  %v5486_v40 = vpop.permute.xlu0 %510 }
 0x108   : > { %7949 = vst [vmem:[#allocation60_spill] sm:$0xff] %v5483_v56  ;;  %7951 = vst [vmem:[#allocation61_spill] sm:$0xff] %v5486_v40  ;;  %2140 = vperm.xlu1 %4787, %v5080_v2  }
 0x10a   : > { %883 = vperm.xlu0 %4813, %v5189_v29  }
 0x10b   : > { %v5490_v42 = vpop.permute.xlu1 %519  ;;  %v5492_v0 = vpop.permute.xlu0 %516 }
 0x10c   : > { %7952 = vst [vmem:[#allocation62_spill] sm:$0xff] %v5490_v42  ;;  %7953 = vst [vmem:[#allocation63_spill] sm:$0xff] %v5492_v0  ;;  %2146 = vperm.xlu1 %4787, %v5077_v1  }
 0x10e   : > { %889 = vperm.xlu0 %4813, %v5197_v31  }
 0x10f   : > { %v5496_v48 = vpop.permute.xlu1 %525  ;;  %v5498_v60 = vpop.permute.xlu0 %522 }
 0x110   : > { %7954 = vst [vmem:[#allocation64_spill] sm:$0xff] %v5496_v48  ;;  %7955 = vst [vmem:[#allocation65_spill] sm:$0xff] %v5498_v60  ;;  %2149 = vperm.xlu1 %4787, %v5085_v3  }
 0x112   : > { %895 = vperm.xlu0 %4813, %v5205_v33  }
 0x113   : > { %v5502_v40 = vpop.permute.xlu1 %531  ;;  %v5504_v56 = vpop.permute.xlu0 %528 }
 0x114   : > { %7956 = vst [vmem:[#allocation66_spill] sm:$0xff] %v5502_v40  ;;  %7957 = vst [vmem:[#allocation67_spill] sm:$0xff] %v5504_v56  ;;  %4789 = vset.pattern.permute.xlu1 %v7958_v59  ;;  %v7962_v40 = vmov 3  }
 0x115   : > { %1259 = vperm.xlu1 %4789, %v5093_v5  }
 0x116   : > { %901 = vperm.xlu0 %4813, %v5213_v35  }
 0x117   : > { %v5509_v1 = vpop.permute.xlu1 %537  ;;  %v5511_v0 = vpop.permute.xlu0 %534 }
 0x118   : > { %7959 = vst [vmem:[#allocation68_spill] sm:$0xff] %v5509_v1  ;;  %7960 = vst [vmem:[#allocation69_spill] sm:$0xff] %v5511_v0 }
 0x119   : > { %1262 = vperm.xlu1 %4789, %v5104_v8  }
 0x11a   : > { %907 = vperm.xlu0 %4813, %v5221_v37  }
 0x11c   : > { %v5515_v60 = vpop.permute.xlu1 %799  ;;  %v5517_v48 = vpop.permute.xlu0 %2143 }
 0x11d   : > { %7961 = vst [vmem:[#allocation70_spill] sm:$0xff] %v5517_v48  ;;  %4790 = vset.pattern.permute.xlu1 %v7962_v40 }
 0x11e   : > { %1704 = vperm.xlu1 %4790, %v5096_v6   ;;  %913 = vperm.xlu0 %4813, %v5229_v39  }
 0x120   : > { %v5522_v56 = vpop.permute.xlu1 %802  ;;  %v5524_v42 = vpop.permute.xlu0 %2152 }
 0x121   : > { %7963 = vst [vmem:[#allocation71_spill] sm:$0xff] %v5522_v56  ;;  %7964 = vst [vmem:[#allocation72_spill] sm:$0xff] %v5524_v42 }
 0x122   : > { %1710 = vperm.xlu1 %4790, %v5104_v8   ;;  %919 = vperm.xlu0 %4813, %v5237_v41  }
 0x124   : > { %v5528_v0 = vpop.permute.xlu1 %808  ;;  %v5530_v1 = vpop.permute.xlu0 %2161 }
 0x125   : > { %7965 = vst [vmem:[#allocation73_spill] sm:$0xff] %v5530_v1 }
 0x126   : > { %1713 = vperm.xlu1 %4790, %v5101_v7   ;;  %925 = vperm.xlu0 %4813, %v5245_v43  }
 0x128   : > { %v5534_v52 = vpop.permute.xlu1 %814  ;;  %v5536_v48 = vpop.permute.xlu0 %2167 }
 0x129   : > { %7966 = vst [vmem:[#allocation74_spill] sm:$0xff] %v5534_v52  ;;  %7967 = vst [vmem:[#allocation75_spill] sm:$0xff] %v5536_v48 }
 0x12a   : > { %4791 = vset.pattern.permute.xlu1 %v7950_v36  ;;  %931 = vperm.xlu0 %4813, %v5253_v45  }
 0x12b   : > { %2155 = vperm.xlu1 %4791, %v5093_v5  }
 0x12c   : > { %v5541_v42 = vpop.permute.xlu1 %820  ;;  %v5543_v56 = vpop.permute.xlu0 %2176 }
 0x12d   : > { %7968 = vst [vmem:[#allocation76_spill] sm:$0xff] %v5543_v56 }
 0x12e   : > { %943 = vperm.xlu0 %4813, %v5266_v49  }
 0x12f   : > { %2158 = vperm.xlu1 %4791, %v5104_v8  }
 0x130   : > { %v5547_v1 = vpop.permute.xlu1 %826  ;;  %v5549_v43 = vpop.permute.xlu0 %2185 }
 0x131   : > { %7969 = vst [vmem:[#allocation77_spill] sm:$0xff] %v5547_v1  ;;  %7970 = vst [vmem:[#allocation78_spill] sm:$0xff] %v5549_v43 }
 0x132   : > { %955 = vperm.xlu0 %4813, %v5279_v53  }
 0x133   : > { %4792 = vset.pattern.permute.xlu1 %v7958_v59 }
 0x134   : > { %v5553_v48 = vpop.permute.xlu1 %832  ;;  %1268 = vperm.xlu1 %4792, %v5112_v10   ;;  %v5556_v52 = vpop.permute.xlu0 %2191 }
 0x135   : > { %7971 = vst [vmem:[#allocation79_spill] sm:$0xff] %v5556_v52 }
 0x136   : > { %967 = vperm.xlu0 %4813, %v5292_v57  }
 0x138   : > { %v5559_v56 = vpop.permute.xlu1 %838  ;;  %1274 = vperm.xlu1 %4792, %v5120_v12   ;;  %v5562_v8 = vpop.permute.xlu0 %2200 }
 0x139   : > { %7972 = vst [vmem:[#allocation80_spill] sm:$0xff] %v5559_v56  ;;  %7973 = vst [vmem:[#allocation81_spill] sm:$0xff] %v5562_v8 }
 0x13a   : > { %979 = vperm.xlu0 %4813, %v5305_v61  }
 0x13c   : > { %v5565_v43 = vpop.permute.xlu1 %844  ;;  %1277 = vperm.xlu1 %4792, %v5117_v11   ;;  %v5568_v1 = vpop.permute.xlu0 %2209 }
 0x13d   : > { %7974 = vst [vmem:[#allocation82_spill] sm:$0xff] %v5565_v43  ;;  %7975 = vst [vmem:[#allocation83_spill] sm:$0xff] %v5568_v1 }
 0x13e   : > { %4838 = vset.pattern.permute.xlu0 %v7958_v59 }
 0x13f   : > { %1247 = vperm.xlu0 %4838, %v5088_v4  }
 0x140   : > { %v5572_v52 = vpop.permute.xlu1 %850  ;;  %4793 = vset.pattern.permute.xlu1 %v7962_v40  ;;  %v5575_v56 = vpop.permute.xlu0 %2215 }
 0x141   : > { %7976 = vst [vmem:[#allocation84_spill] sm:$0xff] %v5575_v56  ;;  %1719 = vperm.xlu1 %4793, %v5109_v9  }
 0x143   : > { %1256 = vperm.xlu0 %4838, %v5096_v6  }
 0x144   : > { %v5579_v8 = vpop.permute.xlu1 %856  ;;  %v5581_v43 = vpop.permute.xlu0 %2224 }
 0x145   : > { %7977 = vst [vmem:[#allocation85_spill] sm:$0xff] %v5581_v43  ;;  %1722 = vperm.xlu1 %4793, %v5120_v12  }
 0x147   : > { %1265 = vperm.xlu0 %4838, %v5101_v7  }
 0x148   : > { %v5585_v1 = vpop.permute.xlu1 %862  ;;  %v5587_v4 = vpop.permute.xlu0 %2233 }
 0x149   : > { %7978 = vst [vmem:[#allocation86_spill] sm:$0xff] %v5585_v1  ;;  %7979 = vst [vmem:[#allocation87_spill] sm:$0xff] %v5587_v4  ;;  %4794 = vset.pattern.permute.xlu1 %v7950_v36 }
 0x14a   : > { %2164 = vperm.xlu1 %4794, %v5112_v10  }
 0x14b   : > { %1271 = vperm.xlu0 %4838, %v5109_v9  }
 0x14c   : > { %v5592_v56 = vpop.permute.xlu1 %868  ;;  %v5594_v6 = vpop.permute.xlu0 %2239 }
 0x14d   : > { %7980 = vst [vmem:[#allocation88_spill] sm:$0xff] %v5592_v56  ;;  %7981 = vst [vmem:[#allocation89_spill] sm:$0xff] %v5594_v6 }
 0x14e   : > { %2170 = vperm.xlu1 %4794, %v5120_v12  }
 0x14f   : > { %1280 = vperm.xlu0 %4838, %v5128_v14  }
 0x150   : > { %v5598_v43 = vpop.permute.xlu1 %874 }
 0x151   : > { %7982 = vst [vmem:[#allocation90_spill] sm:$0xff] %v5598_v43  ;;  %v5600_v7 = vpop.permute.xlu0 %796 }
 0x152   : > { %2173 = vperm.xlu1 %4794, %v5117_v11  }
 0x153   : > { %1289 = vperm.xlu0 %4838, %v5131_v15  }
 0x154   : > { %v5604_v4 = vpop.permute.xlu1 %880 }
 0x155   : > { %7983 = vst [vmem:[#allocation91_spill] sm:$0xff] %v5604_v4  ;;  %v5606_v1 = vpop.permute.xlu0 %805 }
 0x156   : > { %4795 = vset.pattern.permute.xlu1 %v7958_v59 }
 0x157   : > { %1283 = vperm.xlu1 %4795, %v5123_v13   ;;  %1295 = vperm.xlu0 %4838, %v5139_v17  }
 0x158   : > { %v5611_v9 = vpop.permute.xlu1 %886 }
 0x159   : > { %7984 = vst [vmem:[#allocation92_spill] sm:$0xff] %v5611_v9  ;;  %v5613_v12 = vpop.permute.xlu0 %811 }
 0x15a   : > { %7985 = vst [vmem:[#allocation93_spill] sm:$0xff] %v5613_v12 }
 0x15b   : > { %1286 = vperm.xlu1 %4795, %v5134_v16   ;;  %1304 = vperm.xlu0 %4838, %v5160_v22  }
 0x15c   : > { %v5617_v6 = vpop.permute.xlu1 %892 }
 0x15d   : > { %7986 = vst [vmem:[#allocation94_spill] sm:$0xff] %v5617_v6  ;;  %v5619_v43 = vpop.permute.xlu0 %817 }
 0x15e   : > { %7987 = vst [vmem:[#allocation95_spill] sm:$0xff] %v5619_v43 }
 0x15f   : > { %4796 = vset.pattern.permute.xlu1 %v7962_v40  ;;  %1313 = vperm.xlu0 %4838, %v5165_v23  }
 0x160   : > { %v5623_v4 = vpop.permute.xlu1 %898  ;;  %1728 = vperm.xlu1 %4796, %v5128_v14  }
 0x161   : > { %7988 = vst [vmem:[#allocation96_spill] sm:$0xff] %v5623_v4  ;;  %v5626_v56 = vpop.permute.xlu0 %823 }
 0x163   : > { %1319 = vperm.xlu0 %4838, %v5173_v25  }
 0x164   : > { %v5629_v9 = vpop.permute.xlu1 %904  ;;  %1734 = vperm.xlu1 %4796, %v5134_v16  }
 0x165   : > { %7989 = vst [vmem:[#allocation97_spill] sm:$0xff] %v5629_v9  ;;  %v5632_v12 = vpop.permute.xlu0 %829 }
 0x167   : > { %1328 = vperm.xlu0 %4838, %v5192_v30  }
 0x168   : > { %v5635_v6 = vpop.permute.xlu1 %910  ;;  %1737 = vperm.xlu1 %4796, %v5131_v15  }
 0x169   : > { %7990 = vst [vmem:[#allocation98_spill] sm:$0xff] %v5635_v6  ;;  %v5638_v43 = vpop.permute.xlu0 %835 }
 0x16b   : > { %1337 = vperm.xlu0 %4838, %v5197_v31  }
 0x16c   : > { %v5641_v14 = vpop.permute.xlu1 %916  ;;  %4797 = vset.pattern.permute.xlu1 %v7950_v36 }
 0x16d   : > { %7991 = vst [vmem:[#allocation99_spill] sm:$0xff] %v5641_v14  ;;  %2179 = vperm.xlu1 %4797, %v5123_v13   ;;  %v5645_v9 = vpop.permute.xlu0 %841 }
 0x16e   : > { %7992 = vst [vmem:[#allocation100_spill] sm:$0xff] %v5645_v9 }
 0x16f   : > { %1343 = vperm.xlu0 %4838, %v5205_v33  }
 0x171   : > { %2182 = vperm.xlu1 %4797, %v5134_v16   ;;  %v5649_v4 = vpop.permute.xlu1 %1244  ;;  %v5651_v6 = vpop.permute.xlu0 %847 }
 0x172   : > { %7993 = vst [vmem:[#allocation101_spill] sm:$0xff] %v5649_v4 }
 0x173   : > { %1352 = vperm.xlu0 %4838, %v5224_v38  }
 0x175   : > { %4798 = vset.pattern.permute.xlu1 %v7958_v59  ;;  %v5655_v15 = vpop.permute.xlu1 %1250  ;;  %v5657_v14 = vpop.permute.xlu0 %853 }
 0x176   : > { %7994 = vst [vmem:[#allocation102_spill] sm:$0xff] %v5655_v15  ;;  %1292 = vperm.xlu1 %4798, %v5142_v18  }
 0x177   : > { %1361 = vperm.xlu0 %4838, %v5229_v39  }
 0x179   : > { %v5661_v9 = vpop.permute.xlu1 %1253  ;;  %v5663_v33 = vpop.permute.xlu0 %859 }
 0x17a   : > { %7995 = vst [vmem:[#allocation103_spill] sm:$0xff] %v5663_v33  ;;  %1298 = vperm.xlu1 %4798, %v5152_v20  }
 0x17b   : > { %1370 = vperm.xlu0 %4838, %v5248_v44  }
 0x17d   : > { %v5667_v16 = vpop.permute.xlu0 %865 }
 0x17e   : > { %1301 = vperm.xlu1 %4798, %v5149_v19   ;;  %v5670_v4 = vpop.permute.xlu1 %1695 }
 0x17f   : > { %7996 = vst [vmem:[#allocation104_spill] sm:$0xff] %v5670_v4  ;;  %1376 = vperm.xlu0 %4838, %v5256_v46  }
 0x181   : > { %v5673_v15 = vpop.permute.xlu0 %871 }
 0x182   : > { %4799 = vset.pattern.permute.xlu1 %v7962_v40  ;;  %v5676_v39 = vpop.permute.xlu1 %1698 }
 0x183   : > { %1743 = vperm.xlu1 %4799, %v5139_v17   ;;  %1385 = vperm.xlu0 %4838, %v5261_v47  }
 0x185   : > { %v5680_v33 = vpop.permute.xlu0 %877 }
 0x186   : > { %7997 = vst [vmem:[#allocation105_spill] sm:$0xff] %v5680_v33 }
 0x187   : > { %1746 = vperm.xlu1 %4799, %v5152_v20   ;;  %v5683_v44 = vpop.permute.xlu1 %2140  ;;  %1388 = vperm.xlu0 %4838, %v5269_v50   ;;  %v4844_v50 = vld [vmem:[%s7823_s1] sm:$0xff]  }
 0x188   : > { %4479 = vmatprep.subr.bf16.mxu0 %v4844_v50  ;;  %4719 = vmatprep.subr.bf16.mxu1 %v4844_v50 }
 0x189   : > { %v5686_v4 = vpop.permute.xlu0 %883  ;;  %4480 = vmatpush3.bf16.msra.mxu0 %v4844_v50  ;;  %4727 = vmatpush3.bf16.msra.mxu1 %v4844_v50 }
 0x18a   : > { %7998 = vst [vmem:[#allocation106_spill] sm:$0xff] %v5686_v4  ;;  %v8005_v4 = vld [vmem:[#allocation6_spill] sm:$0xff] }
 0x18b   : > { %4800 = vset.pattern.permute.xlu1 %v7950_v36  ;;  %v5689_v46 = vpop.permute.xlu1 %2146  ;;  %1397 = vperm.xlu0 %4838, %v5274_v51  }
 0x18c   : > { %2188 = vperm.xlu1 %4800, %v5142_v18  }
 0x18d   : > { %v5693_v17 = vpop.permute.xlu0 %889 }
 0x18e   : > { %7999 = vst [vmem:[#allocation107_spill] sm:$0xff] %v5693_v17 }
 0x18f   : > { %v5695_v47 = vpop.permute.xlu1 %2149  ;;  %1400 = vperm.xlu0 %4838, %v5282_v54  }
 0x190   : > { %2194 = vperm.xlu1 %4800, %v5152_v20   ;;  %v4845_v20 = vld [vmem:[%s7823_s1 + $0x8] sm:$0xff]  }
 0x191   : > { %v5699_v33 = vpop.permute.xlu0 %895  ;;  %4481 = vmatprep.subr.bf16.mxu0 %v4845_v20  ;;  %4720 = vmatprep.subr.bf16.mxu1 %v4845_v20 }
 0x192   : > { %8000 = vst [vmem:[#allocation108_spill] sm:$0xff] %v5699_v33  ;;  %4482 = vmatpush3.bf16.msra.mxu0 %v4845_v20  ;;  %v8003_v33 = vld [vmem:[#allocation5_spill] sm:$0xff]  ;;  %4728 = vmatpush3.bf16.msra.mxu1 %v4845_v20 }
 0x193   : > { %1409 = vperm.xlu0 %4838, %v5287_v55  }
 0x194   : > { %2197 = vperm.xlu1 %4800, %v5149_v19   ;;  %v5706_v51 = vpop.permute.xlu1 %1259 }
 0x195   : > { %v5708_v17 = vpop.permute.xlu0 %901 }
 0x196   : > { %8001 = vst [vmem:[#allocation109_spill] sm:$0xff] %v5708_v17  ;;  %v4846_v17 = vld [vmem:[%s7823_s1 + $0x10] sm:$0xff]  }
 0x197   : > { %1412 = vperm.xlu0 %4838, %v5295_v58   ;;  %4483 = vmatprep.subr.bf16.mxu0 %v4846_v17 }
 0x198   : > { %4801 = vset.pattern.permute.xlu1 %v7958_v59  ;;  %v5715_v54 = vpop.permute.xlu1 %1262  ;;  %4721 = vmatprep.subr.bf16.mxu1 %v4846_v17 }
 0x199   : > { %1307 = vperm.xlu1 %4801, %v5157_v21   ;;  %v5718_v55 = vpop.permute.xlu0 %907  ;;  %4484 = vmatpush3.bf16.msra.mxu0 %v4846_v17 }
 0x19a   : > { %8002 = vst [vmem:[#allocation110_spill] sm:$0xff] %v5718_v55  ;;  %v4847_v55 = vld [vmem:[%s7823_s1 + $0x18] sm:$0xff]   ;;  %4729 = vmatpush3.bf16.msra.mxu1 %v4846_v17 }
 0x19b   : > { %1421 = vperm.xlu0 %4838, %v8003_v33   ;;  %4485 = vmatprep.subr.bf16.mxu0 %v4847_v55 }
 0x19c   : > { %4722 = vmatprep.subr.bf16.mxu1 %v4847_v55 }
 0x19d   : > { %1310 = vperm.xlu1 %4801, %v5168_v24   ;;  %v5725_v58 = vpop.permute.xlu1 %1704  ;;  %v5727_v50 = vpop.permute.xlu0 %913  ;;  %4486 = vmatpush3.bf16.msra.mxu0 %v4847_v55 }
 0x19e   : > { %8004 = vst [vmem:[#allocation5_spill] sm:$0xff] %v5727_v50  ;;  %v4848_v50 = vld [vmem:[%s7823_s1 + $0x20] sm:$0xff]   ;;  %4730 = vmatpush3.bf16.msra.mxu1 %v4847_v55 }
 0x19f   : > { %1424 = vperm.xlu0 %4838, %v8005_v4   ;;  %4487 = vmatprep.subr.bf16.mxu0 %v4848_v50 }
 0x1a0   : > { %4723 = vmatprep.subr.bf16.mxu1 %v4848_v50 }
 0x1a1   : > { %4802 = vset.pattern.permute.xlu1 %v7962_v40  ;;  %v5734_v33 = vpop.permute.xlu1 %1710  ;;  %v5736_v20 = vpop.permute.xlu0 %919  ;;  %4488 = vmatpush3.bf16.msra.mxu0 %v4848_v50 }
 0x1a2   : > { %8006 = vst [vmem:[#allocation6_spill] sm:$0xff] %v5736_v20  ;;  %1752 = vperm.xlu1 %4802, %v5160_v22   ;;  %v4849_v22 = vld [vmem:[%s7823_s1 + $0x28] sm:$0xff]   ;;  %4731 = vmatpush3.bf16.msra.mxu1 %v4848_v50 }
 0x1a3   : > { %1433 = vperm.xlu0 %4838, %v5313_v63   ;;  %4489 = vmatprep.subr.bf16.mxu0 %v4849_v22 }
 0x1a4   : > { %4724 = vmatprep.subr.bf16.mxu1 %v4849_v22 }
 0x1a5   : > { %v5743_v4 = vpop.permute.xlu1 %1713  ;;  %v5745_v17 = vpop.permute.xlu0 %925  ;;  %4490 = vmatpush3.bf16.msra.mxu0 %v4849_v22 }
 0x1a6   : > { %8007 = vst [vmem:[#allocation111_spill] sm:$0xff] %v5745_v17  ;;  %1758 = vperm.xlu1 %4802, %v5168_v24   ;;  %v4850_v17 = vld [vmem:[%s7823_s1 + $0x30] sm:$0xff]   ;;  %4732 = vmatpush3.bf16.msra.mxu1 %v4849_v22 }
 0x1a7   : > { %4840 = vset.pattern.permute.xlu0 %v7962_v40  ;;  %4491 = vmatprep.subr.bf16.mxu0 %v4850_v17 }
 0x1a8   : > { %1692 = vperm.xlu0 %4840, %v5080_v2   ;;  %4725 = vmatprep.subr.bf16.mxu1 %v4850_v17 }
 0x1a9   : > { %v5753_v63 = vpop.permute.xlu0 %931  ;;  %4492 = vmatpush3.bf16.msra.mxu0 %v4850_v17 }
 0x1aa   : > { %8008 = vst [vmem:[#allocation112_spill] sm:$0xff] %v5753_v63  ;;  %1761 = vperm.xlu1 %4802, %v5165_v23   ;;  %v5756_v55 = vpop.permute.xlu1 %2155  ;;  %v4851_v23 = vld [vmem:[%s7823_s1 + $0x38] sm:$0xff]   ;;  %4733 = vmatpush3.bf16.msra.mxu1 %v4850_v17 }
 0x1ab   : > { %4493 = vmatprep.subr.bf16.mxu0 %v4851_v23  ;;  %4726 = vmatprep.subr.bf16.mxu1 %v4851_v23 }
 0x1ac   : > { %1701 = vperm.xlu0 %4840, %v5085_v3  }
 0x1ad   : > { %v5762_v50 = vpop.permute.xlu0 %943  ;;  %4494 = vmatpush3.bf16.msra.mxu0 %v4851_v23 }
 0x1ae   : > { %8009 = vst [vmem:[#allocation113_spill] sm:$0xff] %v5762_v50  ;;  %4803 = vset.pattern.permute.xlu1 %v7950_v36  ;;  %v5765_v2 = vpop.permute.xlu1 %2158  ;;  %4734 = vmatpush3.bf16.msra.mxu1 %v4851_v23 }
 0x1af   : > { %8010 = vst [vmem:[#allocation114_spill] sm:$0xff] %v5765_v2  ;;  %2203 = vperm.xlu1 %4803, %v5157_v21  }
 0x1b0   : > { %1707 = vperm.xlu0 %4840, %v5093_v5  }
 0x1b1   : > { %v5772_v3 = vpop.permute.xlu0 %955 }
 0x1b2   : > { %8011 = vst [vmem:[#allocation115_spill] sm:$0xff] %v5772_v3 }
 0x1b3   : > { %2206 = vperm.xlu1 %4803, %v5168_v24   ;;  %v5775_v22 = vpop.permute.xlu1 %1268 }
 0x1b4   : > { %8012 = vst [vmem:[#allocation116_spill] sm:$0xff] %v5775_v22  ;;  %1716 = vperm.xlu0 %4840, %v5112_v10  }
 0x1b5   : > { %v5778_v50 = vpop.permute.xlu0 %967 }
 0x1b6   : > { %8013 = vst [vmem:[#allocation117_spill] sm:$0xff] %v5778_v50 }
 0x1b7   : > { %4804 = vset.pattern.permute.xlu1 %v7958_v59  ;;  %v5781_v63 = vpop.permute.xlu1 %1274 }
 0x1b8   : > { %8014 = vst [vmem:[#allocation118_spill] sm:$0xff] %v5781_v63  ;;  %1316 = vperm.xlu1 %4804, %v5176_v26   ;;  %1725 = vperm.xlu0 %4840, %v5117_v11  }
 0x1b9   : > { %v5785_v5 = vpop.permute.xlu0 %979 }
 0x1ba   : > { %8015 = vst [vmem:[#allocation119_spill] sm:$0xff] %v5785_v5 }
 0x1bb   : > { %v5787_v17 = vpop.permute.xlu1 %1277 }
 0x1bc   : > { %8016 = vst [vmem:[#allocation120_spill] sm:$0xff] %v5787_v17  ;;  %1322 = vperm.xlu1 %4804, %v5184_v28   ;;  %1731 = vperm.xlu0 %4840, %v5123_v13  }
 0x1be   : > { %v5791_v24 = vpop.permute.xlu0 %1247 }
 0x1c0   : > { %1325 = vperm.xlu1 %4804, %v5181_v27   ;;  %v5794_v10 = vpop.permute.xlu1 %1719  ;;  %1740 = vperm.xlu0 %4840, %v5142_v18  }
 0x1c1   : > { %8017 = vst [vmem:[#allocation121_spill] sm:$0xff] %v5794_v10 }
 0x1c2   : > { %v5797_v23 = vpop.permute.xlu0 %1256 }
 0x1c4   : > { %4805 = vset.pattern.permute.xlu1 %v7962_v40  ;;  %v5800_v11 = vpop.permute.xlu1 %1722  ;;  %1749 = vperm.xlu0 %4840, %v5149_v19  }
 0x1c5   : > { %8018 = vst [vmem:[#allocation122_spill] sm:$0xff] %v5800_v11  ;;  %1767 = vperm.xlu1 %4805, %v5173_v25  }
 0x1c6   : > { %v5804_v5 = vpop.permute.xlu0 %1265 }
 0x1c8   : > { %1755 = vperm.xlu0 %4840, %v5157_v21  }
 0x1c9   : > { %1770 = vperm.xlu1 %4805, %v5184_v28   ;;  %v5808_v13 = vpop.permute.xlu1 %2164 }
 0x1ca   : > { %8019 = vst [vmem:[#allocation123_spill] sm:$0xff] %v5808_v13  ;;  %v5810_v50 = vpop.permute.xlu0 %1271  ;;  %v6007_v13 = vld [vmem:[%s5074_s17 + $0x118] sm:$0xff] }
 0x1cb   : > { %8020 = vst [vmem:[#allocation124_spill] sm:$0xff] %v5810_v50 }
 0x1cc   : > { %1764 = vperm.xlu0 %4840, %v5176_v26  }
 0x1cd   : > { %4806 = vset.pattern.permute.xlu1 %v7950_v36  ;;  %v5814_v18 = vpop.permute.xlu1 %2170 }
 0x1ce   : > { %8021 = vst [vmem:[#allocation125_spill] sm:$0xff] %v5814_v18  ;;  %2212 = vperm.xlu1 %4806, %v5176_v26   ;;  %v5817_v19 = vpop.permute.xlu0 %1280 }
 0x1cf   : > { %8022 = vst [vmem:[#allocation126_spill] sm:$0xff] %v5817_v19 }
 0x1d0   : > { %1773 = vperm.xlu0 %4840, %v5181_v27  }
 0x1d1   : > { %v5820_v25 = vpop.permute.xlu1 %2173 }
 0x1d2   : > { %8023 = vst [vmem:[#allocation127_spill] sm:$0xff] %v5820_v25  ;;  %2218 = vperm.xlu1 %4806, %v5184_v28   ;;  %v5823_v21 = vpop.permute.xlu0 %1289 }
 0x1d3   : > { %8024 = vst [vmem:[#allocation128_spill] sm:$0xff] %v5823_v21 }
 0x1d4   : > { %1779 = vperm.xlu0 %4840, %v5189_v29  }
 0x1d6   : > { %2221 = vperm.xlu1 %4806, %v5181_v27   ;;  %v5827_v3 = vpop.permute.xlu1 %1283  ;;  %v5829_v20 = vpop.permute.xlu0 %1295 }
 0x1d7   : > { %8025 = vst [vmem:[#allocation129_spill] sm:$0xff] %v5827_v3  ;;  %8026 = vst [vmem:[#allocation130_spill] sm:$0xff] %v5829_v20 }
 0x1d8   : > { %1788 = vperm.xlu0 %4840, %v5208_v34  }
 0x1da   : > { %4807 = vset.pattern.permute.xlu1 %v7958_v59  ;;  %v5833_v26 = vpop.permute.xlu1 %1286  ;;  %v5835_v18 = vpop.permute.xlu0 %1304 }
 0x1db   : > { %8027 = vst [vmem:[#allocation131_spill] sm:$0xff] %v5833_v26  ;;  %8028 = vst [vmem:[#allocation132_spill] sm:$0xff] %v5835_v18  ;;  %1331 = vperm.xlu1 %4807, %v5189_v29   ;;  %v8057_v26 = vld [vmem:[#allocation19_spill] sm:$0xff] }
 0x1dc   : > { %1797 = vperm.xlu0 %4840, %v5213_v35  }
 0x1de   : > { %v5839_v28 = vpop.permute.xlu0 %1313 }
 0x1df   : > { %8029 = vst [vmem:[#allocation133_spill] sm:$0xff] %v5839_v28  ;;  %1334 = vperm.xlu1 %4807, %v5200_v32   ;;  %v5842_v27 = vpop.permute.xlu1 %1728  ;;  %v345_v28 = vlaneseq }
 0x1e0   : > { %8030 = vst [vmem:[#allocation134_spill] sm:$0xff] %v5842_v27  ;;  %1803 = vperm.xlu0 %4840, %v5221_v37  }
 0x1e2   : > { %v5845_v20 = vpop.permute.xlu0 %1319 }
 0x1e3   : > { %8031 = vst [vmem:[#allocation135_spill] sm:$0xff] %v5845_v20  ;;  %4808 = vset.pattern.permute.xlu1 %v7962_v40  ;;  %v5848_v21 = vpop.permute.xlu1 %1734 }
 0x1e4   : > { %8032 = vst [vmem:[#allocation136_spill] sm:$0xff] %v5848_v21  ;;  %1776 = vperm.xlu1 %4808, %v5192_v30   ;;  %1815 = vperm.xlu0 %4840, %v5237_v41   ;;  %v5864_v30 = vand.u32 127, %v345_v28 }
 0x1e6   : > { %v5852_v18 = vpop.permute.xlu0 %1328  ;;  %vm552_vm12 = vcmp.eq.s32.totalorder %v5864_v30, %v8057_v26 }
 0x1e7   : > { %8033 = vst [vmem:[#allocation137_spill] sm:$0xff] %v5852_v18  ;;  %v5854_v35 = vpop.permute.xlu1 %1737 }
 0x1e8   : > { %8034 = vst [vmem:[#allocation138_spill] sm:$0xff] %v5854_v35  ;;  %1782 = vperm.xlu1 %4808, %v5200_v32   ;;  %1827 = vperm.xlu0 %4840, %v5253_v45   ;;  %v8039_v45 = vld [vmem:[#allocation7_spill] sm:$0xff] }
 0x1e9   : > { %vm541_vm0 = vcmp.eq.s32.totalorder %v5864_v30, %v8039_v45  ;;  %v8045_v45 = vld [vmem:[#allocation11_spill] sm:$0xff] }
 0x1ea   : > { %v5858_v37 = vpop.permute.xlu0 %1337  ;;  %vm544_vm4 = vcmp.eq.s32.totalorder %v5864_v30, %v8045_v45  ;;  %v8053_v45 = vld [vmem:[#allocation18_spill] sm:$0xff] }
 0x1eb   : > { %8035 = vst [vmem:[#allocation139_spill] sm:$0xff] %v5858_v37  ;;  %vm549_vm11 = vcmp.eq.s32.totalorder %v5864_v30, %v8053_v45 }
 0x1ec   : > { %1785 = vperm.xlu1 %4808, %v5197_v31   ;;  %v5861_v20 = vpop.permute.xlu1 %2179  ;;  %1839 = vperm.xlu0 %4840, %v5266_v49   ;;  %v8040_v31 = vld [vmem:[#allocation9_spill] sm:$0xff]  ;;  %v7860_v49 = vmov 0.0  }
 0x1ed   : > { %8036 = vst [vmem:[#allocation140_spill] sm:$0xff] %v5861_v20  ;;  %vm542_vm1 = vcmp.eq.s32.totalorder %v5864_v30, %v8040_v31  ;;  %v4008_v28 = vsel %vm541_vm0, 1.0, %v7860_v49  ;;  %v8046_v31 = vld [vmem:[#allocation12_spill] sm:$0xff] }
 0x1ee   : > { %v5866_v41 = vpop.permute.xlu0 %1343  ;;  %vm543_vm5 = vcmp.eq.s32.totalorder %v5864_v30, %v8046_v31  ;;  %v8054_v31 = vmov 0.0  }
 0x1ef   : > { %8037 = vst [vmem:[#allocation141_spill] sm:$0xff] %v5866_v41  ;;  %v8042_v41 = vld [vmem:[#allocation8_spill] sm:$0xff]  ;;  %v5939_v21 = vsel %vm549_vm11, 1.0, %v8054_v31 }
 0x1f0   : > { %4809 = vset.pattern.permute.xlu1 %v7950_v36  ;;  %v5869_v18 = vpop.permute.xlu1 %2182  ;;  %1851 = vperm.xlu0 %4840, %v5279_v53   ;;  %vm539_vm2 = vcmp.eq.s32.totalorder %v5864_v30, %v8042_v41  ;;  %v4009_v53 = vsel %vm542_vm1, 1.0, %v7860_v49  ;;  %v8050_v49 = vld [vmem:[#allocation15_spill] sm:$0xff] }
 0x1f1   : > { %8038 = vst [vmem:[#allocation142_spill] sm:$0xff] %v5869_v18  ;;  %2227 = vperm.xlu1 %4809, %v5189_v29   ;;  %v8043_v18 = vld [vmem:[#allocation10_spill] sm:$0xff]  ;;  %vm548_vm8 = vcmp.eq.s32.totalorder %v5864_v30, %v8050_v49  ;;  %v5908_v35 = vsel %vm539_vm2, 1.0, %v8054_v31  ;;  %v5915_v49 = vsel %vm544_vm4, 1.0, %v8054_v31 }
 0x1f2   : > { %v5877_v37 = vpop.permute.xlu0 %1352  ;;  %vm540_vm3 = vcmp.eq.s32.totalorder %v5864_v30, %v8043_v18  ;;  %v8052_v18 = vld [vmem:[#allocation17_spill] sm:$0xff] }
 0x1f3   : > { %8041 = vst [vmem:[#allocation7_spill] sm:$0xff] %v5877_v37  ;;  %v8048_v37 = vld [vmem:[#allocation14_spill] sm:$0xff]  ;;  %vm550_vm10 = vcmp.eq.s32.totalorder %v5864_v30, %v8052_v18 }
 0x1f4   : > { %1863 = vperm.xlu0 %4840, %v5292_v57   ;;  %v8047_v57 = vld [vmem:[#allocation13_spill] sm:$0xff]  ;;  %vm545_vm7 = vcmp.eq.s32.totalorder %v5864_v30, %v8048_v37  ;;  %v5911_v37 = vsel %vm540_vm3, 1.0, %v8054_v31 }
 0x1f5   : > { %2230 = vperm.xlu1 %4809, %v5200_v32   ;;  %v5887_v29 = vpop.permute.xlu1 %1292  ;;  %vm546_vm6 = vcmp.eq.s32.totalorder %v5864_v30, %v8047_v57  ;;  %v8051_v32 = vld [vmem:[#allocation16_spill] sm:$0xff]  ;;  %v732_v57 = vpack.c.bf16 %v4009_v53, %v4008_v28  ;;  %v5924_v45 = vsel %vm545_vm7, 1.0, %v8054_v31  ;;  %v5930_v53 = vsel %vm548_vm8, 1.0, %v8054_v31 }
 0x1f6   : > { %8044 = vst [vmem:[#allocation9_spill] sm:$0xff] %v5887_v29  ;;  %v5897_v41 = vpop.permute.xlu0 %1361  ;;  %vm547_vm9 = vcmp.eq.s32.totalorder %v5864_v30, %v8051_v32  ;;  %v5918_v32 = vsel %vm543_vm5, 1.0, %v8054_v31  ;;  %v5921_v18 = vsel %vm546_vm6, 1.0, %v8054_v31  ;;  %v731_v20 = vpack.c.bf16 %v5911_v37, %v5908_v35  ;;  %v8060_v37 = vld [vmem:[#allocation21_spill] sm:$0xff] }
 0x1f7   : > { %8049 = vst [vmem:[#allocation8_spill] sm:$0xff] %v5897_v41  ;;  %v5936_v41 = vsel %vm550_vm10, 1.0, %v8054_v31  ;;  %v5948_v27 = vadd.bf16 0, %v732_v57  ;;  %v733_v25 = vpack.c.bf16 %v5915_v49, %v5918_v32  ;;  %v4019_v35 = vsel %vm552_vm12, 1.0, %v8054_v31  ;;  %v8061_v49 = vld [vmem:[#allocation22_spill] sm:$0xff]  ;;  %v5971_v32 = vld [vmem:[%s5074_s17 + $0x110] sm:$0xff] }
 0x1f8   : > { %1875 = vperm.xlu0 %4840, %v5305_v61   ;;  %v5933_v61 = vsel %vm547_vm9, 1.0, %v8054_v31  ;;  %v736_v26 = vpack.c.bf16 %v5936_v41, %v5939_v21  ;;  %vm554_vm14 = vcmp.eq.s32.totalorder %v5864_v30, %v8060_v37  ;;  %vm553_vm15 = vcmp.eq.s32.totalorder %v5864_v30, %v8061_v49  ;;  %v8063_v41 = vld [vmem:[#allocation23_spill] sm:$0xff]  ;;  %v8069_v37 = vld [vmem:[#allocation29_spill] sm:$0xff]  ;;  %v8070_v49 = vld [vmem:[#allocation30_spill] sm:$0xff] }
 0x1f9   : > { %4810 = vset.pattern.permute.xlu1 %v7958_v59  ;;  %v5927_v28 = vpop.permute.xlu1 %1298  ;;  %vm556_vm0 = vcmp.eq.s32.totalorder %v5864_v30, %v8063_v41  ;;  %vm562_vm6 = vcmp.eq.s32.totalorder %v5864_v30, %v8069_v37  ;;  %vm561_vm7 = vcmp.eq.s32.totalorder %v5864_v30, %v8070_v49  ;;  %v4021_v41 = vsel %vm554_vm14, 1.0, %v8054_v31  ;;  %v8076_v49 = vld [vmem:[#allocation33_spill] sm:$0xff] }
 0x1fa   : > { %8055 = vst [vmem:[#allocation10_spill] sm:$0xff] %v5927_v28  ;;  %1340 = vperm.xlu1 %4810, %v5208_v34   ;;  %v5942_v29 = vpop.permute.xlu0 %1370  ;;  %v8058_v28 = vld [vmem:[#allocation20_spill] sm:$0xff]  ;;  %v734_v34 = vpack.c.bf16 %v5921_v18, %v5924_v45  ;;  %v8065_v18 = vld [vmem:[#allocation25_spill] sm:$0xff]  ;;  %v8066_v45 = vld [vmem:[#allocation26_spill] sm:$0xff]  ;;  %v4029_v50 = vsel %vm562_vm6, 1.0, %v8054_v31  ;;  %vm566_vm10 = vcmp.eq.s32.totalorder %v5864_v30, %v5397_v62  ;;  %vm565_vm11 = vcmp.eq.s32.totalorder %v5864_v30, %v8076_v49 }
 0x1fb   : > { %8056 = vst [vmem:[#allocation11_spill] sm:$0xff] %v5942_v29  ;;  %vm551_vm13 = vcmp.eq.s32.totalorder %v5864_v30, %v8058_v28  ;;  %v735_v29 = vpack.c.bf16 %v5930_v53, %v5933_v61  ;;  %vm558_vm2 = vcmp.eq.s32.totalorder %v5864_v30, %v8065_v18  ;;  %vm557_vm3 = vcmp.eq.s32.totalorder %v5864_v30, %v8066_v45  ;;  %v8067_v53 = vld [vmem:[#allocation27_spill] sm:$0xff]  ;;  %v8068_v61 = vld [vmem:[#allocation28_spill] sm:$0xff] }
 0x1fc   : > { %4842 = vset.pattern.permute.xlu0 %v7950_v36  ;;  %v4018_v57 = vsel %vm551_vm13, 1.0, %v8054_v31  ;;  %vm560_vm4 = vcmp.eq.s32.totalorder %v5864_v30, %v8067_v53  ;;  %vm559_vm5 = vcmp.eq.s32.totalorder %v5864_v30, %v8068_v61  ;;  %v8071_v18 = vld [vmem:[#allocation31_spill] sm:$0xff]  ;;  %v8072_v45 = vld [vmem:[#allocation32_spill] sm:$0xff]  ;;  %v4025_v19 = vsel %vm558_vm2, 1.0, %v8054_v31 }
 0x1fd   : > { %v5961_v28 = vpop.permute.xlu1 %1301  ;;  %2248 = vperm.xlu0 %4842, %v5224_v38   ;;  %v8064_v38 = vld [vmem:[#allocation24_spill] sm:$0xff]  ;;  %vm564_vm8 = vcmp.eq.s32.totalorder %v5864_v30, %v8071_v18  ;;  %vm563_vm9 = vcmp.eq.s32.totalorder %v5864_v30, %v8072_v45  ;;  %v4024_v11 = vsel %vm557_vm3, 1.0, %v8054_v31  ;;  %v4026_v22 = vsel %vm559_vm5, 1.0, %v8054_v31 }
 0x1fe   : > { %8059 = vst [vmem:[#allocation12_spill] sm:$0xff] %v5961_v28  ;;  %1346 = vperm.xlu1 %4810, %v5971_v32   ;;  %v5974_v21 = vpop.permute.xlu0 %1376  ;;  %vm555_vm1 = vcmp.eq.s32.totalorder %v5864_v30, %v8064_v38  ;;  %v4020_v38 = vsel %vm553_vm15, 1.0, %v8054_v31  ;;  %v4023_v28 = vsel %vm556_vm0, 1.0, %v8054_v31  ;;  %v4031_v53 = vsel %vm564_vm8, 1.0, %v8054_v31 }
 0x1ff   : > { %8062 = vst [vmem:[#allocation13_spill] sm:$0xff] %v5974_v21  ;;  %v5999_v21 = vld [vmem:[%s5074_s17 + $0x138] sm:$0xff]  ;;  %v4022_v3 = vsel %vm555_vm1, 1.0, %v8054_v31  ;;  %v738_v17 = vpack.c.bf16 %v4021_v41, %v4020_v38  ;;  %v4030_v61 = vsel %vm563_vm9, 1.0, %v8054_v31  ;;  %v740_v37 = vpack.c.bf16 %v4025_v19, %v4024_v11 }
 0x200   : > { %8073 = vst [vmem:[#allocation14_spill] sm:$0xff] %v5999_v21  ;;  %v739_v2 = vpack.c.bf16 %v4023_v28, %v4022_v3  ;;  %v6048_v41 = vadd.bf16 0, %v733_v25  ;;  %v6055_v19 = vadd.bf16 0, %v734_v34  ;;  %v6057_v28 = vadd.bf16 0, %v735_v29 }
 0x201   : > { %2257 = vperm.xlu0 %4842, %v5999_v21   ;;  %v4027_v21 = vsel %vm560_vm4, 1.0, %v8054_v31  ;;  %v6059_v45 = vadd.bf16 0, %v736_v26  ;;  %v6080_v34 = vadd.bf16 0, %v740_v37  ;;  %vm988_vm12 = vcmp.eq.s32.totalorder %v5864_v30, %v5515_v60  ;;  %v8089_v37 = vld [vmem:[#allocation73_spill] sm:$0xff] }
 0x202   : > { %1349 = vperm.xlu1 %4810, %v6007_v13   ;;  %v6010_v10 = vpop.permute.xlu1 %1743  ;;  %v6012_v63 = vpop.permute.xlu0 %1385  ;;  %v741_v38 = vpack.c.bf16 %v4027_v21, %v4026_v22  ;;  %v6064_v22 = vadd.bf16 0, %v738_v17  ;;  %v6078_v29 = vadd.bf16 0, %v739_v2  ;;  %v8082_v17 = vld [vmem:[#allocation70_spill] sm:$0xff]  ;;  %v8085_v21 = vld [vmem:[#allocation71_spill] sm:$0xff]  ;;  %v8086_v2 = vld [vmem:[#allocation72_spill] sm:$0xff]  ;;  %vm991_vm0 = vcmp.eq.s32.totalorder %v5864_v30, %v5528_v0 }
 0x203   : > { %8074 = vst [vmem:[#allocation15_spill] sm:$0xff] %v6010_v10  ;;  %8075 = vst [vmem:[#allocation16_spill] sm:$0xff] %v6012_v63  ;;  %v4028_v63 = vsel %vm561_vm7, 1.0, %v8054_v31  ;;  %v737_v10 = vpack.c.bf16 %v4019_v35, %v4018_v57  ;;  %v6043_v35 = vld [vmem:[%s5074_s17 + $0x140] sm:$0xff]  ;;  %v6046_v57 = vadd.bf16 0, %v731_v20  ;;  %v4872_v20 = vld [vmem:[%s5074_s17 + $0x108] sm:$0xff]  ;;  %vm2332_vm13 = vcmp.eq.s32.totalorder %v5864_v30, %v8082_v17 }
 0x204   : > { %8077 = vst [vmem:[#allocation17_spill] sm:$0xff] %v6043_v35  ;;  %v742_v18 = vpack.c.bf16 %v4029_v50, %v4028_v63  ;;  %v6070_v63 = vsel %vm566_vm10, 1.0, %v8054_v31  ;;  %v6076_v50 = vsel %vm565_vm11, 1.0, %v8054_v31  ;;  %v6090_v62 = vadd.bf16 0, %v741_v38 }
 0x205   : > { %2260 = vperm.xlu0 %4842, %v6043_v35   ;;  %v743_v35 = vpack.c.bf16 %v4031_v53, %v4030_v61  ;;  %v6062_v25 = vadd.bf16 0, %v737_v10  ;;  %8080 = vst [vmem:[#allocation20_spill] sm:$0xff] %v6070_v63  ;;  %8081 = vst [vmem:[#allocation21_spill] sm:$0xff] %v6076_v50  ;;  %v6087_v10 = vld [vmem:[%s5074_s17 + $0x158] sm:$0xff]  ;;  %vm989_vm14 = vcmp.eq.s32.totalorder %v5864_v30, %v8085_v21  ;;  %v6112_v38 = vsel %vm988_vm12, 1.0, %v8054_v31  ;;  %v8095_v61 = vld [vmem:[#allocation78_spill] sm:$0xff] }
 0x206   : > { %4811 = vset.pattern.permute.xlu1 %v7962_v40  ;;  %v6051_v3 = vpop.permute.xlu1 %1746  ;;  %v6053_v11 = vpop.permute.xlu0 %1388  ;;  %8083 = vst [vmem:[#allocation22_spill] sm:$0xff] %v6087_v10  ;;  %v6092_v26 = vadd.bf16 0, %v742_v18  ;;  %vm2335_vm15 = vcmp.eq.s32.totalorder %v5864_v30, %v8086_v2  ;;  %vm2338_vm1 = vcmp.eq.s32.totalorder %v5864_v30, %v8089_v37  ;;  %v6115_v18 = vsel %vm2332_vm13, 1.0, %v8054_v31  ;;  %v8092_v21 = vld [vmem:[#allocation76_spill] sm:$0xff]  ;;  %v6132_v2 = vld [vmem:[%s5074_s17 + $0x160] sm:$0xff] }
 0x207   : > { %8078 = vst [vmem:[#allocation18_spill] sm:$0xff] %v6051_v3  ;;  %8079 = vst [vmem:[#allocation19_spill] sm:$0xff] %v6053_v11  ;;  %1791 = vperm.xlu1 %4811, %v4872_v20   ;;  %v6100_v60 = vadd.bf16 0, %v743_v35  ;;  %v8090_v35 = vld [vmem:[#allocation74_spill] sm:$0xff]  ;;  %v8091_v20 = vld [vmem:[#allocation75_spill] sm:$0xff]  ;;  %v6122_v0 = vsel %vm989_vm14, 1.0, %v8054_v31  ;;  %vm995_vm4 = vcmp.eq.s32.totalorder %v5864_v30, %v5541_v42  ;;  %vm2343_vm5 = vcmp.eq.s32.totalorder %v5864_v30, %v8092_v21 }
 0x208   : > { %8084 = vst [vmem:[#allocation23_spill] sm:$0xff] %v6092_v26  ;;  %vm993_vm2 = vcmp.eq.s32.totalorder %v5864_v30, %v8090_v35  ;;  %vm2340_vm3 = vcmp.eq.s32.totalorder %v5864_v30, %v8091_v20  ;;  %v6125_v17 = vsel %vm2335_vm15, 1.0, %v8054_v31  ;;  %8093 = vst [vmem:[#allocation26_spill] sm:$0xff] %v6132_v2  ;;  %v6136_v37 = vsel %vm991_vm0, 1.0, %v8054_v31  ;;  %v8094_v20 = vld [vmem:[#allocation77_spill] sm:$0xff]  ;;  %v8097_v11 = vld [vmem:[#allocation79_spill] sm:$0xff] }
 0x209   : > { %2269 = vperm.xlu0 %4842, %v6087_v10   ;;  %8088 = vst [vmem:[#allocation25_spill] sm:$0xff] %v6100_v60  ;;  %v6139_v35 = vsel %vm2338_vm1, 1.0, %v8054_v31  ;;  %vm997_vm6 = vcmp.eq.s32.totalorder %v5864_v30, %v8094_v20  ;;  %vm2346_vm7 = vcmp.eq.s32.totalorder %v5864_v30, %v8095_v61  ;;  %v6148_v21 = vsel %vm993_vm2, 1.0, %v8054_v31  ;;  %v4875_v50 = vld [vmem:[%s5074_s17 + $0x100] sm:$0xff]  ;;  %v8102_v10 = vld [vmem:[#allocation82_spill] sm:$0xff]  ;;  %v6182_v3 = vld [vmem:[%s5074_s17 + $0x178] sm:$0xff] }
 0x20a   : > { %v6098_v53 = vpop.permute.xlu0 %1397  ;;  %vm999_vm8 = vcmp.eq.s32.totalorder %v5864_v30, %v5553_v48  ;;  %vm2348_vm9 = vcmp.eq.s32.totalorder %v5864_v30, %v8097_v11  ;;  %v6161_v61 = vsel %vm995_vm4, 1.0, %v8054_v31  ;;  %vm987_vm11 = vcmp.eq.s32.totalorder %v5864_v30, %v5600_v7  ;;  %8103 = vst [vmem:[#allocation30_spill] sm:$0xff] %v6182_v3  ;;  %v8106_v11 = vld [vmem:[#allocation93_spill] sm:$0xff] }
 0x20b   : > { %8087 = vst [vmem:[#allocation24_spill] sm:$0xff] %v6098_v53  ;;  %1794 = vperm.xlu1 %4811, %v5971_v32   ;;  %v6109_v49 = vpop.permute.xlu1 %2188  ;;  %v6151_v53 = vsel %vm2340_vm3, 1.0, %v8054_v31  ;;  %v6172_v63 = vsel %vm997_vm6, 1.0, %v8054_v31  ;;  %v6175_v26 = vsel %vm2346_vm7, 1.0, %v8054_v31  ;;  %vm1003_vm13 = vcmp.eq.s32.totalorder %v5864_v30, %v8102_v10 }
 0x20c   : > { %8100 = vst [vmem:[#allocation29_spill] sm:$0xff] %v6175_v26  ;;  %vm1005_vm14 = vcmp.eq.s32.totalorder %v5864_v30, %v5572_v52  ;;  %vm990_vm15 = vcmp.eq.s32.totalorder %v5864_v30, %v5606_v1  ;;  %vm1007_vm0 = vcmp.eq.s32.totalorder %v5864_v30, %v5579_v8  ;;  %v4070_v48 = vsel %vm987_vm11, 1.0, %v8054_v31  ;;  %v8110_v8 = vld [vmem:[#allocation88_spill] sm:$0xff] }
 0x20d   : > { %2272 = vperm.xlu0 %4842, %v6132_v2   ;;  %v8099_v2 = vld [vmem:[#allocation80_spill] sm:$0xff]  ;;  %vm992_vm1 = vcmp.eq.s32.totalorder %v5864_v30, %v8106_v11  ;;  %vm1011_vm3 = vcmp.eq.s32.totalorder %v5864_v30, %v8110_v8  ;;  %v6228_v7 = vsel %vm1005_vm14, 1.0, %v8054_v31  ;;  %v4073_v11 = vsel %vm990_vm15, 1.0, %v8054_v31 }
 0x20e   : > { %v6145_v42 = vpop.permute.xlu0 %1400  ;;  %vm1001_vm10 = vcmp.eq.s32.totalorder %v5864_v30, %v8099_v2  ;;  %v6195_v2 = vsel %vm2348_vm9, 1.0, %v8054_v31  ;;  %v4075_v8 = vsel %vm992_vm1, 1.0, %v8054_v31  ;;  %vm998_vm6 = vcmp.eq.s32.totalorder %v5864_v30, %v5632_v12 }
 0x20f   : > { %8096 = vst [vmem:[#allocation27_spill] sm:$0xff] %v6145_v42  ;;  %4812 = vset.pattern.permute.xlu1 %v7950_v36  ;;  %v6158_v20 = vpop.permute.xlu1 %2194  ;;  %v6164_v42 = vsel %vm2343_vm5, 1.0, %v8054_v31  ;;  %8104 = vst [vmem:[#allocation31_spill] sm:$0xff] %v6195_v2  ;;  %vm996_vm5 = vcmp.eq.s32.totalorder %v5864_v30, %v5626_v56  ;;  %v6252_v56 = vsel %vm1011_vm3, 1.0, %v8054_v31  ;;  %vm1000_vm7 = vcmp.eq.s32.totalorder %v5864_v30, %v5638_v43 }
 0x210   : > { %8098 = vst [vmem:[#allocation28_spill] sm:$0xff] %v6158_v20  ;;  %2236 = vperm.xlu1 %4812, %v4875_v50   ;;  %v8101_v20 = vld [vmem:[#allocation81_spill] sm:$0xff]  ;;  %v6189_v50 = vsel %vm999_vm8, 1.0, %v8054_v31  ;;  %v4079_v12 = vsel %vm996_vm5, 1.0, %v8054_v31  ;;  %vm1004_vm9 = vcmp.eq.s32.totalorder %v5864_v30, %v5651_v6  ;;  %v1181_v26 = vpack.c.bf16 %v4075_v8, %v6136_v37  ;;  %v8116_v37 = vld [vmem:[#allocation103_spill] sm:$0xff] }
 0x211   : > { %vm2351_vm12 = vcmp.eq.s32.totalorder %v5864_v30, %v8101_v20  ;;  %2281 = vperm.xlu0 %4842, %v6182_v3   ;;  %v6204_v20 = vsel %vm1001_vm10, 1.0, %v8054_v31  ;;  %v8109_v3 = vld [vmem:[#allocation86_spill] sm:$0xff]  ;;  %v4081_v43 = vsel %vm998_vm6, 1.0, %v8054_v31  ;;  %vm1006_vm10 = vcmp.eq.s32.totalorder %v5864_v30, %v5657_v14 }
 0x212   : > { %v6201_v10 = vpop.permute.xlu0 %1409  ;;  %v6217_v1 = vsel %vm2351_vm12, 1.0, %v8054_v31  ;;  %vm1009_vm2 = vcmp.eq.s32.totalorder %v5864_v30, %v8109_v3  ;;  %v6240_v3 = vsel %vm1007_vm0, 1.0, %v8054_v31  ;;  %vm1438_vm11 = vcmp.eq.s32.totalorder %v5864_v30, %v5661_v9 }
 0x213   : > { %8105 = vst [vmem:[#allocation32_spill] sm:$0xff] %v6201_v10  ;;  %v6214_v52 = vpop.permute.xlu1 %2197  ;;  %8108 = vst [vmem:[#allocation70_spill] sm:$0xff] %v6217_v1  ;;  %v6220_v10 = vsel %vm1003_vm13, 1.0, %v8054_v31  ;;  %v6236_v1 = vld [vmem:[%s5074_s17 + $0x180] sm:$0xff]  ;;  %vm1008_vm12 = vcmp.eq.s32.totalorder %v5864_v30, %v8116_v37  ;;  %v1183_v9 = vpack.c.bf16 %v4079_v12, %v6161_v61  ;;  %v1184_v37 = vpack.c.bf16 %v4081_v43, %v6172_v63 }
 0x214   : > { %8107 = vst [vmem:[#allocation33_spill] sm:$0xff] %v6214_v52  ;;  %2242 = vperm.xlu1 %4812, %v5971_v32   ;;  %v8111_v52 = vld [vmem:[#allocation95_spill] sm:$0xff]  ;;  %8112 = vst [vmem:[#allocation71_spill] sm:$0xff] %v6236_v1  ;;  %v1179_v32 = vpack.c.bf16 %v6112_v38, %v4070_v48  ;;  %v1180_v38 = vpack.c.bf16 %v4073_v11, %v6122_v0  ;;  %v6273_v0 = vld [vmem:[%s5074_s17 + $0x198] sm:$0xff]  ;;  %v4089_v60 = vsel %vm1006_vm10, 1.0, %v8054_v31  ;;  %v4091_v12 = vsel %vm1008_vm12, 1.0, %v8054_v31 }
 0x215   : > { %vm994_vm4 = vcmp.eq.s32.totalorder %v5864_v30, %v8111_v52  ;;  %2284 = vperm.xlu0 %4842, %v6236_v1   ;;  %v6249_v52 = vsel %vm1009_vm2, 1.0, %v8054_v31  ;;  %v8114_v1 = vld [vmem:[#allocation100_spill] sm:$0xff]  ;;  %8115 = vst [vmem:[#allocation73_spill] sm:$0xff] %v6273_v0  ;;  %v6301_v61 = vadd.bf16 %v1181_v26, %v6048_v41  ;;  %v4880_v63 = vld [vmem:[%s5074_s17 + $0x1a0] sm:$0xff]  ;;  %vm1010_vm15 = vcmp.eq.s32.totalorder %v5864_v30, %v5667_v16 }
 0x216   : > { %v6246_v2 = vpop.permute.xlu0 %1412  ;;  %vm1002_vm8 = vcmp.eq.s32.totalorder %v5864_v30, %v8114_v1  ;;  %v4077_v48 = vsel %vm994_vm4, 1.0, %v8054_v31  ;;  %v6277_v1 = vadd.bf16 %v1179_v32, %v6046_v57  ;;  %v4087_v57 = vsel %vm1004_vm9, 1.0, %v8054_v31  ;;  %v8118_v32 = vld [vmem:[#allocation102_spill] sm:$0xff] }
 0x217   : > { %8113 = vst [vmem:[#allocation72_spill] sm:$0xff] %v6246_v2  ;;  %v4085_v11 = vsel %vm1002_vm8, 1.0, %v8054_v31  ;;  %v1182_v14 = vpack.c.bf16 %v4077_v48, %v6148_v21  ;;  %vm1437_vm13 = vcmp.eq.s32.totalorder %v5864_v30, %v8118_v32  ;;  %v1187_v43 = vpack.c.bf16 %v4087_v57, %v6220_v10  ;;  %v4883_v32 = vld [vmem:[%s5074_s17 + $0x1c0] sm:$0xff] }
 0x218   : > { %2245 = vperm.xlu1 %4812, %v6007_v13   ;;  %v6264_v2 = vpop.permute.xlu1 %1307  ;;  %v4083_v13 = vsel %vm1000_vm7, 1.0, %v8054_v31  ;;  %v1186_v48 = vpack.c.bf16 %v4085_v11, %v6204_v20  ;;  %v4136_v41 = vsel %vm1437_vm13, 1.0, %v8054_v31  ;;  %v6326_v20 = vadd.bf16 %v1183_v9, %v6057_v28 }
 0x219   : > { %2293 = vperm.xlu0 %4842, %v6273_v0   ;;  %v1212_v0 = vadd.bf16 %v1180_v38, %v5948_v27  ;;  %v1185_v6 = vpack.c.bf16 %v4083_v13, %v6189_v50  ;;  %v6307_v27 = vld [vmem:[%s5074_s17 + $0x128] sm:$0xff]  ;;  %v8119_v38 = vld [vmem:[#allocation101_spill] sm:$0xff]  ;;  %v6323_v50 = vadd.bf16 %v1182_v14, %v6055_v19  ;;  %v1188_v10 = vpack.c.bf16 %v4089_v60, %v6228_v7 }
 0x21a   : > { %v6283_v8 = vpop.permute.xlu0 %1421  ;;  %vm1435_vm14 = vcmp.eq.s32.totalorder %v5864_v30, %v8119_v38  ;;  %v6330_v11 = vadd.bf16 %v1184_v37, %v6059_v45  ;;  %v1189_v57 = vpack.c.bf16 %v4091_v12, %v6240_v3  ;;  %vm1012_vm0 = vcmp.eq.s32.totalorder %v5864_v30, %v5673_v15  ;;  %v6348_v45 = vld [vmem:[%s5074_s17 + $0x130] sm:$0xff]  ;;  %v4882_v3 = vld [vmem:[%s5074_s17 + $0x1b8] sm:$0xff] }
 0x21b   : > { %8117 = vst [vmem:[#allocation74_spill] sm:$0xff] %v6283_v8  ;;  %v4137_v8 = vsel %vm1438_vm11, 1.0, %v8054_v31  ;;  %vm1436_vm1 = vcmp.eq.s32.totalorder %v5864_v30, %v5791_v24  ;;  %v6338_v16 = vadd.bf16 %v1185_v6, %v6062_v25  ;;  %v6341_v19 = vadd.bf16 %v1186_v48, %v6064_v22  ;;  %v8120_v25 = vld [vmem:[#allocation104_spill] sm:$0xff]  ;;  %v4884_v48 = vld [vmem:[%s5074_s17 + $0x120] sm:$0xff] }
 0x21c   : > { %4814 = vset.pattern.permute.xlu1 %v7958_v59  ;;  %v6298_v21 = vpop.permute.xlu1 %1310  ;;  %v1628_v13 = vpack.c.bf16 %v4137_v8, %v4136_v41  ;;  %v4134_v28 = vsel %vm1435_vm14, 1.0, %v8054_v31  ;;  %v6345_v60 = vsel %vm1010_vm15, 1.0, %v8054_v31  ;;  %v6355_v8 = vadd.bf16 %v1187_v43, %v6078_v29  ;;  %v4885_v41 = vld [vmem:[%s5074_s17 + $0x1d8] sm:$0xff] }
 0x21d   : > { %1355 = vperm.xlu1 %4814, %v6307_v27   ;;  %2296 = vperm.xlu0 %4842, %v4880_v63   ;;  %vm1884_vm2 = vcmp.eq.s32.totalorder %v5864_v30, %v8120_v25  ;;  %vm2331_vm3 = vcmp.eq.s32.totalorder %v5864_v30, %v5683_v44  ;;  %vm2334_vm4 = vcmp.eq.s32.totalorder %v5864_v30, %v5695_v47  ;;  %v6374_v29 = vsel %vm1012_vm0, 1.0, %v8054_v31  ;;  %v8123_v25 = vld [vmem:[#allocation124_spill] sm:$0xff] }
 0x21e   : > { %v6320_v26 = vpop.permute.xlu0 %1424  ;;  %v6366_v14 = vadd.bf16 %v1188_v10, %v6080_v34  ;;  %v6368_v9 = vadd.bf16 %v1628_v13, %v1212_v0  ;;  %v4135_v44 = vsel %vm1436_vm1, 1.0, %v8054_v31  ;;  %v6381_v47 = vadd.bf16 %v1189_v57, %v6090_v62  ;;  %v8122_v57 = vld [vmem:[#allocation120_spill] sm:$0xff] }
 0x21f   : > { %v1190_v34 = vpack.c.bf16 %v6345_v60, %v6249_v52  ;;  %vm1885_vm5 = vcmp.eq.s32.totalorder %v5864_v30, %v5676_v39  ;;  %vm2333_vm6 = vcmp.eq.s32.totalorder %v5864_v30, %v5689_v46  ;;  %v4199_v15 = vsel %vm1884_vm2, 1.0, %v8054_v31 }
 0x220   : > { %v4262_v0 = vsel %vm2331_vm3, 1.0, %v8054_v31  ;;  %v6392_v24 = vsel %vm2334_vm4, 1.0, %v8054_v31  ;;  %vm1440_vm7 = vcmp.eq.s32.totalorder %v5864_v30, %v5706_v51  ;;  %v1191_v37 = vpack.c.bf16 %v6374_v29, %v6252_v56 }
 0x221   : > { %1358 = vperm.xlu1 %4814, %v6348_v45   ;;  %v6351_v7 = vpop.permute.xlu1 %1752  ;;  %2305 = vperm.xlu0 %4842, %v4882_v3   ;;  %vm1441_vm8 = vcmp.eq.s32.totalorder %v5864_v30, %v5715_v54  ;;  %vm1887_vm9 = vcmp.eq.s32.totalorder %v5864_v30, %v5725_v58  ;;  %v1627_v6 = vpack.c.bf16 %v4135_v44, %v4134_v28  ;;  %v4200_v12 = vsel %vm1885_vm5, 1.0, %v8054_v31  ;;  %v8124_v44 = vld [vmem:[#allocation116_spill] sm:$0xff] }
 0x222   : > { %v6363_v22 = vpop.permute.xlu0 %1433  ;;  %v6415_v63 = vsel %vm2333_vm6, 1.0, %v8054_v31  ;;  %vm1889_vm10 = vcmp.eq.s32.totalorder %v5864_v30, %v5734_v33  ;;  %vm1439_vm11 = vcmp.eq.s32.totalorder %v5864_v30, %v5797_v23  ;;  %v4139_v39 = vsel %vm1440_vm7, 1.0, %v8054_v31 }
 0x223   : > { %v2524_v58 = vpack.c.bf16 %v6392_v24, %v6415_v63  ;;  %v2523_v46 = vpack.c.bf16 %v6115_v18, %v4262_v0  ;;  %v4140_v38 = vsel %vm1441_vm8, 1.0, %v8054_v31  ;;  %v6431_v33 = vsel %vm1887_vm9, 1.0, %v8054_v31  ;;  %v4886_v24 = vld [vmem:[%s5074_s17 + $0x1e0] sm:$0xff]  ;;  %v8126_v63 = vld [vmem:[#allocation14_spill] sm:$0xff] }
 0x224   : > { %vm1442_vm13 = vcmp.eq.s32.totalorder %v5864_v30, %v5804_v5  ;;  %v6440_v51 = vsel %vm1889_vm10, 1.0, %v8054_v31  ;;  %v4138_v10 = vsel %vm1439_vm11, 1.0, %v8054_v31  ;;  %v1659_v13 = vadd.bf16 %v1627_v6, %v6277_v1  ;;  %v8121_v5 = vld [vmem:[#allocation114_spill] sm:$0xff] }
 0x225   : > { %4815 = vset.pattern.permute.xlu1 %v7962_v40  ;;  %v6397_v62 = vpop.permute.xlu1 %1758  ;;  %2308 = vperm.xlu0 %4842, %v4883_v32   ;;  %vm1890_vm14 = vcmp.eq.s32.totalorder %v5864_v30, %v5743_v4  ;;  %vm2336_vm15 = vcmp.eq.s32.totalorder %v5864_v30, %v5756_v55  ;;  %vm2337_vm0 = vcmp.eq.s32.totalorder %v5864_v30, %v8121_v5  ;;  %v4141_v3 = vsel %vm1442_vm13, 1.0, %v8054_v31  ;;  %v8125_v4 = vld [vmem:[#allocation118_spill] sm:$0xff]  ;;  %v8127_v5 = vld [vmem:[#allocation121_spill] sm:$0xff] }
 0x226   : > { %1800 = vperm.xlu1 %4815, %v4884_v48   ;;  %vm1446_vm1 = vcmp.eq.s32.totalorder %v5864_v30, %v8122_v57  ;;  %vm1444_vm2 = vcmp.eq.s32.totalorder %v5864_v30, %v8123_v25  ;;  %vm1443_vm4 = vcmp.eq.s32.totalorder %v5864_v30, %v8124_v44  ;;  %vm1445_vm5 = vcmp.eq.s32.totalorder %v5864_v30, %v8125_v4  ;;  %v8128_v25 = vld [vmem:[#allocation123_spill] sm:$0xff] }
 0x227   : > { %v1693_v54 = vpop.permute.xlu0 %1692  ;;  %v4205_v32 = vsel %vm1890_vm14, 1.0, %v8054_v31  ;;  %v4145_v6 = vsel %vm1446_vm1, 1.0, %v8054_v31  ;;  %v4144_v55 = vsel %vm1445_vm5, 1.0, %v8054_v31  ;;  %vm1892_vm7 = vcmp.eq.s32.totalorder %v5864_v30, %v8127_v5 }
 0x228   : > { %vm1883_vm12 = vcmp.eq.s32.totalorder %v5864_v30, %v1693_v54  ;;  %vm2339_vm8 = vcmp.eq.s32.totalorder %v5864_v30, %v8128_v25 }
 0x229   : > { %v4198_v23 = vsel %vm1883_vm12, 1.0, %v8054_v31  ;;  %v6436_v43 = vpop.permute.xlu1 %1761  ;;  %2317 = vperm.xlu0 %4842, %v4885_v41   ;;  %v6476_v41 = vsel %vm2337_vm0, 1.0, %v8054_v31 }
 0x22a   : > { %v2075_v18 = vpack.c.bf16 %v4199_v15, %v4198_v23  ;;  %1806 = vperm.xlu1 %4815, %v6348_v45   ;;  %v1629_v15 = vpack.c.bf16 %v4139_v39, %v4138_v10  ;;  %v4267_v39 = vsel %vm2336_vm15, 1.0, %v8054_v31  ;;  %v1630_v10 = vpack.c.bf16 %v4141_v3, %v4140_v38  ;;  %v4887_v3 = vld [vmem:[%s5074_s17 + $0x1f8] sm:$0xff] }
 0x22b   : > { %v1702_v28 = vpop.permute.xlu0 %1701  ;;  %v1632_v38 = vpack.c.bf16 %v4145_v6, %v4144_v55 }
 0x22c   : > { %vm1886_vm3 = vcmp.eq.s32.totalorder %v5864_v30, %v1702_v28  ;;  %v2107_v1 = vadd.bf16 %v2075_v18, %v1659_v13  ;;  %v1661_v57 = vadd.bf16 %v1629_v15, %v6301_v61  ;;  %v8129_v61 = vld [vmem:[#allocation122_spill] sm:$0xff]  ;;  %v1662_v15 = vadd.bf16 %v1630_v10, %v6323_v50 }
 0x22d   : > { %v4201_v0 = vsel %vm1886_vm3, 1.0, %v8054_v31  ;;  %2320 = vperm.xlu0 %4842, %v4886_v24   ;;  %v2525_v24 = vpack.c.bf16 %v4267_v39, %v6125_v17  ;;  %vm1893_vm9 = vcmp.eq.s32.totalorder %v5864_v30, %v8129_v61  ;;  %v2526_v17 = vpack.c.bf16 %v6139_v35, %v6476_v41 }
 0x22e   : > { %v2076_v48 = vpack.c.bf16 %v4201_v0, %v4200_v12  ;;  %1809 = vperm.xlu1 %4815, %v8126_v63   ;;  %v6466_v54 = vpop.permute.xlu1 %2203  ;;  %v2555_v23 = vadd.bf16 %v2523_v46, %v2107_v1  ;;  %v4143_v12 = vsel %vm1444_vm2, 1.0, %v8054_v31  ;;  %v4142_v46 = vsel %vm1443_vm4, 1.0, %v8054_v31 }
 0x22f   : > { %v1708_v18 = vpop.permute.xlu0 %1707  ;;  %v1631_v1 = vpack.c.bf16 %v4143_v12, %v4142_v46  ;;  %v2078_v0 = vpack.c.bf16 %v4205_v32, %v6440_v51  ;;  %v4207_v50 = vsel %vm1892_vm7, 1.0, %v8054_v31  ;;  %v1664_v51 = vadd.bf16 %v1632_v38, %v6330_v11  ;;  %v8134_v38 = vld [vmem:[#allocation128_spill] sm:$0xff] }
 0x230   : > { %v2108_v13 = vadd.bf16 %v2076_v48, %v6368_v9  ;;  %vm1888_vm6 = vcmp.eq.s32.totalorder %v5864_v30, %v1708_v18  ;;  %4495 = vmatprep.mubr.bf16.mxu0 %v2555_v23  ;;  %v8130_v48 = vld [vmem:[#allocation126_spill] sm:$0xff]  ;;  %v4208_v35 = vsel %vm1893_vm9, 1.0, %v8054_v31  ;;  %vm1450_vm0 = vcmp.eq.s32.totalorder %v5864_v30, %v8134_v38  ;;  %v8145_v38 = vld [vmem:[#allocation132_spill] sm:$0xff] }
 0x231   : > { %v4203_v28 = vsel %vm1888_vm6, 1.0, %v8054_v31  ;;  %2329 = vperm.xlu0 %4842, %v4887_v3   ;;  %vm1447_vm10 = vcmp.eq.s32.totalorder %v5864_v30, %v8130_v48  ;;  %v1663_v32 = vadd.bf16 %v1631_v1, %v6326_v20  ;;  %v2110_v46 = vadd.bf16 %v2078_v0, %v1662_v15  ;;  %v8132_v20 = vld [vmem:[#allocation125_spill] sm:$0xff]  ;;  %v8138_v1 = vld [vmem:[#allocation131_spill] sm:$0xff] }
 0x232   : > { %v2077_v44 = vpack.c.bf16 %v4203_v28, %v6431_v33  ;;  %4816 = vset.pattern.permute.xlu1 %v7950_v36  ;;  %v6501_v9 = vpop.permute.xlu1 %2206  ;;  %v2556_v4 = vadd.bf16 %v2524_v58, %v2108_v13  ;;  %v8131_v33 = vld [vmem:[#allocation129_spill] sm:$0xff]  ;;  %v4146_v41 = vsel %vm1447_vm10, 1.0, %v8054_v31  ;;  %vm2341_vm13 = vcmp.eq.s32.totalorder %v5864_v30, %v8132_v20  ;;  %v8133_v13 = vld [vmem:[#allocation127_spill] sm:$0xff]  ;;  %v8137_v28 = vld [vmem:[#allocation134_spill] sm:$0xff] }
 0x233   : > { %2251 = vperm.xlu1 %4816, %v6307_v27   ;;  %v1717_v6 = vpop.permute.xlu0 %1716  ;;  %vm1448_vm11 = vcmp.eq.s32.totalorder %v5864_v30, %v8131_v33  ;;  %v4270_v27 = vsel %vm2339_vm8, 1.0, %v8054_v31  ;;  %vm2342_vm15 = vcmp.eq.s32.totalorder %v5864_v30, %v8133_v13  ;;  %vm1895_vm3 = vcmp.eq.s32.totalorder %v5864_v30, %v8137_v28  ;;  %v8140_v48 = vld [vmem:[#allocation9_spill] sm:$0xff]  ;;  %v6563_v33 = vld [vmem:[%s5074_s17 + $0x150] sm:$0xff] }
 0x234   : > { %v2109_v63 = vadd.bf16 %v2077_v44, %v1661_v57  ;;  %vm1891_vm12 = vcmp.eq.s32.totalorder %v5864_v30, %v1717_v6  ;;  %4496 = vmatmul.mubr.bf16.vlgmr.msra.gmra.mrb[0].mxu0 %v2556_v4  ;;  %v4147_v10 = vsel %vm1448_vm11, 1.0, %v8054_v31  ;;  %v2527_v11 = vpack.c.bf16 %v6151_v53, %v4270_v27  ;;  %v8136_v57 = vld [vmem:[#allocation130_spill] sm:$0xff]  ;;  %v8144_v20 = vld [vmem:[#allocation15_spill] sm:$0xff] }
 0x235   : > { %v4206_v58 = vsel %vm1891_vm12, 1.0, %v8054_v31  ;;  %v1633_v53 = vpack.c.bf16 %v4147_v10, %v4146_v41  ;;  %vm1452_vm2 = vcmp.eq.s32.totalorder %v5864_v30, %v8136_v57  ;;  %v4272_v25 = vsel %vm2341_vm13, 1.0, %v8054_v31 }
 0x236   : > { %v2079_v23 = vpack.c.bf16 %v4207_v50, %v4206_v58  ;;  %v2557_v39 = vadd.bf16 %v2525_v24, %v2109_v63  ;;  %vm1449_vm4 = vcmp.eq.s32.totalorder %v5864_v30, %v8138_v1  ;;  %v8139_v4 = vmov 1  }
 0x237   : > { %2254 = vperm.xlu1 %4816, %v6348_v45   ;;  %v6534_v12 = vpop.permute.xlu1 %1316  ;;  %v1726_v18 = vpop.permute.xlu0 %1725  ;;  %v8135_v45 = vld [vmem:[#allocation140_spill] sm:$0xff]  ;;  %v2558_v61 = vadd.bf16 %v2526_v17, %v2110_v46  ;;  %v4273_v15 = vsel %vm2342_vm15, 1.0, %v8054_v31  ;;  %vm1451_vm5 = vcmp.eq.s32.totalorder %v5864_v30, %v8140_v48  ;;  %v4149_v63 = vsel %vm1450_vm0, 1.0, %v8054_v31  ;;  %v8149_v48 = vld [vmem:[#allocation25_spill] sm:$0xff] }
 0x238   : > { %v2111_v55 = vadd.bf16 %v2079_v23, %v1663_v32  ;;  %vm1894_vm14 = vcmp.eq.s32.totalorder %v5864_v30, %v1726_v18  ;;  %4499 = vmatprep.mubr.bf16.mxu0 %v2557_v39  ;;  %vm2344_vm1 = vcmp.eq.s32.totalorder %v5864_v30, %v8135_v45  ;;  %v4151_v17 = vsel %vm1452_vm2, 1.0, %v8054_v31  ;;  %v8141_v23 = vld [vmem:[#allocation136_spill] sm:$0xff]  ;;  %v8146_v45 = vld [vmem:[#allocation17_spill] sm:$0xff] }
 0x239   : > { %v4209_v5 = vsel %vm1894_vm14, 1.0, %v8054_v31  ;;  %v4275_v6 = vsel %vm2344_vm1, 1.0, %v8054_v31  ;;  %v4210_v50 = vsel %vm1895_vm3, 1.0, %v8054_v31  ;;  %v1665_v58 = vadd.bf16 %v1633_v53, %v6338_v16 }
 0x23a   : > { %v2559_v3 = vadd.bf16 %v2527_v11, %v2111_v55  ;;  %v2080_v44 = vpack.c.bf16 %v4209_v5, %v4208_v35  ;;  %v4148_v32 = vsel %vm1449_vm4, 1.0, %v8054_v31  ;;  %vm1897_vm7 = vcmp.eq.s32.totalorder %v5864_v30, %v8141_v23  ;;  %v8142_v35 = vld [vmem:[#allocation138_spill] sm:$0xff] }
 0x23b   : > { %4817 = vset.pattern.permute.xlu1 %v8139_v4  ;;  %v6555_v0 = vpop.permute.xlu1 %1322  ;;  %v1732_v24 = vpop.permute.xlu0 %1731  ;;  %vm1898_vm8 = vcmp.eq.s32.totalorder %v5864_v30, %v8142_v35  ;;  %v2529_v41 = vpack.c.bf16 %v4275_v6, %v6164_v42  ;;  %v4150_v16 = vsel %vm1451_vm5, 1.0, %v8054_v31  ;;  %v8143_v11 = vld [vmem:[#allocation142_spill] sm:$0xff]  ;;  %vm1900_vm10 = vcmp.eq.s32.totalorder %v5864_v30, %v8144_v20 }
 0x23c   : > { %vm1896_vm6 = vcmp.eq.s32.totalorder %v5864_v30, %v1732_v24  ;;  %922 = vperm.xlu1 %4817, %v6563_v33   ;;  %4500 = vmatmul.mubr.bf16.gmra.mrb[4].mxu0 %v2558_v61  ;;  %v2112_v10 = vadd.bf16 %v2080_v44, %v1664_v51  ;;  %vm2345_vm9 = vcmp.eq.s32.totalorder %v5864_v30, %v8143_v11  ;;  %v4212_v5 = vsel %vm1897_vm7, 1.0, %v8054_v31  ;;  %v8148_v61 = vld [vmem:[#allocation10_spill] sm:$0xff] }
 0x23d   : > { %v4211_v27 = vsel %vm1896_vm6, 1.0, %v8054_v31  ;;  %4503 = vmatprep.mubr.bf16.mxu0 %v2559_v3  ;;  %v2528_v42 = vpack.c.bf16 %v4273_v15, %v4272_v25  ;;  %v1634_v13 = vpack.c.bf16 %v4149_v63, %v4148_v32  ;;  %vm1455_vm12 = vcmp.eq.s32.totalorder %v5864_v30, %v8145_v38  ;;  %v8147_v25 = vld [vmem:[#allocation12_spill] sm:$0xff]  ;;  %v8150_v32 = vld [vmem:[#allocation29_spill] sm:$0xff]  ;;  %v8153_v20 = vld [vmem:[#allocation22_spill] sm:$0xff] }
 0x23e   : > { %v2081_v39 = vpack.c.bf16 %v4211_v27, %v4210_v50  ;;  %v4213_v53 = vsel %vm1898_vm8, 1.0, %v8054_v31  ;;  %v1635_v57 = vpack.c.bf16 %v4151_v17, %v4150_v16  ;;  %v4276_v3 = vsel %vm2345_vm9, 1.0, %v8054_v31  ;;  %v6637_v27 = vld [vmem:[%s5074_s17 + $0x148] sm:$0xff] }
 0x23f   : > { %v6593_v18 = vpop.permute.xlu1 %1325  ;;  %v1741_v46 = vpop.permute.xlu0 %1740  ;;  %vm1454_vm13 = vcmp.eq.s32.totalorder %v5864_v30, %v8147_v25  ;;  %v4215_v1 = vsel %vm1900_vm10, 1.0, %v8054_v31  ;;  %v2560_v24 = vadd.bf16 %v2528_v42, %v2112_v10  ;;  %vm1453_vm14 = vcmp.eq.s32.totalorder %v5864_v30, %v8148_v61  ;;  %v8159_v61 = vld [vmem:[#allocation90_spill] sm:$0xff] }
 0x240   : > { %v2113_v55 = vadd.bf16 %v2081_v39, %v1665_v58  ;;  %vm1899_vm11 = vcmp.eq.s32.totalorder %v5864_v30, %v1741_v46  ;;  %4818 = vset.pattern.permute.xlu1 %v7958_v59  ;;  %vm2347_vm15 = vcmp.eq.s32.totalorder %v5864_v30, %v6109_v49  ;;  %vm1456_vm0 = vcmp.eq.s32.totalorder %v5864_v30, %v6264_v2  ;;  %v8151_v39 = vld [vmem:[#allocation18_spill] sm:$0xff]  ;;  %v8152_v49 = vld [vmem:[#allocation133_spill] sm:$0xff] }
 0x241   : > { %v4214_v51 = vsel %vm1899_vm11, 1.0, %v8054_v31  ;;  %1364 = vperm.xlu1 %4818, %v8146_v45   ;;  %v6629_v63 = vadd.bf16 %v1191_v37, %v8149_v48  ;;  %v4154_v17 = vsel %vm1455_vm12, 1.0, %v8054_v31  ;;  %v2082_v50 = vpack.c.bf16 %v4213_v53, %v4212_v5  ;;  %v8156_v5 = vld [vmem:[#allocation83_spill] sm:$0xff]  ;;  %v8157_v53 = vld [vmem:[#allocation84_spill] sm:$0xff] }
 0x242   : > { %v2561_v28 = vadd.bf16 %v2529_v41, %v2113_v55  ;;  %v2083_v15 = vpack.c.bf16 %v4215_v1, %v4214_v51  ;;  %v1666_v58 = vadd.bf16 %v1634_v13, %v6341_v19  ;;  %v2530_v23 = vpack.c.bf16 %v8150_v32, %v4276_v3  ;;  %v8154_v55 = vld [vmem:[#allocation135_spill] sm:$0xff]  ;;  %v8160_v48 = vld [vmem:[#allocation28_spill] sm:$0xff] }
 0x243   : > { %v1750_v44 = vpop.permute.xlu0 %1749  ;;  %v1667_v56 = vadd.bf16 %v1635_v57, %v6355_v8  ;;  %v4153_v29 = vsel %vm1454_vm13, 1.0, %v8054_v31  ;;  %v4152_v37 = vsel %vm1453_vm14, 1.0, %v8054_v31  ;;  %vm1901_vm2 = vcmp.eq.s32.totalorder %v5864_v30, %v8151_v39  ;;  %v8155_v13 = vld [vmem:[#allocation31_spill] sm:$0xff]  ;;  %v8158_v57 = vld [vmem:[#allocation33_spill] sm:$0xff] }
 0x244   : > { %v6623_v6 = vpop.permute.xlu1 %1767  ;;  %vm1902_vm1 = vcmp.eq.s32.totalorder %v5864_v30, %v1750_v44  ;;  %4504 = vmatmul.mubr.bf16.gmra.mrb[8].mxu0 %v2560_v24  ;;  %v4278_v19 = vsel %vm2347_vm15, 1.0, %v8054_v31  ;;  %v4155_v8 = vsel %vm1456_vm0, 1.0, %v8054_v31  ;;  %vm1903_vm3 = vcmp.eq.s32.totalorder %v5864_v30, %v6351_v7 }
 0x245   : > { %1367 = vperm.xlu1 %4818, %v6637_v27   ;;  %4507 = vmatprep.mubr.bf16.mxu0 %v2561_v28  ;;  %v2115_v41 = vadd.bf16 %v2083_v15, %v1667_v56  ;;  %v4217_v16 = vsel %vm1902_vm1, 1.0, %v8054_v31  ;;  %vm1458_vm5 = vcmp.eq.s32.totalorder %v5864_v30, %v8152_v49  ;;  %v2114_v46 = vadd.bf16 %v2082_v50, %v1666_v58 }
 0x246   : > { %v1636_v11 = vpack.c.bf16 %v4153_v29, %v4152_v37  ;;  %vm1460_vm6 = vcmp.eq.s32.totalorder %v5864_v30, %v8154_v55  ;;  %v4216_v42 = vsel %vm1901_vm2, 1.0, %v8054_v31  ;;  %v2531_v38 = vpack.c.bf16 %v8155_v13, %v4278_v19  ;;  %v8161_v37 = vld [vmem:[#allocation70_spill] sm:$0xff] }
 0x247   : > { %v1756_v35 = vpop.permute.xlu0 %1755  ;;  %v1637_v51 = vpack.c.bf16 %v4155_v8, %v4154_v17  ;;  %vm2354_vm7 = vcmp.eq.s32.totalorder %v5864_v30, %v8156_v5  ;;  %vm2356_vm8 = vcmp.eq.s32.totalorder %v5864_v30, %v8157_v53  ;;  %vm2350_vm9 = vcmp.eq.s32.totalorder %v5864_v30, %v8158_v57 }
 0x248   : > { %vm1904_vm4 = vcmp.eq.s32.totalorder %v5864_v30, %v1756_v35  ;;  %v6667_v10 = vpop.permute.xlu1 %1770  ;;  %v4218_v28 = vsel %vm1903_vm3, 1.0, %v8054_v31  ;;  %v2084_v3 = vpack.c.bf16 %v4217_v16, %v4216_v42  ;;  %v2562_v1 = vadd.bf16 %v2530_v23, %v2114_v46 }
 0x249   : > { %v4219_v2 = vsel %vm1904_vm4, 1.0, %v8054_v31  ;;  %1373 = vperm.xlu1 %4818, %v8153_v20   ;;  %vm2352_vm10 = vcmp.eq.s32.totalorder %v5864_v30, %v6466_v54  ;;  %vm1459_vm11 = vcmp.eq.s32.totalorder %v5864_v30, %v6534_v12  ;;  %v2563_v24 = vadd.bf16 %v2531_v38, %v2115_v41 }
 0x24a   : > { %v2085_v44 = vpack.c.bf16 %v4219_v2, %v4218_v28  ;;  %vm1013_vm12 = vcmp.eq.s32.totalorder %v5864_v30, %v8159_v61  ;;  %v4157_v7 = vsel %vm1458_vm5, 1.0, %v8054_v31  ;;  %v1668_v15 = vadd.bf16 %v1636_v11, %v6366_v14  ;;  %v8163_v11 = vld [vmem:[#allocation23_spill] sm:$0xff] }
 0x24b   : > { %v1765_v25 = vpop.permute.xlu0 %1764  ;;  %vm2349_vm13 = vcmp.eq.s32.totalorder %v5864_v30, %v8160_v48  ;;  %vm1457_vm14 = vcmp.eq.s32.totalorder %v5864_v30, %v6298_v21  ;;  %v4159_v50 = vsel %vm1460_vm6, 1.0, %v8054_v31  ;;  %v4281_v14 = vsel %vm2350_vm9, 1.0, %v8054_v31 }
 0x24c   : > { %4508 = vmatmul.mubr.bf16.gmra.mrb[12].mxu0 %v2562_v1  ;;  %v1669_v58 = vadd.bf16 %v1637_v51, %v6381_v47  ;;  %vm1907_vm15 = vcmp.eq.s32.totalorder %v5864_v30, %v1765_v25  ;;  %vm1906_vm0 = vcmp.eq.s32.totalorder %v5864_v30, %v6436_v43  ;;  %v4283_v21 = vsel %vm2352_vm10, 1.0, %v8054_v31  ;;  %v8164_v1 = vld [vmem:[#allocation20_spill] sm:$0xff] }
 0x24d   : > { %4819 = vset.pattern.permute.xlu1 %v7962_v40  ;;  %v2213_v17 = vpop.permute.xlu1 %2212  ;;  %4511 = vmatprep.mubr.bf16.mxu0 %v2563_v24  ;;  %v4158_v32 = vsel %vm1459_vm11, 1.0, %v8054_v31  ;;  %v2116_v23 = vadd.bf16 %v2084_v3, %v1668_v15  ;;  %v4280_v47 = vsel %vm2349_vm13, 1.0, %v8054_v31  ;;  %v4156_v56 = vsel %vm1457_vm14, 1.0, %v8054_v31 }
 0x24e   : > { %1812 = vperm.xlu1 %4819, %v8146_v45   ;;  %vm1908_vm1 = vcmp.eq.s32.totalorder %v5864_v30, %v6623_v6  ;;  %v2117_v45 = vadd.bf16 %v2085_v44, %v1669_v58  ;;  %v2532_v43 = vpack.c.bf16 %v4281_v14, %v4280_v47  ;;  %vm1905_vm2 = vcmp.eq.s32.totalorder %v5864_v30, %v6397_v62  ;;  %v8162_v6 = vld [vmem:[#allocation105_spill] sm:$0xff] }
 0x24f   : > { %vm2353_vm3 = vcmp.eq.s32.totalorder %v5864_v30, %v6501_v9  ;;  %v4222_v54 = vsel %vm1907_vm15, 1.0, %v8054_v31  ;;  %v4221_v29 = vsel %vm1906_vm0, 1.0, %v8054_v31  ;;  %v2533_v39 = vpack.c.bf16 %v4283_v21, %v8161_v37  ;;  %v1774_v49 = vpop.permute.xlu0 %1773  ;;  %v8165_v44 = vld [vmem:[#allocation21_spill] sm:$0xff]  ;;  %v8170_v37 = vld [vmem:[#allocation106_spill] sm:$0xff] }
 0x250   : > { %v1639_v19 = vpack.c.bf16 %v4159_v50, %v4158_v32  ;;  %vm2355_vm4 = vcmp.eq.s32.totalorder %v5864_v30, %v2213_v17  ;;  %vm1014_vm5 = vcmp.eq.s32.totalorder %v5864_v30, %v8162_v6  ;;  %v1638_v8 = vpack.c.bf16 %v4157_v7, %v4156_v56  ;;  %v8167_v56 = vld [vmem:[#allocation34_spill] sm:$0xff]  ;;  %v8173_v6 = vld [vmem:[#allocation91_spill] sm:$0xff] }
 0x251   : > { %v2219_v12 = vpop.permute.xlu1 %2218  ;;  %v4223_v62 = vsel %vm1908_vm1, 1.0, %v8054_v31  ;;  %v2564_v35 = vadd.bf16 %v2532_v43, %v2116_v23  ;;  %v4220_v9 = vsel %vm1905_vm2, 1.0, %v8054_v31  ;;  %v4284_v41 = vsel %vm2353_vm3, 1.0, %v8054_v31 }
 0x252   : > { %1818 = vperm.xlu1 %4819, %v6563_v33   ;;  %v2087_v16 = vpack.c.bf16 %v4223_v62, %v4222_v54  ;;  %v2565_v46 = vadd.bf16 %v2533_v39, %v2117_v45  ;;  %v1222_v2 = vadd.bf16 %v1190_v34, %v8163_v11  ;;  %v2086_v55 = vpack.c.bf16 %v4221_v29, %v4220_v9  ;;  %v8169_v54 = vld [vmem:[#allocation26_spill] sm:$0xff] }
 0x253   : > { %vm1462_vm6 = vcmp.eq.s32.totalorder %v5864_v30, %v6593_v18  ;;  %v4286_v42 = vsel %vm2355_vm4, 1.0, %v8054_v31  ;;  %v4285_v38 = vsel %vm2354_vm7, 1.0, %v8054_v31  ;;  %v4287_v51 = vsel %vm2356_vm8, 1.0, %v8054_v31  ;;  %v1780_v39 = vpop.permute.xlu0 %1779 }
 0x254   : > { %4512 = vmatmul.mubr.bf16.gmra.mrb[16].mxu0 %v2564_v35  ;;  %v4097_v52 = vsel %vm1014_vm5, 1.0, %v8054_v31  ;;  %v1671_v60 = vadd.bf16 %v1639_v19, %v6629_v63  ;;  %v1670_v34 = vadd.bf16 %v1638_v8, %v1222_v2  ;;  %v2534_v18 = vpack.c.bf16 %v4285_v38, %v4284_v41  ;;  %v8172_v19 = vld [vmem:[#allocation37_spill] sm:$0xff]  ;;  %v6807_v41 = vld [vmem:[%s5074_s17 + $0x170] sm:$0xff] }
 0x255   : > { %v2222_v13 = vpop.permute.xlu1 %2221  ;;  %4515 = vmatprep.mubr.bf16.mxu0 %v2565_v46  ;;  %vm1461_vm7 = vcmp.eq.s32.totalorder %v5864_v30, %v6555_v0  ;;  %vm1910_vm9 = vcmp.eq.s32.totalorder %v5864_v30, %v1774_v49  ;;  %v4096_v5 = vsel %vm1013_vm12, 1.0, %v8054_v31  ;;  %v4161_v53 = vsel %vm1462_vm6, 1.0, %v8054_v31  ;;  %v8174_v8 = vld [vmem:[#allocation137_spill] sm:$0xff]  ;;  %v8175_v49 = vld [vmem:[#allocation107_spill] sm:$0xff] }
 0x256   : > { %1821 = vperm.xlu1 %4819, %v8153_v20   ;;  %v2119_v57 = vadd.bf16 %v2087_v16, %v1671_v60  ;;  %v2535_v28 = vpack.c.bf16 %v4287_v51, %v4286_v42  ;;  %v1192_v63 = vpack.c.bf16 %v4097_v52, %v4096_v5  ;;  %v2118_v3 = vadd.bf16 %v2086_v55, %v1670_v34  ;;  %v8176_v42 = vld [vmem:[#allocation92_spill] sm:$0xff]  ;;  %v8177_v38 = vld [vmem:[#allocation139_spill] sm:$0xff] }
 0x257   : > { %vm1909_vm8 = vcmp.eq.s32.totalorder %v5864_v30, %v6667_v10  ;;  %vm2358_vm10 = vcmp.eq.s32.totalorder %v5864_v30, %v2222_v13  ;;  %v4160_v0 = vsel %vm1461_vm7, 1.0, %v8054_v31  ;;  %v4225_v20 = vsel %vm1910_vm9, 1.0, %v8054_v31 }
 0x258   : > { %v8166_v24 = vpack.c.bf16 %v8164_v1, %v8165_v44  ;;  %v1640_v7 = vpack.c.bf16 %v4161_v53, %v4160_v0  ;;  %vm2357_vm11 = vcmp.eq.s32.totalorder %v5864_v30, %v2219_v12  ;;  %v2566_v15 = vadd.bf16 %v2534_v18, %v2118_v3  ;;  %v8178_v18 = vld [vmem:[#allocation30_spill] sm:$0xff] }
 0x259   : > { %v4224_v10 = vsel %vm1909_vm8, 1.0, %v8054_v31  ;;  %v4289_v48 = vsel %vm2358_vm10, 1.0, %v8054_v31  ;;  %v2567_v17 = vadd.bf16 %v2535_v28, %v2119_v57  ;;  %v4288_v58 = vsel %vm2357_vm11, 1.0, %v8054_v31  ;;  %v8179_v28 = vld [vmem:[#allocation85_spill] sm:$0xff] }
 0x25a   : > { %4820 = vset.pattern.permute.xlu1 %v7950_v36  ;;  %v1332_v25 = vpop.permute.xlu1 %1331  ;;  %v776_v61 = vadd.bf16 0, %v8166_v24  ;;  %v2088_v14 = vpack.c.bf16 %v4225_v20, %v4224_v10  ;;  %v2536_v23 = vpack.c.bf16 %v4289_v48, %v4288_v58  ;;  %vm568_vm12 = vcmp.eq.s32.totalorder %v5864_v30, %v8167_v56  ;;  %v4891_v10 = vld [vmem:[%s5074_s17 + $0x168] sm:$0xff] }
 0x25b   : > { %2263 = vperm.xlu1 %4820, %v6637_v27   ;;  %v8168_v27 = vld [vmem:[#allocation35_spill] sm:$0xff]  ;;  %v4035_v12 = vsel %vm568_vm12, 1.0, %v8054_v31  ;;  %vm1016_vm14 = vcmp.eq.s32.totalorder %v5864_v30, %v8170_v37  ;;  %vm569_vm0 = vcmp.eq.s32.totalorder %v5864_v30, %v8172_v19  ;;  %vm1015_vm1 = vcmp.eq.s32.totalorder %v5864_v30, %v8173_v6 }
 0x25c   : > { %v1224_v50 = vadd.bf16 %v1192_v63, %v776_v61  ;;  %4516 = vmatmul.mubr.bf16.gmra.mrb[20].mxu0 %v2566_v15  ;;  %vm567_vm13 = vcmp.eq.s32.totalorder %v5864_v30, %v8168_v27  ;;  %vm1463_vm2 = vcmp.eq.s32.totalorder %v5864_v30, %v8174_v8  ;;  %vm1464_vm3 = vcmp.eq.s32.totalorder %v5864_v30, %v1332_v25 }
 0x25d   : > { %4519 = vmatprep.mubr.bf16.mxu0 %v2567_v17  ;;  %v4034_v29 = vsel %vm567_vm13, 1.0, %v8054_v31  ;;  %v4099_v9 = vsel %vm1016_vm14, 1.0, %v8054_v31  ;;  %vm1018_vm4 = vcmp.eq.s32.totalorder %v5864_v30, %v8175_v49  ;;  %vm1912_vm6 = vcmp.eq.s32.totalorder %v5864_v30, %v1780_v39  ;;  %v8180_v17 = vld [vmem:[#allocation87_spill] sm:$0xff]  ;;  %v8183_v49 = vld [vmem:[#allocation108_spill] sm:$0xff] }
 0x25e   : > { %v1335_v21 = vpop.permute.xlu1 %1334  ;;  %v1672_v32 = vadd.bf16 %v1640_v7, %v1224_v50  ;;  %v745_v35 = vpack.c.bf16 %v4035_v12, %v4034_v29  ;;  %v4036_v46 = vsel %vm569_vm0, 1.0, %v8054_v31  ;;  %v4098_v11 = vsel %vm1015_vm1, 1.0, %v8054_v31  ;;  %v1789_v12 = vpop.permute.xlu0 %1788 }
 0x25f   : > { %2266 = vperm.xlu1 %4820, %v6563_v33   ;;  %v8171_v33 = vld [vmem:[#allocation36_spill] sm:$0xff]  ;;  %v4162_v2 = vsel %vm1463_vm2, 1.0, %v8054_v31  ;;  %v4163_v55 = vsel %vm1464_vm3, 1.0, %v8054_v31  ;;  %vm1017_vm7 = vcmp.eq.s32.totalorder %v5864_v30, %v8176_v42  ;;  %v1193_v13 = vpack.c.bf16 %v4099_v9, %v4098_v11  ;;  %v8185_v11 = vld [vmem:[#allocation141_spill] sm:$0xff] }
 0x260   : > { %v2120_v47 = vadd.bf16 %v2088_v14, %v1672_v32  ;;  %vm570_vm15 = vcmp.eq.s32.totalorder %v5864_v30, %v8171_v33  ;;  %vm1466_vm9 = vcmp.eq.s32.totalorder %v5864_v30, %v8177_v38  ;;  %vm1465_vm8 = vcmp.eq.s32.totalorder %v5864_v30, %v1335_v21  ;;  %v8186_v38 = vld [vmem:[#allocation40_spill] sm:$0xff] }
 0x261   : > { %v4037_v16 = vsel %vm570_vm15, 1.0, %v8054_v31  ;;  %v4101_v52 = vsel %vm1018_vm4, 1.0, %v8054_v31  ;;  %v4227_v34 = vsel %vm1912_vm6, 1.0, %v8054_v31  ;;  %v777_v5 = vadd.bf16 0, %v745_v35  ;;  %v8182_v35 = vld [vmem:[#allocation39_spill] sm:$0xff] }
 0x262   : > { %v2568_v43 = vadd.bf16 %v2536_v23, %v2120_v47  ;;  %v746_v53 = vpack.c.bf16 %v4037_v16, %v4036_v46  ;;  %v1641_v57 = vpack.c.bf16 %v4163_v55, %v4162_v2  ;;  %vm2359_vm11 = vcmp.eq.s32.totalorder %v5864_v30, %v8179_v28  ;;  %v6853_v19 = vpop.permute.xlu0 %1797  ;;  %v8184_v46 = vld [vmem:[#allocation94_spill] sm:$0xff] }
 0x263   : > { %4821 = vset.pattern.permute.xlu1 %v8139_v4  ;;  %v1777_v45 = vpop.permute.xlu1 %1776  ;;  %v4100_v63 = vsel %vm1017_vm7, 1.0, %v8054_v31  ;;  %v4165_v3 = vsel %vm1466_vm9, 1.0, %v8054_v31  ;;  %v4164_v0 = vsel %vm1465_vm8, 1.0, %v8054_v31  ;;  %v1225_v20 = vadd.bf16 %v1193_v13, %v777_v5 }
 0x264   : > { %928 = vperm.xlu1 %4821, %v8169_v54   ;;  %4520 = vmatmul.mubr.bf16.gmra.mrb[24].mxu0 %v2568_v43  ;;  %vm1911_vm5 = vcmp.eq.s32.totalorder %v5864_v30, %v1777_v45  ;;  %v1194_v25 = vpack.c.bf16 %v4101_v52, %v4100_v63  ;;  %v778_v61 = vadd.bf16 0, %v746_v53  ;;  %v1642_v15 = vpack.c.bf16 %v4165_v3, %v4164_v0  ;;  %v8188_v0 = vld [vmem:[#allocation109_spill] sm:$0xff] }
 0x265   : > { %v4226_v60 = vsel %vm1911_vm5, 1.0, %v8054_v31  ;;  %v1673_v7 = vadd.bf16 %v1641_v57, %v1225_v20  ;;  %v4290_v48 = vsel %vm2359_vm11, 1.0, %v8054_v31  ;;  %vm2362_vm14 = vcmp.eq.s32.totalorder %v5864_v30, %v8180_v17 }
 0x266   : > { %v2089_v1 = vpack.c.bf16 %v4227_v34, %v4226_v60  ;;  %v1226_v58 = vadd.bf16 %v1194_v25, %v778_v61  ;;  %v4293_v45 = vsel %vm2362_vm14, 1.0, %v8054_v31  ;;  %v6856_v8 = vpop.permute.xlu0 %1803  ;;  %vm571_vm1 = vcmp.eq.s32.totalorder %v5864_v30, %v8182_v35 }
 0x267   : > { %v1783_v62 = vpop.permute.xlu1 %1782  ;;  %vm1020_vm2 = vcmp.eq.s32.totalorder %v5864_v30, %v8183_v49  ;;  %vm1019_vm3 = vcmp.eq.s32.totalorder %v5864_v30, %v8184_v46  ;;  %vm1468_vm4 = vcmp.eq.s32.totalorder %v5864_v30, %v8185_v11  ;;  %vm574_vm6 = vcmp.eq.s32.totalorder %v5864_v30, %v8186_v38 }
 0x268   : > { %934 = vperm.xlu1 %4821, %v6807_v41   ;;  %vm1913_vm12 = vcmp.eq.s32.totalorder %v5864_v30, %v1783_v62  ;;  %v2121_v21 = vadd.bf16 %v2089_v1, %v1673_v7  ;;  %v1674_v56 = vadd.bf16 %v1642_v15, %v1226_v58  ;;  %v8181_v62 = vld [vmem:[#allocation38_spill] sm:$0xff]  ;;  %v4103_v13 = vsel %vm1020_vm2, 1.0, %v8054_v31  ;;  %v8189_v1 = vld [vmem:[#allocation89_spill] sm:$0xff] }
 0x269   : > { %v4228_v50 = vsel %vm1913_vm12, 1.0, %v8054_v31  ;;  %vm572_vm0 = vcmp.eq.s32.totalorder %v5864_v30, %v8181_v62  ;;  %vm1915_vm9 = vcmp.eq.s32.totalorder %v5864_v30, %v1789_v12  ;;  %v4102_v52 = vsel %vm1019_vm3, 1.0, %v8054_v31 }
 0x26a   : > { %v4039_v16 = vsel %vm572_vm0, 1.0, %v8054_v31  ;;  %v6873_v55 = vpop.permute.xlu0 %1815  ;;  %v4167_v60 = vsel %vm1468_vm4, 1.0, %v8054_v31  ;;  %v4230_v28 = vsel %vm1915_vm9, 1.0, %v8054_v31  ;;  %v4041_v63 = vsel %vm574_vm6, 1.0, %v8054_v31 }
 0x26b   : > { %v1786_v51 = vpop.permute.xlu1 %1785  ;;  %vm2364_vm11 = vcmp.eq.s32.totalorder %v5864_v30, %v8189_v1  ;;  %vm1918_vm14 = vcmp.eq.s32.totalorder %v5864_v30, %v6853_v19  ;;  %v8192_v19 = vld [vmem:[#allocation73_spill] sm:$0xff] }
 0x26c   : > { %937 = vperm.xlu1 %4821, %v8178_v18   ;;  %vm1914_vm10 = vcmp.eq.s32.totalorder %v5864_v30, %v1786_v51  ;;  %v8187_v51 = vld [vmem:[#allocation41_spill] sm:$0xff]  ;;  %v4295_v17 = vsel %vm2364_vm11, 1.0, %v8054_v31 }
 0x26d   : > { %v4229_v44 = vsel %vm1914_vm10, 1.0, %v8054_v31  ;;  %vm573_vm8 = vcmp.eq.s32.totalorder %v5864_v30, %v8187_v51  ;;  %vm1022_vm10 = vcmp.eq.s32.totalorder %v5864_v30, %v8188_v0  ;;  %v8193_v51 = vld [vmem:[#allocation42_spill] sm:$0xff]  ;;  %v8199_v0 = vld [vmem:[#allocation7_spill] sm:$0xff] }
 0x26e   : > { %v2090_v32 = vpack.c.bf16 %v4229_v44, %v4228_v50  ;;  %v4040_v3 = vsel %vm573_vm8, 1.0, %v8054_v31  ;;  %v6892_v25 = vpop.permute.xlu0 %1827  ;;  %v8190_v44 = vld [vmem:[#allocation96_spill] sm:$0xff]  ;;  %v4105_v7 = vsel %vm1022_vm10, 1.0, %v8054_v31  ;;  %vm576_vm4 = vcmp.eq.s32.totalorder %v5864_v30, %v8193_v51 }
 0x26f   : > { %vm1021_vm12 = vcmp.eq.s32.totalorder %v5864_v30, %v8190_v44  ;;  %v748_v61 = vpack.c.bf16 %v4041_v63, %v4040_v3  ;;  %v8197_v63 = vld [vmem:[#allocation45_spill] sm:$0xff]  ;;  %vm1471_vm10 = vcmp.eq.s32.totalorder %v5864_v30, %v8199_v0 }
 0x270   : > { %4822 = vset.pattern.permute.xlu1 %v7958_v59  ;;  %v2228_v24 = vpop.permute.xlu1 %2227  ;;  %v2122_v29 = vadd.bf16 %v2090_v32, %v1674_v56  ;;  %v4104_v50 = vsel %vm1021_vm12, 1.0, %v8054_v31  ;;  %vm577_vm9 = vcmp.eq.s32.totalorder %v5864_v30, %v8197_v63  ;;  %v8198_v3 = vld [vmem:[#allocation97_spill] sm:$0xff] }
 0x271   : > { %vm2360_vm13 = vcmp.eq.s32.totalorder %v5864_v30, %v2228_v24  ;;  %1379 = vperm.xlu1 %4822, %v4891_v10   ;;  %v780_v12 = vadd.bf16 0, %v748_v61  ;;  %vm1023_vm8 = vcmp.eq.s32.totalorder %v5864_v30, %v8198_v3  ;;  %v4044_v61 = vsel %vm577_vm9, 1.0, %v8054_v31 }
 0x272   : > { %v4291_v14 = vsel %vm2360_vm13, 1.0, %v8054_v31 }
 0x273   : > { %v2537_v23 = vpack.c.bf16 %v4291_v14, %v4290_v48 }
 0x274   : > { %v2231_v47 = vpop.permute.xlu1 %2230 }
 0x275   : > { %vm2361_vm15 = vcmp.eq.s32.totalorder %v5864_v30, %v2231_v47  ;;  %1382 = vperm.xlu1 %4822, %v6807_v41   ;;  %v2569_v27 = vadd.bf16 %v2537_v23, %v2121_v21  ;;  %v1196_v21 = vpack.c.bf16 %v4105_v7, %v4104_v50  ;;  %v6911_v47 = vpop.permute.xlu0 %1839  ;;  %v8200_v7 = vld [vmem:[#allocation5_spill] sm:$0xff] }
 0x276   : > { %v4292_v43 = vsel %vm2361_vm15, 1.0, %v8054_v31  ;;  %vm1026_vm12 = vcmp.eq.s32.totalorder %v5864_v30, %v8200_v7  ;;  %v8203_v7 = vld [vmem:[#allocation46_spill] sm:$0xff] }
 0x277   : > { %v2538_v37 = vpack.c.bf16 %v4293_v45, %v4292_v43  ;;  %4523 = vmatprep.mubr.bf16.mxu0 %v2569_v27  ;;  %v4233_v45 = vsel %vm1918_vm14, 1.0, %v8054_v31  ;;  %vm580_vm9 = vcmp.eq.s32.totalorder %v5864_v30, %v8203_v7 }
 0x279   : > { %4823 = vset.pattern.permute.xlu1 %v7962_v40  ;;  %v1341_v33 = vpop.permute.xlu1 %1340  ;;  %v2570_v39 = vadd.bf16 %v2538_v37, %v2122_v29  ;;  %v6920_v37 = vld [vmem:[%s5074_s17 + $0x190] sm:$0xff] }
 0x27a   : > { %1824 = vperm.xlu1 %4823, %v8169_v54   ;;  %v4038_v54 = vsel %vm571_vm1, 1.0, %v8054_v31  ;;  %vm1467_vm5 = vcmp.eq.s32.totalorder %v5864_v30, %v1341_v33 }
 0x27b   : > { %4524 = vmatmul.mubr.bf16.gmra.mrb[28].mxu0 %v2570_v39  ;;  %v747_v42 = vpack.c.bf16 %v4039_v16, %v4038_v54  ;;  %v4166_v34 = vsel %vm1467_vm5, 1.0, %v8054_v31  ;;  %v1228_v39 = vadd.bf16 %v1196_v21, %v780_v12 }
 0x27c   : > { %v1643_v20 = vpack.c.bf16 %v4167_v60, %v4166_v34 }
 0x27d   : > { %v1347_v6 = vpop.permute.xlu1 %1346  ;;  %v779_v53 = vadd.bf16 0, %v747_v42  ;;  %v6932_v42 = vld [vmem:[%s5074_s17 + $0x188] sm:$0xff] }
 0x27e   : > { %1830 = vperm.xlu1 %4823, %v6807_v41   ;;  %vm1469_vm15 = vcmp.eq.s32.totalorder %v5864_v30, %v1347_v6 }
 0x27f   : > { %v4168_v56 = vsel %vm1469_vm15, 1.0, %v8054_v31 }
 0x281   : > { %v1350_v9 = vpop.permute.xlu1 %1349 }
 0x282   : > { %1833 = vperm.xlu1 %4823, %v8178_v18   ;;  %v1195_v18 = vpack.c.bf16 %v4103_v13, %v4102_v52  ;;  %vm1470_vm13 = vcmp.eq.s32.totalorder %v5864_v30, %v1350_v9  ;;  %v6926_v9 = vpop.permute.xlu0 %1851  ;;  %v8194_v52 = vld [vmem:[#allocation43_spill] sm:$0xff] }
 0x283   : > { %v4169_v14 = vsel %vm1470_vm13, 1.0, %v8054_v31  ;;  %vm575_vm5 = vcmp.eq.s32.totalorder %v5864_v30, %v8194_v52  ;;  %vm1920_vm13 = vcmp.eq.s32.totalorder %v5864_v30, %v6856_v8  ;;  %v4109_v8 = vsel %vm1026_vm12, 1.0, %v8054_v31 }
 0x284   : > { %v1227_v24 = vadd.bf16 %v1195_v18, %v779_v53  ;;  %v1644_v29 = vpack.c.bf16 %v4169_v14, %v4168_v56  ;;  %v4894_v18 = vld [vmem:[%s5074_s17 + $0x180] sm:$0xff]  ;;  %v4042_v53 = vsel %vm575_vm5, 1.0, %v8054_v31  ;;  %v8202_v14 = vld [vmem:[#allocation8_spill] sm:$0xff] }
 0x285   : > { %v4895_v56 = vld [vmem:[%s5074_s17 + $0x198] sm:$0xff] }
 0x286   : > { %4824 = vset.pattern.permute.xlu1 %v7950_v36  ;;  %v1792_v2 = vpop.permute.xlu1 %1791  ;;  %v1675_v48 = vadd.bf16 %v1643_v20, %v1227_v24  ;;  %v1676_v35 = vadd.bf16 %v1644_v29, %v1228_v39  ;;  %v6935_v13 = vpop.permute.xlu0 %1863 }
 0x287   : > { %2275 = vperm.xlu1 %4824, %v4891_v10   ;;  %vm1916_vm7 = vcmp.eq.s32.totalorder %v5864_v30, %v1792_v2  ;;  %v8191_v10 = vld [vmem:[#allocation71_spill] sm:$0xff] }
 0x288   : > { %v4231_v57 = vsel %vm1916_vm7, 1.0, %v8054_v31 }
 0x28a   : > { %v1795_v5 = vpop.permute.xlu1 %1794  ;;  %v6942_v60 = vpop.permute.xlu0 %1875 }
 0x28b   : > { %2278 = vperm.xlu1 %4824, %v6807_v41   ;;  %v2091_v41 = vpack.c.bf16 %v4231_v57, %v4230_v28  ;;  %vm1917_vm0 = vcmp.eq.s32.totalorder %v5864_v30, %v1795_v5  ;;  %v4043_v5 = vsel %vm576_vm4, 1.0, %v8054_v31  ;;  %v8195_v57 = vld [vmem:[#allocation44_spill] sm:$0xff]  ;;  %v8196_v28 = vld [vmem:[#allocation110_spill] sm:$0xff] }
 0x28c   : > { %v4232_v27 = vsel %vm1917_vm0, 1.0, %v8054_v31  ;;  %vm578_vm6 = vcmp.eq.s32.totalorder %v5864_v30, %v8195_v57  ;;  %vm1024_vm7 = vcmp.eq.s32.totalorder %v5864_v30, %v8196_v28  ;;  %v749_v1 = vpack.c.bf16 %v4043_v5, %v4042_v53 }
 0x28d   : > { %v2123_v32 = vadd.bf16 %v2091_v41, %v1675_v48  ;;  %v2092_v6 = vpack.c.bf16 %v4233_v45, %v4232_v27  ;;  %v4045_v44 = vsel %vm578_vm6, 1.0, %v8054_v31  ;;  %v4107_v24 = vsel %vm1024_vm7, 1.0, %v8054_v31 }
 0x28e   : > { %v2249_v41 = vpop.permute.xlu0 %2248  ;;  %vm1474_vm0 = vcmp.eq.s32.totalorder %v5864_v30, %v8202_v14  ;;  %v750_v21 = vpack.c.bf16 %v4045_v44, %v4044_v61  ;;  %v781_v27 = vadd.bf16 0, %v749_v1  ;;  %v7001_v1 = vld [vmem:[%s5074_s17 + $0x1b0] sm:$0xff]  ;;  %v7007_v61 = vld [vmem:[%s5074_s17 + $0x1a8] sm:$0xff] }
 0x28f   : > { %4825 = vset.pattern.permute.xlu1 %v8139_v4  ;;  %v2237_v15 = vpop.permute.xlu1 %2236  ;;  %v2124_v49 = vadd.bf16 %v2092_v6, %v1676_v35  ;;  %v4173_v12 = vsel %vm1474_vm0, 1.0, %v8054_v31 }
 0x290   : > { %vm2363_vm1 = vcmp.eq.s32.totalorder %v5864_v30, %v2237_v15  ;;  %940 = vperm.xlu1 %4825, %v8191_v10   ;;  %v4106_v15 = vsel %vm1023_vm8, 1.0, %v8054_v31  ;;  %v4170_v10 = vsel %vm1471_vm10, 1.0, %v8054_v31  ;;  %v782_v35 = vadd.bf16 0, %v750_v21 }
 0x291   : > { %v4294_v58 = vsel %vm2363_vm1, 1.0, %v8054_v31  ;;  %v1197_v50 = vpack.c.bf16 %v4107_v24, %v4106_v15  ;;  %v8204_v15 = vld [vmem:[#allocation47_spill] sm:$0xff] }
 0x292   : > { %v2539_v23 = vpack.c.bf16 %v4295_v17, %v4294_v58  ;;  %v8201_v17 = vld [vmem:[#allocation98_spill] sm:$0xff]  ;;  %vm579_vm8 = vcmp.eq.s32.totalorder %v5864_v30, %v8204_v15 }
 0x293   : > { %v2243_v43 = vpop.permute.xlu1 %2242  ;;  %vm1025_vm15 = vcmp.eq.s32.totalorder %v5864_v30, %v8201_v17  ;;  %v1229_v39 = vadd.bf16 %v1197_v50, %v781_v27  ;;  %v8206_v17 = vld [vmem:[#allocation49_spill] sm:$0xff]  ;;  %v4047_v50 = vsel %vm580_vm9, 1.0, %v8054_v31  ;;  %v4046_v14 = vsel %vm579_vm8, 1.0, %v8054_v31 }
 0x294   : > { %946 = vperm.xlu1 %4825, %v6920_v37   ;;  %v2571_v33 = vadd.bf16 %v2539_v23, %v2123_v32  ;;  %vm2365_vm2 = vcmp.eq.s32.totalorder %v5864_v30, %v2243_v43  ;;  %v4235_v32 = vsel %vm1920_vm13, 1.0, %v8054_v31  ;;  %v4108_v43 = vsel %vm1025_vm15, 1.0, %v8054_v31 }
 0x295   : > { %v4296_v16 = vsel %vm2365_vm2, 1.0, %v8054_v31  ;;  %v1198_v6 = vpack.c.bf16 %v4109_v8, %v4108_v43  ;;  %vm1924_vm15 = vcmp.eq.s32.totalorder %v5864_v30, %v6873_v55 }
 0x296   : > { %4527 = vmatprep.mubr.bf16.mxu1 %v2571_v33  ;;  %v2258_v33 = vpop.permute.xlu0 %2257 }
 0x297   : > { %v2246_v62 = vpop.permute.xlu1 %2245  ;;  %vm2370_vm6 = vcmp.eq.s32.totalorder %v5864_v30, %v2258_v33 }
 0x298   : > { %vm2366_vm3 = vcmp.eq.s32.totalorder %v5864_v30, %v2246_v62  ;;  %949 = vperm.xlu1 %4825, %v8192_v19   ;;  %v4301_v5 = vsel %vm2370_vm6, 1.0, %v8054_v31 }
 0x299   : > { %v4297_v54 = vsel %vm2366_vm3, 1.0, %v8054_v31  ;;  %vm2367_vm3 = vcmp.eq.s32.totalorder %v5864_v30, %v2249_v41 }
 0x29a   : > { %v2540_v46 = vpack.c.bf16 %v4297_v54, %v4296_v16  ;;  %v4298_v54 = vsel %vm2367_vm3, 1.0, %v8054_v31 }
 0x29c   : > { %4826 = vset.pattern.permute.xlu1 %v7958_v59  ;;  %v1356_v11 = vpop.permute.xlu1 %1355  ;;  %v2572_v2 = vadd.bf16 %v2540_v46, %v2124_v49 }
 0x29d   : > { %1391 = vperm.xlu1 %4826, %v6932_v42   ;;  %vm1472_vm11 = vcmp.eq.s32.totalorder %v5864_v30, %v1356_v11 }
 0x29e   : > { %4528 = vmatmul.mubr.bf16.vlgmr.msra.gmra.mrb[0].mxu1 %v2572_v2  ;;  %v4171_v48 = vsel %vm1472_vm11, 1.0, %v8054_v31  ;;  %vm581_vm11 = vcmp.eq.s32.totalorder %v5864_v30, %v8206_v17 }
 0x29f   : > { %v1645_v45 = vpack.c.bf16 %v4171_v48, %v4170_v10  ;;  %v8205_v48 = vld [vmem:[#allocation48_spill] sm:$0xff]  ;;  %v4048_v8 = vsel %vm581_vm11, 1.0, %v8054_v31 }
 0x2a0   : > { %v1359_v38 = vpop.permute.xlu1 %1358  ;;  %vm582_vm10 = vcmp.eq.s32.totalorder %v5864_v30, %v8205_v48 }
 0x2a1   : > { %1394 = vperm.xlu1 %4826, %v6920_v37   ;;  %vm1473_vm1 = vcmp.eq.s32.totalorder %v5864_v30, %v1359_v38  ;;  %v1677_v49 = vadd.bf16 %v1645_v45, %v1229_v39  ;;  %v1230_v38 = vadd.bf16 %v1198_v6, %v782_v35  ;;  %v4049_v21 = vsel %vm582_vm10, 1.0, %v8054_v31  ;;  %v2261_v45 = vpop.permute.xlu0 %2260  ;;  %v8209_v39 = vld [vmem:[#allocation111_spill] sm:$0xff] }
 0x2a2   : > { %v4172_v29 = vsel %vm1473_vm1, 1.0, %v8054_v31  ;;  %v752_v43 = vpack.c.bf16 %v4049_v21, %v4048_v8  ;;  %vm1030_vm3 = vcmp.eq.s32.totalorder %v5864_v30, %v8209_v39  ;;  %v8210_v6 = vld [vmem:[#allocation11_spill] sm:$0xff]  ;;  %v4900_v21 = vld [vmem:[%s5074_s17 + $0x1c0] sm:$0xff] }
 0x2a3   : > { %v1646_v46 = vpack.c.bf16 %v4173_v12, %v4172_v29 }
 0x2a5   : > { %4827 = vset.pattern.permute.xlu1 %v7962_v40  ;;  %v1801_v34 = vpop.permute.xlu1 %1800  ;;  %v1678_v53 = vadd.bf16 %v1646_v46, %v1230_v38  ;;  %v4113_v46 = vsel %vm1030_vm3, 1.0, %v8054_v31  ;;  %v2270_v38 = vpop.permute.xlu0 %2269 }
 0x2a6   : > { %1836 = vperm.xlu1 %4827, %v4894_v18   ;;  %vm1919_vm14 = vcmp.eq.s32.totalorder %v5864_v30, %v1801_v34  ;;  %vm2374_vm10 = vcmp.eq.s32.totalorder %v5864_v30, %v2270_v38 }
 0x2a7   : > { %v4234_v23 = vsel %vm1919_vm14, 1.0, %v8054_v31 }
 0x2a8   : > { %v2093_v62 = vpack.c.bf16 %v4235_v32, %v4234_v23  ;;  %v8208_v32 = vld [vmem:[#allocation99_spill] sm:$0xff] }
 0x2a9   : > { %v1807_v20 = vpop.permute.xlu1 %1806  ;;  %vm1027_vm13 = vcmp.eq.s32.totalorder %v5864_v30, %v8208_v32  ;;  %v7068_v32 = vld [vmem:[%s5074_s17 + $0x1d0] sm:$0xff] }
 0x2aa   : > { %1842 = vperm.xlu1 %4827, %v6920_v37   ;;  %vm1921_vm4 = vcmp.eq.s32.totalorder %v5864_v30, %v1807_v20  ;;  %v2125_v51 = vadd.bf16 %v2093_v62, %v1677_v49  ;;  %v4896_v20 = vld [vmem:[%s5074_s17 + $0x1a0] sm:$0xff]  ;;  %v4110_v12 = vsel %vm1027_vm13, 1.0, %v8054_v31  ;;  %v4239_v62 = vsel %vm1924_vm15, 1.0, %v8054_v31 }
 0x2ab   : > { %v4236_v11 = vsel %vm1921_vm4, 1.0, %v8054_v31  ;;  %vm1477_vm4 = vcmp.eq.s32.totalorder %v5864_v30, %v8210_v6 }
 0x2ad   : > { %v1810_v58 = vpop.permute.xlu1 %1809 }
 0x2ae   : > { %1845 = vperm.xlu1 %4827, %v4895_v56   ;;  %vm1922_vm2 = vcmp.eq.s32.totalorder %v5864_v30, %v1810_v58  ;;  %v8207_v58 = vld [vmem:[#allocation6_spill] sm:$0xff]  ;;  %v751_v56 = vpack.c.bf16 %v4047_v50, %v4046_v14 }
 0x2af   : > { %v4237_v19 = vsel %vm1922_vm2, 1.0, %v8054_v31  ;;  %vm1028_vm12 = vcmp.eq.s32.totalorder %v5864_v30, %v8207_v58 }
 0x2b0   : > { %v2094_v52 = vpack.c.bf16 %v4237_v19, %v4236_v11  ;;  %v4111_v27 = vsel %vm1028_vm12, 1.0, %v8054_v31  ;;  %v4176_v11 = vsel %vm1477_vm4, 1.0, %v8054_v31 }
 0x2b1   : > { %v1199_v33 = vpack.c.bf16 %v4111_v27, %v4110_v12 }
 0x2b2   : > { %4828 = vset.pattern.permute.xlu1 %v7950_v36  ;;  %v2252_v16 = vpop.permute.xlu1 %2251  ;;  %v2126_v28 = vadd.bf16 %v2094_v52, %v1678_v53 }
 0x2b3   : > { %vm2368_vm5 = vcmp.eq.s32.totalorder %v5864_v30, %v2252_v16  ;;  %2287 = vperm.xlu1 %4828, %v6932_v42  }
 0x2b4   : > { %v4299_v2 = vsel %vm2368_vm5, 1.0, %v8054_v31 }
 0x2b5   : > { %v2541_v34 = vpack.c.bf16 %v4299_v2, %v4298_v54  ;;  %v783_v54 = vadd.bf16 0, %v751_v56 }
 0x2b6   : > { %v2255_v18 = vpop.permute.xlu1 %2254 }
 0x2b7   : > { %vm2369_vm7 = vcmp.eq.s32.totalorder %v5864_v30, %v2255_v18  ;;  %2290 = vperm.xlu1 %4828, %v6920_v37   ;;  %v2573_v42 = vadd.bf16 %v2541_v34, %v2125_v51  ;;  %v4898_v37 = vld [vmem:[%s5074_s17 + $0x1b8] sm:$0xff]  ;;  %v1231_v51 = vadd.bf16 %v1199_v33, %v783_v54  ;;  %v784_v18 = vadd.bf16 0, %v752_v43  ;;  %v8214_v33 = vld [vmem:[#allocation13_spill] sm:$0xff] }
 0x2b8   : > { %v4300_v57 = vsel %vm2369_vm7, 1.0, %v8054_v31  ;;  %vm2371_vm7 = vcmp.eq.s32.totalorder %v5864_v30, %v2261_v45  ;;  %v8213_v43 = vld [vmem:[#allocation112_spill] sm:$0xff] }
 0x2b9   : > { %v2542_v63 = vpack.c.bf16 %v4301_v5, %v4300_v57  ;;  %4531 = vmatprep.mubr.bf16.mxu1 %v2573_v42  ;;  %v4302_v42 = vsel %vm2371_vm7, 1.0, %v8054_v31  ;;  %vm1032_vm15 = vcmp.eq.s32.totalorder %v5864_v30, %v8213_v43 }
 0x2ba   : > { %v4115_v6 = vsel %vm1032_vm15, 1.0, %v8054_v31 }
 0x2bb   : > { %4829 = vset.pattern.permute.xlu1 %v8139_v4  ;;  %v923_v3 = vpop.permute.xlu1 %922  ;;  %v2574_v0 = vadd.bf16 %v2542_v63, %v2126_v28 }
 0x2bc   : > { %952 = vperm.xlu1 %4829, %v4896_v20   ;;  %vm1029_vm0 = vcmp.eq.s32.totalorder %v5864_v30, %v923_v3 }
 0x2bd   : > { %4532 = vmatmul.mubr.bf16.gmra.mrb[4].mxu1 %v2574_v0  ;;  %v4112_v35 = vsel %vm1029_vm0, 1.0, %v8054_v31 }
 0x2be   : > { %v1200_v52 = vpack.c.bf16 %v4113_v46, %v4112_v35 }
 0x2c0   : > { %958 = vperm.xlu1 %4829, %v7001_v1   ;;  %v1365_v44 = vpop.permute.xlu1 %1364  ;;  %v1232_v0 = vadd.bf16 %v1200_v52, %v784_v18  ;;  %v8215_v52 = vld [vmem:[#allocation52_spill] sm:$0xff] }
 0x2c1   : > { %vm1475_vm1 = vcmp.eq.s32.totalorder %v5864_v30, %v1365_v44  ;;  %vm586_vm4 = vcmp.eq.s32.totalorder %v5864_v30, %v8215_v52 }
 0x2c2   : > { %v4174_v19 = vsel %vm1475_vm1, 1.0, %v8054_v31  ;;  %vm1479_vm1 = vcmp.eq.s32.totalorder %v5864_v30, %v8214_v33 }
 0x2c4   : > { %961 = vperm.xlu1 %4829, %v4898_v37   ;;  %v1368_v24 = vpop.permute.xlu1 %1367 }
 0x2c5   : > { %vm1476_vm14 = vcmp.eq.s32.totalorder %v5864_v30, %v1368_v24 }
 0x2c6   : > { %v4175_v29 = vsel %vm1476_vm14, 1.0, %v8054_v31 }
 0x2c7   : > { %v1647_v49 = vpack.c.bf16 %v4175_v29, %v4174_v19  ;;  %v4178_v19 = vsel %vm1479_vm1, 1.0, %v8054_v31 }
 0x2c8   : > { %4830 = vset.pattern.permute.xlu1 %v7958_v59  ;;  %v1374_v41 = vpop.permute.xlu1 %1373 }
 0x2c9   : > { %1403 = vperm.xlu1 %4830, %v7007_v61   ;;  %vm1478_vm5 = vcmp.eq.s32.totalorder %v5864_v30, %v1374_v41  ;;  %v1679_v57 = vadd.bf16 %v1647_v49, %v1231_v51  ;;  %v4305_v41 = vsel %vm2374_vm10, 1.0, %v8054_v31 }
 0x2ca   : > { %v4177_v2 = vsel %vm1478_vm5, 1.0, %v8054_v31 }
 0x2cb   : > { %v1648_v28 = vpack.c.bf16 %v4177_v2, %v4176_v11 }
 0x2cd   : > { %1406 = vperm.xlu1 %4830, %v7001_v1   ;;  %v1813_v10 = vpop.permute.xlu1 %1812  ;;  %v1680_v7 = vadd.bf16 %v1648_v28, %v1232_v0 }
 0x2ce   : > { %vm1923_vm2 = vcmp.eq.s32.totalorder %v5864_v30, %v1813_v10 }
 0x2cf   : > { %v4238_v16 = vsel %vm1923_vm2, 1.0, %v8054_v31  ;;  %vm1928_vm2 = vcmp.eq.s32.totalorder %v5864_v30, %v6892_v25  ;;  %v8216_v25 = vld [vmem:[#allocation53_spill] sm:$0xff] }
 0x2d0   : > { %v2095_v34 = vpack.c.bf16 %v4239_v62, %v4238_v16  ;;  %v7089_v62 = vld [vmem:[%s5074_s17 + $0x1c8] sm:$0xff]  ;;  %v4243_v49 = vsel %vm1928_vm2, 1.0, %v8054_v31  ;;  %vm585_vm5 = vcmp.eq.s32.totalorder %v5864_v30, %v8216_v25 }
 0x2d1   : > { %4831 = vset.pattern.permute.xlu1 %v7962_v40  ;;  %v1819_v23 = vpop.permute.xlu1 %1818 }
 0x2d2   : > { %1848 = vperm.xlu1 %4831, %v4896_v20   ;;  %vm1925_vm9 = vcmp.eq.s32.totalorder %v5864_v30, %v1819_v23  ;;  %v2127_v20 = vadd.bf16 %v2095_v34, %v1679_v57  ;;  %v8212_v23 = vld [vmem:[#allocation51_spill] sm:$0xff] }
 0x2d3   : > { %v4240_v63 = vsel %vm1925_vm9, 1.0, %v8054_v31  ;;  %vm583_vm13 = vcmp.eq.s32.totalorder %v5864_v30, %v8212_v23 }
 0x2d4   : > { %v4050_v45 = vsel %vm583_vm13, 1.0, %v8054_v31 }
 0x2d5   : > { %v1822_v55 = vpop.permute.xlu1 %1821 }
 0x2d6   : > { %1854 = vperm.xlu1 %4831, %v7001_v1   ;;  %vm1926_vm6 = vcmp.eq.s32.totalorder %v5864_v30, %v1822_v55 }
 0x2d7   : > { %v4241_v5 = vsel %vm1926_vm6, 1.0, %v8054_v31 }
 0x2d8   : > { %v2096_v44 = vpack.c.bf16 %v4241_v5, %v4240_v63  ;;  %v2273_v5 = vpop.permute.xlu0 %2272 }
 0x2da   : > { %1857 = vperm.xlu1 %4831, %v4898_v37   ;;  %v2264_v53 = vpop.permute.xlu1 %2263  ;;  %v2128_v48 = vadd.bf16 %v2096_v44, %v1680_v7 }
 0x2db   : > { %vm2372_vm8 = vcmp.eq.s32.totalorder %v5864_v30, %v2264_v53  ;;  %v4053_v53 = vsel %vm586_vm4, 1.0, %v8054_v31 }
 0x2dc   : > { %v4303_v3 = vsel %vm2372_vm8, 1.0, %v8054_v31  ;;  %v2282_v44 = vpop.permute.xlu0 %2281 }
 0x2dd   : > { %v2543_v24 = vpack.c.bf16 %v4303_v3, %v4302_v42  ;;  %v4052_v42 = vsel %vm585_vm5, 1.0, %v8054_v31  ;;  %v8217_v3 = vld [vmem:[#allocation16_spill] sm:$0xff] }
 0x2de   : > { %4832 = vset.pattern.permute.xlu1 %v7950_v36  ;;  %v2267_v37 = vpop.permute.xlu1 %2266  ;;  %v754_v63 = vpack.c.bf16 %v4053_v53, %v4052_v42  ;;  %vm1482_vm8 = vcmp.eq.s32.totalorder %v5864_v30, %v8217_v3 }
 0x2df   : > { %vm2373_vm11 = vcmp.eq.s32.totalorder %v5864_v30, %v2267_v37  ;;  %2299 = vperm.xlu1 %4832, %v7007_v61   ;;  %v2575_v15 = vadd.bf16 %v2543_v24, %v2127_v20  ;;  %v8211_v61 = vld [vmem:[#allocation50_spill] sm:$0xff]  ;;  %v7121_v37 = vld [vmem:[%s7824_s2] ss:$0 sm:$0xff] }
 0x2e0   : > { %v4304_v10 = vsel %vm2373_vm11, 1.0, %v8054_v31  ;;  %vm584_vm12 = vcmp.eq.s32.totalorder %v5864_v30, %v8211_v61  ;;  %vm2375_vm11 = vcmp.eq.s32.totalorder %v5864_v30, %v2273_v5 }
 0x2e1   : > { %v2544_v17 = vpack.c.bf16 %v4305_v41, %v4304_v10  ;;  %4535 = vmatprep.mubr.bf16.mxu1 %v2575_v15  ;;  %v4051_v27 = vsel %vm584_vm12, 1.0, %v8054_v31  ;;  %v4181_v41 = vsel %vm1482_vm8, 1.0, %v8054_v31  ;;  %v4306_v10 = vsel %vm2375_vm11, 1.0, %v8054_v31 }
 0x2e2   : > { %v753_v29 = vpack.c.bf16 %v4051_v27, %v4050_v45 }
 0x2e3   : > { %2302 = vperm.xlu1 %4832, %v7001_v1   ;;  %v929_v50 = vpop.permute.xlu1 %928  ;;  %v2576_v14 = vadd.bf16 %v2544_v17, %v2128_v48  ;;  %v4902_v1 = vld [vmem:[%s5074_s17 + $0x1d8] sm:$0xff]  ;;  %v786_v48 = vadd.bf16 0, %v754_v63 }
 0x2e4   : > { %vm1031_vm14 = vcmp.eq.s32.totalorder %v5864_v30, %v929_v50  ;;  %v785_v16 = vadd.bf16 0, %v753_v29 }
 0x2e5   : > { %4536 = vmatmul.mubr.bf16.gmra.mrb[8].mxu1 %v2576_v14  ;;  %v4114_v12 = vsel %vm1031_vm14, 1.0, %v8054_v31  ;;  %vm2378_vm14 = vcmp.eq.s32.totalorder %v5864_v30, %v2282_v44 }
 0x2e6   : > { %v1201_v35 = vpack.c.bf16 %v4115_v6, %v4114_v12  ;;  %v4309_v29 = vsel %vm2378_vm14, 1.0, %v8054_v31 }
 0x2e7   : > { %4833 = vset.pattern.permute.xlu1 %v8139_v4  ;;  %v935_v58 = vpop.permute.xlu1 %934 }
 0x2e8   : > { %964 = vperm.xlu1 %4833, %v4900_v21   ;;  %v1233_v11 = vadd.bf16 %v1201_v35, %v785_v16  ;;  %vm1033_vm7 = vcmp.eq.s32.totalorder %v5864_v30, %v935_v58 }
 0x2e9   : > { %v4116_v0 = vsel %vm1033_vm7, 1.0, %v8054_v31 }
 0x2eb   : > { %v938_v8 = vpop.permute.xlu1 %937 }
 0x2ec   : > { %970 = vperm.xlu1 %4833, %v7068_v32   ;;  %vm1034_vm6 = vcmp.eq.s32.totalorder %v5864_v30, %v938_v8 }
 0x2ed   : > { %v4117_v28 = vsel %vm1034_vm6, 1.0, %v8054_v31  ;;  %vm1932_vm6 = vcmp.eq.s32.totalorder %v5864_v30, %v6911_v47 }
 0x2ee   : > { %v1202_v24 = vpack.c.bf16 %v4117_v28, %v4116_v0 }
 0x2f0   : > { %973 = vperm.xlu1 %4833, %v4902_v1   ;;  %v1380_v56 = vpop.permute.xlu1 %1379  ;;  %v1234_v61 = vadd.bf16 %v1202_v24, %v786_v48  ;;  %v8219_v48 = vld [vmem:[#allocation55_spill] sm:$0xff] }
 0x2f1   : > { %vm1480_vm0 = vcmp.eq.s32.totalorder %v5864_v30, %v1380_v56  ;;  %vm587_vm1 = vcmp.eq.s32.totalorder %v5864_v30, %v8219_v48 }
 0x2f2   : > { %v4179_v55 = vsel %vm1480_vm0, 1.0, %v8054_v31 }
 0x2f3   : > { %v1649_v54 = vpack.c.bf16 %v4179_v55, %v4178_v19 }
 0x2f4   : > { %4834 = vset.pattern.permute.xlu1 %v7958_v59  ;;  %v1383_v39 = vpop.permute.xlu1 %1382 }
 0x2f5   : > { %1415 = vperm.xlu1 %4834, %v7089_v62   ;;  %v1681_v38 = vadd.bf16 %v1649_v54, %v1233_v11  ;;  %vm1481_vm9 = vcmp.eq.s32.totalorder %v5864_v30, %v1383_v39 }
 0x2f6   : > { %v4180_v20 = vsel %vm1481_vm9, 1.0, %v8054_v31 }
 0x2f7   : > { %v1650_v17 = vpack.c.bf16 %v4181_v41, %v4180_v20  ;;  %v7162_v41 = vld [vmem:[%s5074_s17 + $0x1f0] sm:$0xff] }
 0x2f9   : > { %1418 = vperm.xlu1 %4834, %v7068_v32   ;;  %v1825_v46 = vpop.permute.xlu1 %1824  ;;  %v1682_v33 = vadd.bf16 %v1650_v17, %v1234_v61 }
 0x2fa   : > { %vm1927_vm3 = vcmp.eq.s32.totalorder %v5864_v30, %v1825_v46 }
 0x2fb   : > { %v4242_v2 = vsel %vm1927_vm3, 1.0, %v8054_v31 }
 0x2fc   : > { %v2097_v51 = vpack.c.bf16 %v4243_v49, %v4242_v2 }
 0x2fd   : > { %4835 = vset.pattern.permute.xlu1 %v7962_v40  ;;  %v1831_v34 = vpop.permute.xlu1 %1830 }
 0x2fe   : > { %v2129_v18 = vadd.bf16 %v2097_v51, %v1681_v38  ;;  %1860 = vperm.xlu1 %4835, %v4900_v21   ;;  %vm1929_vm12 = vcmp.eq.s32.totalorder %v5864_v30, %v1831_v34 }
 0x2ff   : > { %v4244_v14 = vsel %vm1929_vm12, 1.0, %v8054_v31 }
 0x301   : > { %v1834_v57 = vpop.permute.xlu1 %1833 }
 0x302   : > { %1866 = vperm.xlu1 %4835, %v7068_v32   ;;  %vm1930_vm10 = vcmp.eq.s32.totalorder %v5864_v30, %v1834_v57  ;;  %v7152_v57 = vld [vmem:[%s5074_s17 + $0x1e0] sm:$0xff] }
 0x303   : > { %v4245_v7 = vsel %vm1930_vm10, 1.0, %v8054_v31 }
 0x304   : > { %v2098_v23 = vpack.c.bf16 %v4245_v7, %v4244_v14 }
 0x306   : > { %1869 = vperm.xlu1 %4835, %v4902_v1   ;;  %v2276_v15 = vpop.permute.xlu1 %2275  ;;  %v2130_v16 = vadd.bf16 %v2098_v23, %v1682_v33 }
 0x307   : > { %vm2376_vm13 = vcmp.eq.s32.totalorder %v5864_v30, %v2276_v15  ;;  %v4497_v50 = vpop.f32.mrb[0].mxu0 }
 0x308   : > { %v4307_v58 = vsel %vm2376_vm13, 1.0, %v8054_v31  ;;  %v2701_v21 = vadd.f32 %v4497_v50, %v7121_v37  ;;  %v2692_v8 = vpop.f32.mrb[1].mxu0 }
 0x309   : > { %v2545_v1 = vpack.c.bf16 %v4307_v58, %v4306_v10  ;;  %v2693_v56 = vadd.f32 %v7121_v37, %v2692_v8  ;;  %v4498_v27 = vpop.f32.mrb[2].mxu0  ;;  %v8218_v10 = vld [vmem:[#allocation54_spill] sm:$0xff]  ;;  %v7175_v8 = vld [vmem:[%s5074_s17 + $0x1f8] sm:$0xff] }
 0x30a   : > { %v2704_v45 = vadd.f32 %v4498_v27, %v7121_v37  ;;  %4836 = vset.pattern.permute.xlu1 %v7950_v36  ;;  %v2279_v43 = vpop.permute.xlu1 %2278  ;;  %v2695_v12 = vpop.f32.mrb[3].mxu0  ;;  %v2949_v55 = vmax.f32 %v2701_v21, 0.0  ;;  %vm588_vm0 = vcmp.eq.s32.totalorder %v5864_v30, %v8218_v10 }
 0x30b   : > { %vm2377_vm15 = vcmp.eq.s32.totalorder %v5864_v30, %v2279_v43  ;;  %v2696_v39 = vadd.f32 %v7121_v37, %v2695_v12  ;;  %2311 = vperm.xlu1 %4836, %v7089_v62   ;;  %v2577_v6 = vadd.bf16 %v2545_v1, %v2129_v18  ;;  %v2947_v54 = vmax.f32 %v2693_v56, 0.0 }
 0x30c   : > { %v2950_v35 = vmax.f32 %v2704_v45, 0.0  ;;  %v4308_v19 = vsel %vm2377_vm15, 1.0, %v8054_v31  ;;  %v4055_v23 = vsel %vm588_vm0, 1.0, %v8054_v31  ;;  %v4054_v1 = vsel %vm587_vm1, 1.0, %v8054_v31  ;;  %v8220_v45 = vld [vmem:[#allocation113_spill] sm:$0xff] }
 0x30d   : > { %v2948_v49 = vmax.f32 %v2696_v39, 0.0  ;;  %v2546_v46 = vpack.c.bf16 %v4309_v29, %v4308_v19  ;;  %4539 = vmatprep.mubr.bf16.mxu1 %v2577_v6  ;;  %vm1036_vm3 = vcmp.eq.s32.totalorder %v5864_v30, %v8220_v45  ;;  %v755_v39 = vpack.c.bf16 %v4055_v23, %v4054_v1  ;;  %v8221_v6 = vld [vmem:[#allocation19_spill] sm:$0xff] }
 0x30e   : > { %v7139_v11 = vpack.c.bf16 %v2950_v35, %v2949_v55  ;;  %vm1483_vm5 = vcmp.eq.s32.totalorder %v5864_v30, %v8221_v6 }
 0x30f   : > { %v7141_v2 = vpack.c.bf16 %v2948_v49, %v2947_v54  ;;  %2314 = vperm.xlu1 %4836, %v7068_v32   ;;  %v941_v38 = vpop.permute.xlu1 %940  ;;  %v2578_v51 = vadd.bf16 %v2546_v46, %v2130_v16  ;;  %v4501_v62 = vpop.f32.mrb[4].mxu0  ;;  %v4119_v16 = vsel %vm1036_vm3, 1.0, %v8054_v31 }
 0x310   : > { %v2717_v52 = vadd.f32 %v4501_v62, %v7121_v37  ;;  %v2708_v25 = vpop.f32.mrb[5].mxu0  ;;  %vm1035_vm2 = vcmp.eq.s32.totalorder %v5864_v30, %v941_v38  ;;  %v7197_v38 = vld [vmem:[%s5074_s17 + $0x1e8] sm:$0xff]  ;;  %s3937_s17 = sshll.u32 %s7642_s21, 4  ;;  %s7773_s17 = int_to_ptr.vmem [resolvable:$true] %s3937_s17 }
 0x311   : > { %4540 = vmatmul.mubr.bf16.gmra.mrb[12].mxu1 %v2578_v51  ;;  %v2709_v34 = vadd.f32 %v7121_v37, %v2708_v25  ;;  %v4502_v18 = vpop.f32.mrb[6].mxu0  ;;  %v4118_v29 = vsel %vm1035_vm2, 1.0, %v8054_v31  ;;  %s4909_s9 = scalar_lea.vmem %s7773_s17, 8192  ;;  %p4916_p0 = scmp.lt.s32.totalorder %s7773_s17, %s4914_s14 }
 0x312   : > { %v2720_v5 = vadd.f32 %v4502_v18, %v7121_v37  ;;  %v2711_v53 = vpop.f32.mrb[7].mxu0  ;;  %v2953_v28 = vmax.f32 %v2717_v52, 0.0  ;;  %v1203_v51 = vpack.c.bf16 %v4119_v16, %v4118_v29  ;;  %v4182_v52 = vsel %vm1483_vm5, 1.0, %v8054_v31  ;;  %v2285_v29 = vpop.permute.xlu0 %2284  ;;  %p4910_p11 = scmp.ne.s32.totalorder %s7773_s17, %s4909_s9  ;;  %p4917_p1 = scmp.lt.s32.totalorder %s4915_s15, %s4909_s9 }
 0x313   : > { %4837 = vset.pattern.permute.xlu1 %v8139_v4  ;;  %v7148_v42 = vpop.permute.xlu1 %946  ;;  %v2712_v32 = vadd.f32 %v7121_v37, %v2711_v53  ;;  %v2951_v3 = vmax.f32 %v2709_v34, 0.0  ;;  %v787_v18 = vadd.bf16 0, %v755_v39  ;;  %vm2379_vm14 = vcmp.eq.s32.totalorder %v5864_v30, %v2285_v29 }
 0x314   : > { %976 = vperm.xlu1 %4837, %v7152_v57   ;;  %v2954_v63 = vmax.f32 %v2720_v5, 0.0  ;;  %vm1037_vm11 = vcmp.eq.s32.totalorder %v5864_v30, %v7148_v42  ;;  %p4911_p12 = pnand %p4910_p11, %p5060_p5  ;;  %p4918_p2 = por %p4917_p1, %p4916_p0 }
 0x315   : > { %v2952_v0 = vmax.f32 %v2712_v32, 0.0  ;;  %v8222_v32 = vld [vmem:[#allocation56_spill] sm:$0xff] }
 0x316   : > { %v7155_v20 = vpack.c.bf16 %v2954_v63, %v2953_v28  ;;  %vm590_vm7 = vcmp.eq.s32.totalorder %v5864_v30, %v8222_v32  ;;  %v4247_v28 = vsel %vm1932_vm6, 1.0, %v8054_v31  ;;  %p4912_p13 = pneg %p4911_p12 }
 0x317   : > { %v7157_v44 = vpop.permute.xlu1 %949  ;;  %v7159_v24 = vpack.c.bf16 %v2952_v0, %v2951_v3  ;;  %v4505_v4 = vpop.f32.mrb[8].mxu0  ;;  %v1235_v0 = vadd.bf16 %v1203_v51, %v787_v18 }
 0x318   : > { %982 = vperm.xlu1 %4837, %v7162_v41   ;;  %v2733_v7 = vadd.f32 %v4505_v4, %v7121_v37  ;;  %v2724_v15 = vpop.f32.mrb[9].mxu0  ;;  %vm1038_vm10 = vcmp.eq.s32.totalorder %v5864_v30, %v7157_v44  ;;  %v4853_v44 = vld [vmem:[%s7825_s3 + $0x8] sm:$0xff]   ;;  %v2294_v18 = vpop.permute.xlu0 %2293  ;;  %p4919_p3 = pnand %p4918_p2, %p4912_p13 }
 0x319   : > { %v2725_v17 = vadd.f32 %v7121_v37, %v2724_v15  ;;  %v4506_v50 = vpop.f32.mrb[10].mxu0  ;;  %v8223_v15 = vld [vmem:[#allocation57_spill] sm:$0xff]  ;;  %vm2382_vm2 = vcmp.eq.s32.totalorder %v5864_v30, %v2294_v18  ;;  %v4857_v18 = vld [vmem:[%s7825_s3 + $0x28] sm:$0xff]  }
 0x31a   : > { %v2736_v14 = vadd.f32 %v4506_v50, %v7121_v37  ;;  %v2727_v58 = vpop.f32.mrb[11].mxu0  ;;  %v2957_v56 = vmax.f32 %v2733_v7, 0.0  ;;  %vm589_vm8 = vcmp.eq.s32.totalorder %v5864_v30, %v8223_v15  ;;  %v4310_v15 = vsel %vm2379_vm14, 1.0, %v8054_v31 }
 0x31b   : > { %v2728_v21 = vadd.f32 %v7121_v37, %v2727_v58  ;;  %v2955_v43 = vmax.f32 %v2725_v17, 0.0 }
 0x31c   : > { %985 = vperm.xlu1 %4837, %v7175_v8   ;;  %v1392_v61 = vpop.permute.xlu1 %1391  ;;  %v2958_v27 = vmax.f32 %v2736_v14, 0.0 }
 0x31d   : > { %v2956_v12 = vmax.f32 %v2728_v21, 0.0  ;;  %vm1484_vm4 = vcmp.eq.s32.totalorder %v5864_v30, %v1392_v61  ;;  %v4852_v21 = vld [vmem:[%s7825_s3] sm:$0xff]   ;;  %v4057_v61 = vsel %vm590_vm7, 1.0, %v8054_v31 }
 0x31e   : > { %v7184_v33 = vpack.c.bf16 %v2958_v27, %v2957_v56  ;;  %v4183_v54 = vsel %vm1484_vm4, 1.0, %v8054_v31  ;;  %v4056_v27 = vsel %vm589_vm8, 1.0, %v8054_v31  ;;  %4559 = vmatprep.subr.bf16.mxu1 %v4852_v21 }
 0x31f   : > { %v7188_v55 = vpack.c.bf16 %v2956_v12, %v2955_v43  ;;  %v4509_v35 = vpop.f32.mrb[12].mxu0  ;;  %v1651_v5 = vpack.c.bf16 %v4183_v54, %v4182_v52  ;;  %4560 = vmatpush3.bf16.msra.mxu1 %v4852_v21 }
 0x320   : > { %4839 = vset.pattern.permute.xlu1 %v7958_v59  ;;  %v7191_v19 = vpop.permute.xlu1 %1394  ;;  %v2749_v49 = vadd.f32 %v4509_v35, %v7121_v37  ;;  %v2740_v46 = vpop.f32.mrb[13].mxu0  ;;  %v756_v35 = vpack.c.bf16 %v4057_v61, %v4056_v27  ;;  %4561 = vmatprep.subr.bf16.mxu1 %v4853_v44  ;;  %v4855_v61 = vld [vmem:[%s7825_s3 + $0x18] sm:$0xff]  }
 0x321   : > { %1427 = vperm.xlu1 %4839, %v7197_v38   ;;  %v2741_v62 = vadd.f32 %v7121_v37, %v2740_v46  ;;  %v4510_v59 = vpop.f32.mrb[14].mxu0  ;;  %v1683_v17 = vadd.bf16 %v1651_v5, %v1235_v0  ;;  %vm1485_vm12 = vcmp.eq.s32.totalorder %v5864_v30, %v7191_v19  ;;  %v8224_v46 = vld [vmem:[#allocation24_spill] sm:$0xff]  ;;  %v4120_v19 = vsel %vm1037_vm11, 1.0, %v8054_v31  ;;  %v4854_v5 = vld [vmem:[%s7825_s3 + $0x10] sm:$0xff]  }
 0x322   : > { %v2752_v25 = vadd.f32 %v4510_v59, %v7121_v37  ;;  %v2743_v34 = vpop.f32.mrb[15].mxu0  ;;  %v2961_v63 = vmax.f32 %v2749_v49, 0.0  ;;  %vm1486_vm13 = vcmp.eq.s32.totalorder %v5864_v30, %v8224_v46 }
 0x323   : > { %v2744_v53 = vadd.f32 %v7121_v37, %v2743_v34  ;;  %v2959_v4 = vmax.f32 %v2741_v62, 0.0  ;;  %v4184_v62 = vsel %vm1485_vm12, 1.0, %v8054_v31  ;;  %4562 = vmatpush3.bf16.msra.mxu1 %v4853_v44  ;;  %v4185_v32 = vsel %vm1486_vm13, 1.0, %v8054_v31 }
 0x324   : > { %v2962_v47 = vmax.f32 %v2752_v25, 0.0  ;;  %4563 = vmatprep.subr.bf16.mxu1 %v4854_v5 }
 0x325   : > { %1430 = vperm.xlu1 %4839, %v7162_v41   ;;  %v1837_v3 = vpop.permute.xlu1 %1836  ;;  %v2960_v7 = vmax.f32 %v2744_v53, 0.0  ;;  %v788_v53 = vadd.bf16 0, %v756_v35 }
 0x326   : > { %vm1931_vm9 = vcmp.eq.s32.totalorder %v5864_v30, %v1837_v3  ;;  %v7213_v10 = vpack.c.bf16 %v2962_v47, %v2961_v63  ;;  %v1652_v47 = vpack.c.bf16 %v4185_v32, %v4184_v62 }
 0x327   : > { %v4246_v48 = vsel %vm1931_vm9, 1.0, %v8054_v31  ;;  %v7216_v50 = vpack.c.bf16 %v2960_v7, %v2959_v4  ;;  %v4513_v58 = vpop.f32.mrb[16].mxu0  ;;  %4564 = vmatpush3.bf16.msra.mxu1 %v4854_v5 }
 0x328   : > { %v2099_v14 = vpack.c.bf16 %v4247_v28, %v4246_v48  ;;  %v2765_v23 = vadd.f32 %v4513_v58, %v7121_v37  ;;  %v2756_v1 = vpop.f32.mrb[17].mxu0  ;;  %4565 = vmatprep.subr.bf16.mxu1 %v4855_v61 }
 0x329   : > { %4841 = vset.pattern.permute.xlu1 %v7962_v40  ;;  %v1843_v56 = vpop.permute.xlu1 %1842  ;;  %v2757_v43 = vadd.f32 %v7121_v37, %v2756_v1  ;;  %v4514_v12 = vpop.f32.mrb[18].mxu0 }
 0x32a   : > { %v7230_v45 = vadd.bf16 %v2099_v14, %v1683_v17  ;;  %1872 = vperm.xlu1 %4841, %v7152_v57   ;;  %v2768_v39 = vadd.f32 %v4514_v12, %v7121_v37  ;;  %v2759_v6 = vpop.f32.mrb[19].mxu0  ;;  %v4121_v57 = vsel %vm1038_vm10, 1.0, %v8054_v31  ;;  %v2965_v16 = vmax.f32 %v2765_v23, 0.0 }
 0x32b   : > { %v2760_v40 = vadd.f32 %v7121_v37, %v2759_v6  ;;  %v2963_v51 = vmax.f32 %v2757_v43, 0.0  ;;  %v1204_v52 = vpack.c.bf16 %v4121_v57, %v4120_v19  ;;  %vm1933_vm0 = vcmp.eq.s32.totalorder %v5864_v30, %v1843_v56  ;;  %4566 = vmatpush3.bf16.msra.mxu1 %v4855_v61  ;;  %v8228_v61 = vld [vmem:[#allocation27_spill] sm:$0xff] }
 0x32c   : > { %v2966_v54 = vmax.f32 %v2768_v39, 0.0  ;;  %v4248_v58 = vsel %vm1933_vm0, 1.0, %v8054_v31  ;;  %v4313_v56 = vsel %vm2382_vm2, 1.0, %v8054_v31  ;;  %vm1487_vm8 = vcmp.eq.s32.totalorder %v5864_v30, %v8228_v61 }
 0x32d   : > { %v1846_v49 = vpop.permute.xlu1 %1845  ;;  %v2964_v42 = vmax.f32 %v2760_v40, 0.0  ;;  %v1236_v14 = vadd.bf16 %v1204_v52, %v788_v53  ;;  %vm1936_vm10 = vcmp.eq.s32.totalorder %v5864_v30, %v6926_v9 }
 0x32e   : > { %1878 = vperm.xlu1 %4841, %v7162_v41   ;;  %v7250_v59 = vpack.c.bf16 %v2966_v54, %v2965_v16  ;;  %vm1934_vm15 = vcmp.eq.s32.totalorder %v5864_v30, %v1846_v49  ;;  %v4856_v16 = vld [vmem:[%s7825_s3 + $0x20] sm:$0xff]  }
 0x32f   : > { %v7253_v25 = vpack.c.bf16 %v2964_v42, %v2963_v51  ;;  %v4517_v34 = vpop.f32.mrb[20].mxu0  ;;  %v4249_v3 = vsel %vm1934_vm15, 1.0, %v8054_v31  ;;  %v1684_v12 = vadd.bf16 %v1652_v47, %v1236_v14  ;;  %4567 = vmatprep.subr.bf16.mxu1 %v4856_v16 }
 0x330   : > { %v2781_v28 = vadd.f32 %v4517_v34, %v7121_v37  ;;  %v2772_v63 = vpop.f32.mrb[21].mxu0  ;;  %v2100_v23 = vpack.c.bf16 %v4249_v3, %v4248_v58  ;;  %4568 = vmatpush3.bf16.msra.mxu1 %v4856_v16  ;;  %v4858_v3 = vld [vmem:[%s7825_s3 + $0x30] sm:$0xff]  }
 0x331   : > { %v2773_v0 = vadd.f32 %v7121_v37, %v2772_v63  ;;  %v4518_v4 = vpop.f32.mrb[22].mxu0  ;;  %4569 = vmatprep.subr.bf16.mxu1 %v4857_v18  ;;  %v8227_v58 = vld [vmem:[#allocation115_spill] sm:$0xff] }
 0x332   : > { %1881 = vperm.xlu1 %4841, %v7175_v8   ;;  %v2288_v7 = vpop.permute.xlu1 %2287  ;;  %v2784_v48 = vadd.f32 %v4518_v4, %v7121_v37  ;;  %v2775_v17 = vpop.f32.mrb[23].mxu0  ;;  %v2969_v1 = vmax.f32 %v2781_v28, 0.0  ;;  %v2132_v54 = vadd.bf16 %v2100_v23, %v1684_v12  ;;  %vm1040_vm7 = vcmp.eq.s32.totalorder %v5864_v30, %v8227_v58  ;;  %v8231_v58 = vld [vmem:[#allocation32_spill] sm:$0xff] }
 0x333   : > { %vm2380_vm1 = vcmp.eq.s32.totalorder %v5864_v30, %v2288_v7  ;;  %v2776_v21 = vadd.f32 %v7121_v37, %v2775_v17  ;;  %v2967_v29 = vmax.f32 %v2773_v0, 0.0  ;;  %v4859_v0 = vld [vmem:[%s7825_s3 + $0x38] sm:$0xff]   ;;  %v8225_v7 = vld [vmem:[#allocation58_spill] sm:$0xff] }
 0x334   : > { %v4311_v8 = vsel %vm2380_vm1, 1.0, %v8054_v31  ;;  %v2970_v27 = vmax.f32 %v2784_v48, 0.0  ;;  %4570 = vmatpush3.bf16.msra.mxu1 %v4857_v18  ;;  %vm592_vm4 = vcmp.eq.s32.totalorder %v5864_v30, %v8225_v7  ;;  %v8229_v18 = vld [vmem:[#allocation60_spill] sm:$0xff]  ;;  %vm1490_vm1 = vcmp.eq.s32.totalorder %v5864_v30, %v8231_v58 }
 0x335   : > { %v2547_v43 = vpack.c.bf16 %v4311_v8, %v4310_v15  ;;  %v2968_v39 = vmax.f32 %v2776_v21, 0.0  ;;  %4571 = vmatprep.subr.bf16.mxu1 %v4858_v3  ;;  %v8226_v15 = vld [vmem:[#allocation59_spill] sm:$0xff]  ;;  %v4059_v17 = vsel %vm592_vm4, 1.0, %v8054_v31  ;;  %vm594_vm12 = vcmp.eq.s32.totalorder %v5864_v30, %v8229_v18 }
 0x336   : > { %4843 = vset.pattern.permute.xlu1 %v7950_v36  ;;  %v2291_v6 = vpop.permute.xlu1 %2290  ;;  %v7285_v40 = vpack.c.bf16 %v2970_v27, %v2969_v1  ;;  %vm591_vm5 = vcmp.eq.s32.totalorder %v5864_v30, %v8226_v15  ;;  %v4123_v1 = vsel %vm1040_vm7, 1.0, %v8054_v31  ;;  %v4061_v7 = vsel %vm594_vm12, 1.0, %v8054_v31 }
 0x337   : > { %vm2381_vm3 = vcmp.eq.s32.totalorder %v5864_v30, %v2291_v6  ;;  %2323 = vperm.xlu1 %4843, %v7197_v38   ;;  %v2579_v44 = vadd.bf16 %v2547_v43, %v7230_v45  ;;  %v7290_v35 = vpack.c.bf16 %v2968_v39, %v2967_v29  ;;  %v4521_v36 = vpop.f32.mrb[24].mxu0  ;;  %v4058_v14 = vsel %vm591_vm5, 1.0, %v8054_v31 }
 0x338   : > { %v4312_v57 = vsel %vm2381_vm3, 1.0, %v8054_v31  ;;  %v2797_v46 = vadd.f32 %v4521_v36, %v7121_v37  ;;  %v2788_v51 = vpop.f32.mrb[25].mxu0  ;;  %4572 = vmatpush3.bf16.msra.mxu1 %v4858_v3  ;;  %v757_v21 = vpack.c.bf16 %v4059_v17, %v4058_v14  ;;  %v4186_v29 = vsel %vm1487_vm8, 1.0, %v8054_v31 }
 0x339   : > { %v2548_v49 = vpack.c.bf16 %v4313_v56, %v4312_v57  ;;  %4543 = vmatprep.mubr.bf16.mxu1 %v2579_v44  ;;  %v2789_v38 = vadd.f32 %v7121_v37, %v2788_v51  ;;  %v4522_v42 = vpop.f32.mrb[26].mxu0  ;;  %4573 = vmatprep.subr.bf16.mxu1 %v4859_v0 }
 0x33a   : > { %v2800_v45 = vadd.f32 %v4522_v42, %v7121_v37  ;;  %v2791_v19 = vpop.f32.mrb[27].mxu0  ;;  %v2973_v5 = vmax.f32 %v2797_v46, 0.0  ;;  %v789_v56 = vadd.bf16 0, %v757_v21 }
 0x33b   : > { %2326 = vperm.xlu1 %4843, %v7162_v41   ;;  %v953_v62 = vpop.permute.xlu1 %952  ;;  %v2580_v52 = vadd.bf16 %v2548_v49, %v2132_v54  ;;  %v2792_v34 = vadd.f32 %v7121_v37, %v2791_v19  ;;  %v2971_v32 = vmax.f32 %v2789_v38, 0.0  ;;  %v4251_v38 = vsel %vm1936_vm10, 1.0, %v8054_v31 }
 0x33c   : > { %v2974_v53 = vmax.f32 %v2800_v45, 0.0  ;;  %4574 = vmatpush3.bf16.msra.mxu1 %v4859_v0  ;;  %vm1039_vm6 = vcmp.eq.s32.totalorder %v5864_v30, %v953_v62  ;;  %v2297_v0 = vpop.permute.xlu0 %2296 }
 0x33d   : > { %4544 = vmatmul.mubr.bf16.gmra.mrb[16].mxu1 %v2580_v52  ;;  %v2972_v28 = vmax.f32 %v2792_v34, 0.0  ;;  %v4122_v8 = vsel %vm1039_vm6, 1.0, %v8054_v31  ;;  %vm2383_vm3 = vcmp.eq.s32.totalorder %v5864_v30, %v2297_v0 }
 0x33e   : > { %v7304_v63 = vpack.c.bf16 %v2974_v53, %v2973_v5  ;;  %v1205_v43 = vpack.c.bf16 %v4123_v1, %v4122_v8  ;;  %v8230_v5 = vld [vmem:[#allocation61_spill] sm:$0xff] }
 0x33f   : > { %v7306_v47 = vpop.permute.xlu1 %958  ;;  %v7308_v41 = vpack.c.bf16 %v2972_v28, %v2971_v32  ;;  %vm593_vm13 = vcmp.eq.s32.totalorder %v5864_v30, %v8230_v5 }
 0x340   : > { %v1237_v46 = vadd.bf16 %v1205_v43, %v789_v56  ;;  %v4060_v15 = vsel %vm593_vm13, 1.0, %v8054_v31  ;;  %vm1041_vm15 = vcmp.eq.s32.totalorder %v5864_v30, %v7306_v47  ;;  %v2306_v21 = vpop.permute.xlu0 %2305  ;;  %v4189_v47 = vsel %vm1490_vm1, 1.0, %v8054_v31 }
 0x341   : > { %v758_v14 = vpack.c.bf16 %v4061_v7, %v4060_v15  ;;  %vm2386_vm6 = vcmp.eq.s32.totalorder %v5864_v30, %v2306_v21 }
 0x343   : > { %v962_v4 = vpop.permute.xlu1 %961  ;;  %v790_v43 = vadd.bf16 0, %v758_v14  ;;  %v8234_v14 = vld [vmem:[#allocation117_spill] sm:$0xff] }
 0x344   : > { %vm1042_vm14 = vcmp.eq.s32.totalorder %v5864_v30, %v962_v4  ;;  %v4124_v4 = vsel %vm1041_vm15, 1.0, %v8054_v31 }
 0x345   : > { %v4125_v17 = vsel %vm1042_vm14, 1.0, %v8054_v31  ;;  %vm1940_vm14 = vcmp.eq.s32.totalorder %v5864_v30, %v6935_v13 }
 0x346   : > { %v1206_v61 = vpack.c.bf16 %v4125_v17, %v4124_v4 }
 0x348   : > { %v1404_v48 = vpop.permute.xlu1 %1403 }
 0x349   : > { %vm1488_vm9 = vcmp.eq.s32.totalorder %v5864_v30, %v1404_v48 }
 0x34a   : > { %v4187_v27 = vsel %vm1488_vm9, 1.0, %v8054_v31 }
 0x34b   : > { %v1653_v44 = vpack.c.bf16 %v4187_v27, %v4186_v29  ;;  %v4314_v27 = vsel %vm2383_vm3, 1.0, %v8054_v31 }
 0x34c   : > { %v1407_v23 = vpop.permute.xlu1 %1406 }
 0x34d   : > { %v1685_v9 = vadd.bf16 %v1653_v44, %v1237_v46  ;;  %vm1489_vm0 = vcmp.eq.s32.totalorder %v5864_v30, %v1407_v23 }
 0x34e   : > { %v4525_v12 = vpop.f32.mrb[28].mxu0  ;;  %v4188_v8 = vsel %vm1489_vm0, 1.0, %v8054_v31 }
 0x34f   : > { %v2813_v39 = vadd.f32 %v4525_v12, %v7121_v37  ;;  %v2804_v6 = vpop.f32.mrb[29].mxu0  ;;  %v1654_v12 = vpack.c.bf16 %v4189_v47, %v4188_v8 }
 0x350   : > { %v2805_v57 = vadd.f32 %v7121_v37, %v2804_v6  ;;  %v4526_v36 = vpop.f32.mrb[30].mxu0  ;;  %v1238_v6 = vadd.bf16 %v1206_v61, %v790_v43 }
 0x351   : > { %v2816_v16 = vadd.f32 %v4526_v36, %v7121_v37  ;;  %v1849_v54 = vpop.permute.xlu1 %1848  ;;  %v2807_v49 = vpop.f32.mrb[31].mxu0  ;;  %v2977_v42 = vmax.f32 %v2813_v39, 0.0  ;;  %v4317_v36 = vsel %vm2386_vm6, 1.0, %v8054_v31 }
 0x352   : > { %vm1935_vm11 = vcmp.eq.s32.totalorder %v5864_v30, %v1849_v54  ;;  %v2808_v51 = vadd.f32 %v7121_v37, %v2807_v49  ;;  %v2975_v62 = vmax.f32 %v2805_v57, 0.0 }
 0x353   : > { %v2978_v45 = vmax.f32 %v2816_v16, 0.0  ;;  %v4250_v19 = vsel %vm1935_vm11, 1.0, %v8054_v31  ;;  %v1686_v16 = vadd.bf16 %v1654_v12, %v1238_v6  ;;  %vm1044_vm11 = vcmp.eq.s32.totalorder %v5864_v30, %v8234_v14 }
 0x354   : > { %v2101_v52 = vpack.c.bf16 %v4251_v38, %v4250_v19  ;;  %v2976_v34 = vmax.f32 %v2808_v51, 0.0  ;;  %v4127_v43 = vsel %vm1044_vm11, 1.0, %v8054_v31 }
 0x355   : > { %v7345_v53 = vpack.c.bf16 %v2978_v45, %v2977_v42  ;;  %v1855_v32 = vpop.permute.xlu1 %1854 }
 0x356   : > { %v2133_v28 = vadd.bf16 %v2101_v52, %v1685_v9  ;;  %v7347_v3 = vpack.c.bf16 %v2976_v34, %v2975_v62  ;;  %vm1937_vm4 = vcmp.eq.s32.totalorder %v5864_v30, %v1855_v32  ;;  %v8232_v62 = vld [vmem:[#allocation62_spill] sm:$0xff]  ;;  %v8233_v52 = vld [vmem:[#allocation63_spill] sm:$0xff] }
 0x357   : > { %v4252_v29 = vsel %vm1937_vm4, 1.0, %v8054_v31  ;;  %vm596_vm9 = vcmp.eq.s32.totalorder %v5864_v30, %v8232_v62  ;;  %vm595_vm8 = vcmp.eq.s32.totalorder %v5864_v30, %v8233_v52 }
 0x358   : > { %v4063_v15 = vsel %vm596_vm9, 1.0, %v8054_v31 }
 0x359   : > { %v1858_v48 = vpop.permute.xlu1 %1857 }
 0x35a   : > { %vm1938_vm2 = vcmp.eq.s32.totalorder %v5864_v30, %v1858_v48  ;;  %v4062_v48 = vsel %vm595_vm8, 1.0, %v8054_v31 }
 0x35b   : > { %v4253_v23 = vsel %vm1938_vm2, 1.0, %v8054_v31  ;;  %v759_v47 = vpack.c.bf16 %v4063_v15, %v4062_v48 }
 0x35c   : > { %v2102_v56 = vpack.c.bf16 %v4253_v23, %v4252_v29  ;;  %v8235_v23 = vld [vmem:[#allocation72_spill] sm:$0xff] }
 0x35d   : > { %vm1491_vm13 = vcmp.eq.s32.totalorder %v5864_v30, %v8235_v23 }
 0x35e   : > { %v2300_v1 = vpop.permute.xlu1 %2299  ;;  %v2134_v46 = vadd.bf16 %v2102_v56, %v1686_v16  ;;  %v4190_v6 = vsel %vm1491_vm13, 1.0, %v8054_v31  ;;  %v791_v56 = vadd.bf16 0, %v759_v47  ;;  %v4255_v16 = vsel %vm1940_vm14, 1.0, %v8054_v31 }
 0x35f   : > { %vm2384_vm5 = vcmp.eq.s32.totalorder %v5864_v30, %v2300_v1 }
 0x360   : > { %v4315_v39 = vsel %vm2384_vm5, 1.0, %v8054_v31 }
 0x361   : > { %v2549_v44 = vpack.c.bf16 %v4315_v39, %v4314_v27 }
 0x362   : > { %v2303_v57 = vpop.permute.xlu1 %2302 }
 0x363   : > { %vm2385_vm7 = vcmp.eq.s32.totalorder %v5864_v30, %v2303_v57  ;;  %v2581_v54 = vadd.bf16 %v2549_v44, %v2133_v28 }
 0x364   : > { %v4316_v49 = vsel %vm2385_vm7, 1.0, %v8054_v31 }
 0x365   : > { %v2550_v51 = vpack.c.bf16 %v4317_v36, %v4316_v49  ;;  %4547 = vmatprep.mubr.bf16.mxu1 %v2581_v54 }
 0x367   : > { %v965_v38 = vpop.permute.xlu1 %964  ;;  %v2582_v42 = vadd.bf16 %v2550_v51, %v2134_v46  ;;  %v8236_v51 = vld [vmem:[#allocation64_spill] sm:$0xff] }
 0x368   : > { %vm1043_vm10 = vcmp.eq.s32.totalorder %v5864_v30, %v965_v38  ;;  %vm598_vm0 = vcmp.eq.s32.totalorder %v5864_v30, %v8236_v51  ;;  %v8237_v38 = vld [vmem:[#allocation65_spill] sm:$0xff] }
 0x369   : > { %4548 = vmatmul.mubr.bf16.gmra.mrb[20].mxu1 %v2582_v42  ;;  %v4126_v8 = vsel %vm1043_vm10, 1.0, %v8054_v31  ;;  %vm597_vm1 = vcmp.eq.s32.totalorder %v5864_v30, %v8237_v38  ;;  %v4065_v13 = vsel %vm598_vm0, 1.0, %v8054_v31 }
 0x36a   : > { %v1207_v39 = vpack.c.bf16 %v4127_v43, %v4126_v8  ;;  %v4064_v62 = vsel %vm597_vm1, 1.0, %v8054_v31  ;;  %vm1495_vm1 = vcmp.eq.s32.totalorder %v5864_v30, %v6320_v26 }
 0x36b   : > { %v971_v45 = vpop.permute.xlu1 %970 }
 0x36c   : > { %v1239_v36 = vadd.bf16 %v1207_v39, %v791_v56  ;;  %vm1045_vm3 = vcmp.eq.s32.totalorder %v5864_v30, %v971_v45 }
 0x36f   : > { %v974_v19 = vpop.permute.xlu1 %973 }
 0x370   : > { %vm1046_vm2 = vcmp.eq.s32.totalorder %v5864_v30, %v974_v19  ;;  %v4128_v19 = vsel %vm1045_vm3, 1.0, %v8054_v31 }
 0x371   : > { %v4529_v9 = vpop.f32.mrb[0].mxu1 }
 0x372   : > { %v2829_v34 = vadd.f32 %v4529_v9, %v7121_v37  ;;  %v2820_v18 = vpop.f32.mrb[1].mxu1 }
 0x373   : > { %v2821_v5 = vadd.f32 %v7121_v37, %v2820_v18  ;;  %v4530_v32 = vpop.f32.mrb[2].mxu1  ;;  %v2309_v18 = vpop.permute.xlu0 %2308 }
 0x374   : > { %v2832_v28 = vadd.f32 %v4530_v32, %v7121_v37  ;;  %v1416_v0 = vpop.permute.xlu1 %1415  ;;  %v2823_v7 = vpop.f32.mrb[3].mxu1  ;;  %v2981_v58 = vmax.f32 %v2829_v34, 0.0  ;;  %v4129_v34 = vsel %vm1046_vm2, 1.0, %v8054_v31  ;;  %v8238_v32 = vld [vmem:[#allocation74_spill] sm:$0xff]  ;;  %vm2387_vm7 = vcmp.eq.s32.totalorder %v5864_v30, %v2309_v18 }
 0x375   : > { %v2824_v17 = vadd.f32 %v7121_v37, %v2823_v7  ;;  %vm1492_vm12 = vcmp.eq.s32.totalorder %v5864_v30, %v1416_v0  ;;  %v2979_v21 = vmax.f32 %v2821_v5, 0.0  ;;  %v760_v5 = vpack.c.bf16 %v4065_v13, %v4064_v62 }
 0x376   : > { %v2982_v4 = vmax.f32 %v2832_v28, 0.0  ;;  %v4191_v12 = vsel %vm1492_vm12, 1.0, %v8054_v31  ;;  %vm1494_vm5 = vcmp.eq.s32.totalorder %v5864_v30, %v8238_v32  ;;  %v1208_v0 = vpack.c.bf16 %v4129_v34, %v4128_v19  ;;  %v8239_v19 = vld [vmem:[#allocation66_spill] sm:$0xff] }
 0x377   : > { %v2980_v61 = vmax.f32 %v2824_v17, 0.0  ;;  %v1655_v44 = vpack.c.bf16 %v4191_v12, %v4190_v6  ;;  %v4193_v45 = vsel %vm1494_vm5, 1.0, %v8054_v31  ;;  %v792_v48 = vadd.bf16 0, %v760_v5 }
 0x378   : > { %v7390_v1 = vpack.c.bf16 %v2982_v4, %v2981_v58  ;;  %v1419_v27 = vpop.permute.xlu1 %1418  ;;  %v4318_v14 = vsel %vm2387_vm7, 1.0, %v8054_v31  ;;  %v2318_v58 = vpop.permute.xlu0 %2317  ;;  %vm600_vm12 = vcmp.eq.s32.totalorder %v5864_v30, %v8239_v19  ;;  %vm1944_vm2 = vcmp.eq.s32.totalorder %v5864_v30, %v6942_v60 }
 0x379   : > { %v7394_v29 = vpack.c.bf16 %v2980_v61, %v2979_v21  ;;  %v1687_v49 = vadd.bf16 %v1655_v44, %v1239_v36  ;;  %vm1493_vm4 = vcmp.eq.s32.totalorder %v5864_v30, %v1419_v27  ;;  %v1240_v21 = vadd.bf16 %v1208_v0, %v792_v48 }
 0x37a   : > { %v4192_v28 = vsel %vm1493_vm4, 1.0, %v8054_v31  ;;  %vm2390_vm10 = vcmp.eq.s32.totalorder %v5864_v30, %v2318_v58 }
 0x37b   : > { %v1656_v17 = vpack.c.bf16 %v4193_v45, %v4192_v28  ;;  %v4321_v12 = vsel %vm2390_vm10, 1.0, %v8054_v31  ;;  %v8240_v28 = vld [vmem:[#allocation67_spill] sm:$0xff]  ;;  %v4067_v45 = vsel %vm600_vm12, 1.0, %v8054_v31 }
 0x37c   : > { %vm599_vm13 = vcmp.eq.s32.totalorder %v5864_v30, %v8240_v28  ;;  %v2321_v60 = vpop.permute.xlu0 %2320 }
 0x37d   : > { %v1861_v57 = vpop.permute.xlu1 %1860  ;;  %v1688_v27 = vadd.bf16 %v1656_v17, %v1240_v21  ;;  %v4194_v21 = vsel %vm1495_vm1, 1.0, %v8054_v31 }
 0x37e   : > { %vm1939_vm15 = vcmp.eq.s32.totalorder %v5864_v30, %v1861_v57 }
 0x37f   : > { %v4254_v54 = vsel %vm1939_vm15, 1.0, %v8054_v31 }
 0x380   : > { %v2103_v46 = vpack.c.bf16 %v4255_v16, %v4254_v54 }
 0x381   : > { %v1867_v42 = vpop.permute.xlu1 %1866 }
 0x382   : > { %v2135_v9 = vadd.bf16 %v2103_v46, %v1687_v49  ;;  %vm1941_vm9 = vcmp.eq.s32.totalorder %v5864_v30, %v1867_v42 }
 0x383   : > { %v4256_v4 = vsel %vm1941_vm9, 1.0, %v8054_v31 }
 0x385   : > { %v1870_v52 = vpop.permute.xlu1 %1869 }
 0x386   : > { %vm1942_vm6 = vcmp.eq.s32.totalorder %v5864_v30, %v1870_v52 }
 0x387   : > { %v4257_v7 = vsel %vm1942_vm6, 1.0, %v8054_v31 }
 0x388   : > { %v2104_v61 = vpack.c.bf16 %v4257_v7, %v4256_v4  ;;  %v4066_v7 = vsel %vm599_vm13, 1.0, %v8054_v31 }
 0x389   : > { %v761_v17 = vpack.c.bf16 %v4067_v45, %v4066_v7 }
 0x38a   : > { %v2312_v15 = vpop.permute.xlu1 %2311  ;;  %v2136_v56 = vadd.bf16 %v2104_v61, %v1688_v27 }
 0x38b   : > { %vm2388_vm8 = vcmp.eq.s32.totalorder %v5864_v30, %v2312_v15  ;;  %v8241_v15 = vld [vmem:[#allocation119_spill] sm:$0xff]  ;;  %v793_v61 = vadd.bf16 0, %v761_v17 }
 0x38c   : > { %v4319_v8 = vsel %vm2388_vm8, 1.0, %v8054_v31  ;;  %vm1048_vm15 = vcmp.eq.s32.totalorder %v5864_v30, %v8241_v15  ;;  %vm1498_vm8 = vcmp.eq.s32.totalorder %v5864_v30, %v6363_v22 }
 0x38d   : > { %v2551_v47 = vpack.c.bf16 %v4319_v8, %v4318_v14  ;;  %v4131_v58 = vsel %vm1048_vm15, 1.0, %v8054_v31 }
 0x38e   : > { %v2315_v23 = vpop.permute.xlu1 %2314 }
 0x38f   : > { %vm2389_vm11 = vcmp.eq.s32.totalorder %v5864_v30, %v2315_v23  ;;  %v2583_v43 = vadd.bf16 %v2551_v47, %v2135_v9 }
 0x390   : > { %v4320_v39 = vsel %vm2389_vm11, 1.0, %v8054_v31  ;;  %v4533_v6 = vpop.f32.mrb[4].mxu1  ;;  %vm2391_vm11 = vcmp.eq.s32.totalorder %v5864_v30, %v2321_v60 }
 0x391   : > { %v2552_v44 = vpack.c.bf16 %v4321_v12, %v4320_v39  ;;  %v2845_v57 = vadd.f32 %v4533_v6, %v7121_v37  ;;  %v2836_v36 = vpop.f32.mrb[5].mxu1  ;;  %4551 = vmatprep.mubr.bf16.mxu1 %v2583_v43  ;;  %v4259_v43 = vsel %vm1944_vm2, 1.0, %v8054_v31  ;;  %v8242_v6 = vld [vmem:[#allocation68_spill] sm:$0xff]  ;;  %v4322_v22 = vsel %vm2391_vm11, 1.0, %v8054_v31 }
 0x392   : > { %v2837_v16 = vadd.f32 %v7121_v37, %v2836_v36  ;;  %v4534_v54 = vpop.f32.mrb[6].mxu1  ;;  %vm602_vm4 = vcmp.eq.s32.totalorder %v5864_v30, %v8242_v6 }
 0x393   : > { %v2848_v49 = vadd.f32 %v4534_v54, %v7121_v37  ;;  %v977_v46 = vpop.permute.xlu1 %976  ;;  %v2839_v51 = vpop.f32.mrb[7].mxu1  ;;  %v2584_v38 = vadd.bf16 %v2552_v44, %v2136_v56  ;;  %v2985_v9 = vmax.f32 %v2845_v57, 0.0  ;;  %v8243_v56 = vld [vmem:[#allocation69_spill] sm:$0xff]  ;;  %v4069_v36 = vsel %vm602_vm4, 1.0, %v8054_v31 }
 0x394   : > { %v2840_v42 = vadd.f32 %v7121_v37, %v2839_v51  ;;  %v2983_v62 = vmax.f32 %v2837_v16, 0.0  ;;  %vm1047_vm14 = vcmp.eq.s32.totalorder %v5864_v30, %v977_v46  ;;  %vm601_vm5 = vcmp.eq.s32.totalorder %v5864_v30, %v8243_v56 }
 0x395   : > { %v2986_v13 = vmax.f32 %v2848_v49, 0.0  ;;  %4552 = vmatmul.mubr.bf16.gmra.mrb[24].mxu1 %v2584_v38  ;;  %v4130_v48 = vsel %vm1047_vm14, 1.0, %v8054_v31  ;;  %v4068_v16 = vsel %vm601_vm5, 1.0, %v8054_v31 }
 0x396   : > { %v2984_v52 = vmax.f32 %v2840_v42, 0.0  ;;  %v1209_v8 = vpack.c.bf16 %v4131_v58, %v4130_v48  ;;  %v762_v46 = vpack.c.bf16 %v4069_v36, %v4068_v16  ;;  %v2330_v42 = vpop.permute.xlu0 %2329 }
 0x397   : > { %v7433_v34 = vpack.c.bf16 %v2986_v13, %v2985_v9  ;;  %v983_v18 = vpop.permute.xlu1 %982  ;;  %v4197_v13 = vsel %vm1498_vm8, 1.0, %v8054_v31  ;;  %vm2394_vm14 = vcmp.eq.s32.totalorder %v5864_v30, %v2330_v42 }
 0x398   : > { %v7435_v5 = vpack.c.bf16 %v2984_v52, %v2983_v62  ;;  %v1241_v27 = vadd.bf16 %v1209_v8, %v793_v61  ;;  %vm1049_vm7 = vcmp.eq.s32.totalorder %v5864_v30, %v983_v18  ;;  %v794_v18 = vadd.bf16 0, %v762_v46  ;;  %v4860_v46 = vld [vmem:[%s7827_s5] sm:$0xff]  }
 0x399   : > { %v4132_v51 = vsel %vm1049_vm7, 1.0, %v8054_v31  ;;  %4639 = vmatprep.subr.bf16.mxu0 %v4860_v46 }
 0x39a   : > { %4640 = vmatpush3.bf16.msra.mxu0 %v4860_v46 }
 0x39b   : > { %v986_v32 = vpop.permute.xlu1 %985 }
 0x39c   : > { %vm1050_vm6 = vcmp.eq.s32.totalorder %v5864_v30, %v986_v32 }
 0x39d   : > { %v4133_v49 = vsel %vm1050_vm6, 1.0, %v8054_v31 }
 0x39e   : > { %v1210_v9 = vpack.c.bf16 %v4133_v49, %v4132_v51  ;;  %v4861_v51 = vld [vmem:[%s7827_s5 + $0x8] sm:$0xff]  }
 0x39f   : > { %4641 = vmatprep.subr.bf16.mxu0 %v4861_v51 }
 0x3a0   : > { %v1428_v0 = vpop.permute.xlu1 %1427  ;;  %v1242_v45 = vadd.bf16 %v1210_v9, %v794_v18  ;;  %4642 = vmatpush3.bf16.msra.mxu0 %v4861_v51 }
 0x3a1   : > { %vm1496_vm0 = vcmp.eq.s32.totalorder %v5864_v30, %v1428_v0 }
 0x3a2   : > { %v4195_v4 = vsel %vm1496_vm0, 1.0, %v8054_v31 }
 0x3a3   : > { %v1657_v47 = vpack.c.bf16 %v4195_v4, %v4194_v21 }
 0x3a4   : > { %v1431_v14 = vpop.permute.xlu1 %1430 }
 0x3a5   : > { %v1689_v12 = vadd.bf16 %v1657_v47, %v1241_v27  ;;  %vm1497_vm9 = vcmp.eq.s32.totalorder %v5864_v30, %v1431_v14 }
 0x3a6   : > { %v4196_v38 = vsel %vm1497_vm9, 1.0, %v8054_v31 }
 0x3a7   : > { %v1658_v32 = vpack.c.bf16 %v4197_v13, %v4196_v38 }
 0x3a9   : > { %v1873_v23 = vpop.permute.xlu1 %1872  ;;  %v1690_v8 = vadd.bf16 %v1658_v32, %v1242_v45  ;;  %v4866_v32 = vld [vmem:[%s7827_s5 + $0x30] sm:$0xff]  }
 0x3aa   : > { %vm1943_vm3 = vcmp.eq.s32.totalorder %v5864_v30, %v1873_v23  ;;  %v4325_v23 = vsel %vm2394_vm14, 1.0, %v8054_v31 }
 0x3ab   : > { %v4258_v26 = vsel %vm1943_vm3, 1.0, %v8054_v31 }
 0x3ac   : > { %v2105_v39 = vpack.c.bf16 %v4259_v43, %v4258_v26 }
 0x3ad   : > { %v1879_v44 = vpop.permute.xlu1 %1878 }
 0x3ae   : > { %v2137_v57 = vadd.bf16 %v2105_v39, %v1689_v12  ;;  %vm1945_vm12 = vcmp.eq.s32.totalorder %v5864_v30, %v1879_v44 }
 0x3af   : > { %v4260_v19 = vsel %vm1945_vm12, 1.0, %v8054_v31 }
 0x3b1   : > { %v1882_v54 = vpop.permute.xlu1 %1881 }
 0x3b2   : > { %vm1946_vm10 = vcmp.eq.s32.totalorder %v5864_v30, %v1882_v54 }
 0x3b3   : > { %v4261_v62 = vsel %vm1946_vm10, 1.0, %v8054_v31 }
 0x3b4   : > { %v2106_v7 = vpack.c.bf16 %v4261_v62, %v4260_v19 }
 0x3b6   : > { %v2324_v52 = vpop.permute.xlu1 %2323  ;;  %v2138_v26 = vadd.bf16 %v2106_v7, %v1690_v8 }
 0x3b7   : > { %vm2392_vm13 = vcmp.eq.s32.totalorder %v5864_v30, %v2324_v52 }
 0x3b8   : > { %v4323_v28 = vsel %vm2392_vm13, 1.0, %v8054_v31  ;;  %v4537_v0 = vpop.f32.mrb[8].mxu1 }
 0x3b9   : > { %v2553_v15 = vpack.c.bf16 %v4323_v28, %v4322_v22  ;;  %v2861_v48 = vadd.f32 %v4537_v0, %v7121_v37  ;;  %v2852_v17 = vpop.f32.mrb[9].mxu1  ;;  %v4867_v22 = vld [vmem:[%s7827_s5 + $0x38] sm:$0xff]  }
 0x3ba   : > { %v2853_v14 = vadd.f32 %v7121_v37, %v2852_v17  ;;  %v2327_v58 = vpop.permute.xlu1 %2326  ;;  %v4538_v4 = vpop.f32.mrb[10].mxu1 }
 0x3bb   : > { %vm2393_vm15 = vcmp.eq.s32.totalorder %v5864_v30, %v2327_v58  ;;  %v2864_v21 = vadd.f32 %v4538_v4, %v7121_v37  ;;  %v2855_v61 = vpop.f32.mrb[11].mxu1  ;;  %v2585_v47 = vadd.bf16 %v2553_v15, %v2137_v57  ;;  %v2989_v12 = vmax.f32 %v2861_v48, 0.0 }
 0x3bc   : > { %v4324_v27 = vsel %vm2393_vm15, 1.0, %v8054_v31  ;;  %v2856_v43 = vadd.f32 %v7121_v37, %v2855_v61  ;;  %v2987_v56 = vmax.f32 %v2853_v14, 0.0  ;;  %v7505_v31 = vld [vmem:[%s7824_s2] ss:$0 sm:$0xff] }
 0x3bd   : > { %v2554_v39 = vpack.c.bf16 %v4325_v23, %v4324_v27  ;;  %v2990_v6 = vmax.f32 %v2864_v21, 0.0  ;;  %4555 = vmatprep.mubr.bf16.mxu1 %v2585_v47 }
 0x3be   : > { %v2988_v44 = vmax.f32 %v2856_v43, 0.0 }
 0x3bf   : > { %v7491_v60 = vpack.c.bf16 %v2990_v6, %v2989_v12  ;;  %v2586_v36 = vadd.bf16 %v2554_v39, %v2138_v26 }
 0x3c0   : > { %v3031_v16 = vpack.c.bf16 %v2988_v44, %v2987_v56 }
 0x3c1   : > { %4556 = vmatmul.mubr.bf16.gmra.mrb[28].mxu1 %v2586_v36 }
 0x3c2   : > { %4575 = vmatprep.mubr.bf16.mxu1 %v7141_v2 }
 0x3c9   : > { %4576 = vmatmul.mubr.bf16.vlgmr.msra.gmra.mrb[32].mxu1 %v7139_v11 }
 0x3ca   : > { %4579 = vmatprep.mubr.bf16.mxu1 %v7159_v24 }
 0x3d1   : > { %4580 = vmatmul.mubr.bf16.gmra.mrb[36].mxu1 %v7155_v20 }
 0x3d2   : > { %4583 = vmatprep.mubr.bf16.mxu1 %v7188_v55 }
 0x3d9   : > { %4584 = vmatmul.mubr.bf16.gmra.mrb[40].mxu1 %v7184_v33 }
 0x3da   : > { %4587 = vmatprep.mubr.bf16.mxu1 %v7216_v50 }
 0x3e1   : > { %4588 = vmatmul.mubr.bf16.gmra.mrb[44].mxu1 %v7213_v10 }
 0x3e2   : > { %4591 = vmatprep.mubr.bf16.mxu1 %v7253_v25 }
 0x3e4   : > { %v4541_v30 = vpop.f32.mrb[12].mxu1 }
 0x3e5   : > { %v2877_v37 = vadd.f32 %v7505_v31, %v4541_v30  ;;  %v2868_v11 = vpop.f32.mrb[13].mxu1 }
 0x3e6   : > { %v2869_v2 = vadd.f32 %v7505_v31, %v2868_v11  ;;  %v4542_v20 = vpop.f32.mrb[14].mxu1 }
 0x3e7   : > { %v2880_v24 = vadd.f32 %v7505_v31, %v4542_v20  ;;  %v2871_v33 = vpop.f32.mrb[15].mxu1  ;;  %v2993_v10 = vmax.f32 %v2877_v37, 0.0 }
 0x3e8   : > { %v2872_v55 = vadd.f32 %v7505_v31, %v2871_v33  ;;  %v2991_v25 = vmax.f32 %v2869_v2, 0.0 }
 0x3e9   : > { %v2994_v50 = vmax.f32 %v2880_v24, 0.0  ;;  %4592 = vmatmul.mubr.bf16.gmra.mrb[48].mxu1 %v7250_v59  ;;  %v4862_v59 = vld [vmem:[%s7827_s5 + $0x10] sm:$0xff]  }
 0x3ea   : > { %v2992_v57 = vmax.f32 %v2872_v55, 0.0  ;;  %4595 = vmatprep.mubr.bf16.mxu1 %v7290_v35  ;;  %4643 = vmatprep.subr.bf16.mxu0 %v4862_v59 }
 0x3eb   : > { %v3034_v54 = vpack.c.bf16 %v2994_v50, %v2993_v10  ;;  %4644 = vmatpush3.bf16.msra.mxu0 %v4862_v59 }
 0x3ec   : > { %v3033_v49 = vpack.c.bf16 %v2992_v57, %v2991_v25 }
 0x3f1   : > { %4596 = vmatmul.mubr.bf16.gmra.mrb[52].mxu1 %v7285_v40  ;;  %v4863_v40 = vld [vmem:[%s7827_s5 + $0x18] sm:$0xff]  }
 0x3f2   : > { %4599 = vmatprep.mubr.bf16.mxu1 %v7308_v41  ;;  %4645 = vmatprep.subr.bf16.mxu0 %v4863_v40 }
 0x3f3   : > { %4646 = vmatpush3.bf16.msra.mxu0 %v4863_v40 }
 0x3f9   : > { %4600 = vmatmul.mubr.bf16.gmra.mrb[56].mxu1 %v7304_v63 }
 0x3fa   : > { %4603 = vmatprep.mubr.bf16.mxu1 %v7347_v3 }
 0x401   : > { %4604 = vmatmul.mubr.bf16.gmra.mrb[60].mxu1 %v7345_v53 }
 0x402   : > { %4607 = vmatprep.mubr.bf16.mxu1 %v7394_v29 }
 0x409   : > { %4608 = vmatmul.mubr.bf16.gmra.mrb[64].mxu1 %v7390_v1 }
 0x40a   : > { %4611 = vmatprep.mubr.bf16.mxu1 %v7435_v5  ;;  %v4864_v5 = vld [vmem:[%s7827_s5 + $0x20] sm:$0xff]  }
 0x40b   : > { %4647 = vmatprep.subr.bf16.mxu0 %v4864_v5 }
 0x40c   : > { %4648 = vmatpush3.bf16.msra.mxu0 %v4864_v5 }
 0x410   : > { %v4545_v35 = vpop.f32.mrb[16].mxu1 }
 0x411   : > { %v2893_v63 = vadd.f32 %v7505_v31, %v4545_v35  ;;  %v2884_v41 = vpop.f32.mrb[17].mxu1  ;;  %4612 = vmatmul.mubr.bf16.gmra.mrb[68].mxu1 %v7433_v34  ;;  %v4865_v34 = vld [vmem:[%s7827_s5 + $0x28] sm:$0xff]  }
 0x412   : > { %v2885_v3 = vadd.f32 %v7505_v31, %v2884_v41  ;;  %v4546_v38 = vpop.f32.mrb[18].mxu1  ;;  %4615 = vmatprep.mubr.bf16.mxu1 %v3031_v16  ;;  %4649 = vmatprep.subr.bf16.mxu0 %v4865_v34 }
 0x413   : > { %v2896_v42 = vadd.f32 %v7505_v31, %v4546_v38  ;;  %v2887_v53 = vpop.f32.mrb[19].mxu1  ;;  %v2997_v9 = vmax.f32 %v2893_v63, 0.0  ;;  %4650 = vmatpush3.bf16.msra.mxu0 %v4865_v34 }
 0x414   : > { %v2888_v29 = vadd.f32 %v7505_v31, %v2887_v53  ;;  %v2995_v1 = vmax.f32 %v2885_v3, 0.0  ;;  %4651 = vmatprep.subr.bf16.mxu0 %v4866_v32 }
 0x415   : > { %v2998_v13 = vmax.f32 %v2896_v42, 0.0 }
 0x416   : > { %v2996_v62 = vmax.f32 %v2888_v29, 0.0 }
 0x417   : > { %v3036_v52 = vpack.c.bf16 %v2998_v13, %v2997_v9  ;;  %4652 = vmatpush3.bf16.msra.mxu0 %v4866_v32 }
 0x418   : > { %v3035_v18 = vpack.c.bf16 %v2996_v62, %v2995_v1  ;;  %4653 = vmatprep.subr.bf16.mxu0 %v4867_v22 }
 0x419   : > { %4616 = vmatmul.mubr.bf16.gmra.mrb[72].mxu1 %v7491_v60 }
 0x41a   : > { %4619 = vmatprep.mubr.bf16.mxu1 %v3033_v49  ;;  %v7566_v49 = vld [vmem:[%s7826_s4] ss:$0 sm:$0xff] }
 0x41b   : > { %4654 = vmatpush3.bf16.msra.mxu0 %v4867_v22 }
 0x421   : > { %4620 = vmatmul.mubr.bf16.gmra.mrb[76].mxu1 %v3034_v54 }
 0x422   : > { %4623 = vmatprep.mubr.bf16.mxu1 %v3035_v18 }
 0x429   : > { %4624 = vmatmul.mubr.bf16.gmra.mrb[80].mxu1 %v3036_v52 }
 0x43c   : > { %v4549_v19 = vpop.f32.mrb[20].mxu1 }
 0x43d   : > { %v2909_v28 = vadd.f32 %v7505_v31, %v4549_v19  ;;  %v2900_v0 = vpop.f32.mrb[21].mxu1 }
 0x43e   : > { %v2901_v45 = vadd.f32 %v7505_v31, %v2900_v0  ;;  %v4550_v7 = vpop.f32.mrb[22].mxu1 }
 0x43f   : > { %v2912_v15 = vadd.f32 %v7505_v31, %v4550_v7  ;;  %v2903_v48 = vpop.f32.mrb[23].mxu1  ;;  %v3001_v14 = vmax.f32 %v2909_v28, 0.0 }
 0x440   : > { %v2904_v17 = vadd.f32 %v7505_v31, %v2903_v48  ;;  %v2999_v4 = vmax.f32 %v2901_v45, 0.0 }
 0x441   : > { %v3002_v58 = vmax.f32 %v2912_v15, 0.0 }
 0x442   : > { %v3000_v8 = vmax.f32 %v2904_v17, 0.0 }
 0x443   : > { %v3038_v21 = vpack.c.bf16 %v3002_v58, %v3001_v14 }
 0x444   : > { %v3037_v61 = vpack.c.bf16 %v3000_v8, %v2999_v4 }
 0x446   : > { %4627 = vmatprep.mubr.bf16.mxu1 %v3037_v61 }
 0x447   : > { %4628 = vmatmul.mubr.bf16.gmra.mrb[84].mxu1 %v3038_v21 }
 0x468   : > { %v4553_v47 = vpop.f32.mrb[24].mxu1 }
 0x469   : > { %v2925_v23 = vadd.f32 %v7505_v31, %v4553_v47  ;;  %v2916_v27 = vpop.f32.mrb[25].mxu1 }
 0x46a   : > { %v2917_v43 = vadd.f32 %v7505_v31, %v2916_v27  ;;  %v4554_v26 = vpop.f32.mrb[26].mxu1 }
 0x46b   : > { %v2928_v12 = vadd.f32 %v7505_v31, %v4554_v26  ;;  %v2919_v39 = vpop.f32.mrb[27].mxu1  ;;  %v3005_v56 = vmax.f32 %v2925_v23, 0.0 }
 0x46c   : > { %v2920_v6 = vadd.f32 %v7505_v31, %v2919_v39  ;;  %v3003_v60 = vmax.f32 %v2917_v43, 0.0 }
 0x46d   : > { %v3006_v44 = vmax.f32 %v2928_v12, 0.0 }
 0x46e   : > { %v3004_v36 = vmax.f32 %v2920_v6, 0.0 }
 0x46f   : > { %v3040_v16 = vpack.c.bf16 %v3006_v44, %v3005_v56 }
 0x470   : > { %v3039_v30 = vpack.c.bf16 %v3004_v36, %v3003_v60 }
 0x472   : > { %4631 = vmatprep.mubr.bf16.mxu1 %v3039_v30 }
 0x473   : > { %4632 = vmatmul.mubr.bf16.gmra.mrb[88].mxu1 %v3040_v16 }
 0x494   : > { %v4557_v37 = vpop.f32.mrb[28].mxu1 }
 0x495   : > { %v2941_v11 = vadd.f32 %v7505_v31, %v4557_v37  ;;  %v2932_v2 = vpop.f32.mrb[29].mxu1 }
 0x496   : > { %v2933_v20 = vadd.f32 %v7505_v31, %v2932_v2  ;;  %v4558_v24 = vpop.f32.mrb[30].mxu1 }
 0x497   : > { %v2944_v33 = vadd.f32 %v7505_v31, %v4558_v24  ;;  %v2935_v55 = vpop.f32.mrb[31].mxu1  ;;  %v3009_v50 = vmax.f32 %v2941_v11, 0.0 }
 0x498   : > { %v2936_v10 = vadd.f32 %v7505_v31, %v2935_v55  ;;  %v3007_v57 = vmax.f32 %v2933_v20, 0.0 }
 0x499   : > { %v3010_v25 = vmax.f32 %v2944_v33, 0.0 }
 0x49a   : > { %v3008_v54 = vmax.f32 %v2936_v10, 0.0 }
 0x49b   : > { %v3042_v46 = vpack.c.bf16 %v3010_v25, %v3009_v50 }
 0x49c   : > { %v3041_v51 = vpack.c.bf16 %v3008_v54, %v3007_v57  ;;  %v4577_v59 = vpop.f32.mrb[32].mxu1 }
 0x49d   : > { %v3157_v40 = vadd.f32 %v4577_v59, %v7566_v49  ;;  %v3148_v35 = vpop.f32.mrb[33].mxu1 }
 0x49e   : > { %v3149_v63 = vadd.f32 %v7566_v49, %v3148_v35  ;;  %v4578_v41 = vpop.f32.mrb[34].mxu1  ;;  %4635 = vmatprep.mubr.bf16.mxu1 %v3041_v51 }
 0x49f   : > { %v3160_v31 = vadd.f32 %v4578_v41, %v7566_v49  ;;  %v3151_v3 = vpop.f32.mrb[35].mxu1  ;;  %4636 = vmatmul.mubr.bf16.gmra.mrb[92].mxu1 %v3042_v46  ;;  %v3405_v42 = vmax.f32 %v3157_v40, 0.0 }
 0x4a0   : > { %v3152_v38 = vadd.f32 %v7566_v49, %v3151_v3  ;;  %v3403_v29 = vmax.f32 %v3149_v63, 0.0 }
 0x4a1   : > { %v3406_v53 = vmax.f32 %v3160_v31, 0.0 }
 0x4a2   : > { %v3404_v9 = vmax.f32 %v3152_v38, 0.0 }
 0x4a3   : > { %v3468_v13 = vpack.c.bf16 %v3406_v53, %v3405_v42 }
 0x4a4   : > { %v3467_v1 = vpack.c.bf16 %v3404_v9, %v3403_v29  ;;  %v4581_v62 = vpop.f32.mrb[36].mxu1 }
 0x4a5   : > { %v3173_v5 = vadd.f32 %v4581_v62, %v7566_v49  ;;  %v3164_v52 = vpop.f32.mrb[37].mxu1 }
 0x4a6   : > { %v3165_v18 = vadd.f32 %v7566_v49, %v3164_v52  ;;  %v4582_v34 = vpop.f32.mrb[38].mxu1  ;;  %4655 = vmatprep.mubr.bf16.mxu0 %v3467_v1 }
 0x4a7   : > { %v3176_v32 = vadd.f32 %v4582_v34, %v7566_v49  ;;  %v3167_v22 = vpop.f32.mrb[39].mxu1  ;;  %4656 = vmatmul.mubr.bf16.vlgmr.msra.gmra.mrb[32].mxu0 %v3468_v13  ;;  %v3409_v28 = vmax.f32 %v3173_v5, 0.0 }
 0x4a8   : > { %v3168_v19 = vadd.f32 %v7566_v49, %v3167_v22  ;;  %v3407_v45 = vmax.f32 %v3165_v18, 0.0 }
 0x4a9   : > { %v3410_v0 = vmax.f32 %v3176_v32, 0.0 }
 0x4aa   : > { %v3408_v7 = vmax.f32 %v3168_v19, 0.0 }
 0x4ab   : > { %v3470_v15 = vpack.c.bf16 %v3410_v0, %v3409_v28 }
 0x4ac   : > { %v3469_v48 = vpack.c.bf16 %v3408_v7, %v3407_v45  ;;  %v4585_v17 = vpop.f32.mrb[40].mxu1 }
 0x4ad   : > { %v3189_v14 = vadd.f32 %v4585_v17, %v7566_v49  ;;  %v3180_v58 = vpop.f32.mrb[41].mxu1 }
 0x4ae   : > { %v3181_v4 = vadd.f32 %v7566_v49, %v3180_v58  ;;  %v4586_v8 = vpop.f32.mrb[42].mxu1  ;;  %4659 = vmatprep.mubr.bf16.mxu0 %v3469_v48 }
 0x4af   : > { %v3192_v21 = vadd.f32 %v4586_v8, %v7566_v49  ;;  %v3183_v61 = vpop.f32.mrb[43].mxu1  ;;  %4660 = vmatmul.mubr.bf16.gmra.mrb[36].mxu0 %v3470_v15  ;;  %v3413_v23 = vmax.f32 %v3189_v14, 0.0 }
 0x4b0   : > { %v3184_v47 = vadd.f32 %v7566_v49, %v3183_v61  ;;  %v3411_v43 = vmax.f32 %v3181_v4, 0.0 }
 0x4b1   : > { %v3414_v27 = vmax.f32 %v3192_v21, 0.0 }
 0x4b2   : > { %v3412_v26 = vmax.f32 %v3184_v47, 0.0 }
 0x4b3   : > { %v3472_v12 = vpack.c.bf16 %v3414_v27, %v3413_v23 }
 0x4b4   : > { %v3471_v39 = vpack.c.bf16 %v3412_v26, %v3411_v43  ;;  %v4589_v6 = vpop.f32.mrb[44].mxu1 }
 0x4b5   : > { %v3205_v56 = vadd.f32 %v4589_v6, %v7566_v49  ;;  %v3196_v44 = vpop.f32.mrb[45].mxu1 }
 0x4b6   : > { %v3197_v60 = vadd.f32 %v7566_v49, %v3196_v44  ;;  %v4590_v36 = vpop.f32.mrb[46].mxu1  ;;  %4663 = vmatprep.mubr.bf16.mxu0 %v3471_v39 }
 0x4b7   : > { %v3208_v16 = vadd.f32 %v4590_v36, %v7566_v49  ;;  %v3199_v30 = vpop.f32.mrb[47].mxu1  ;;  %4664 = vmatmul.mubr.bf16.gmra.mrb[40].mxu0 %v3472_v12  ;;  %v3417_v11 = vmax.f32 %v3205_v56, 0.0 }
 0x4b8   : > { %v3200_v37 = vadd.f32 %v7566_v49, %v3199_v30  ;;  %v3415_v20 = vmax.f32 %v3197_v60, 0.0 }
 0x4b9   : > { %v3418_v2 = vmax.f32 %v3208_v16, 0.0 }
 0x4ba   : > { %v3416_v24 = vmax.f32 %v3200_v37, 0.0 }
 0x4bb   : > { %v3474_v33 = vpack.c.bf16 %v3418_v2, %v3417_v11 }
 0x4bc   : > { %v3473_v55 = vpack.c.bf16 %v3416_v24, %v3415_v20  ;;  %v4593_v10 = vpop.f32.mrb[48].mxu1 }
 0x4bd   : > { %v3221_v50 = vadd.f32 %v4593_v10, %v7566_v49  ;;  %v3212_v25 = vpop.f32.mrb[49].mxu1 }
 0x4be   : > { %v3213_v57 = vadd.f32 %v7566_v49, %v3212_v25  ;;  %v4594_v54 = vpop.f32.mrb[50].mxu1  ;;  %4667 = vmatprep.mubr.bf16.mxu0 %v3473_v55 }
 0x4bf   : > { %v3224_v46 = vadd.f32 %v4594_v54, %v7566_v49  ;;  %v3215_v51 = vpop.f32.mrb[51].mxu1  ;;  %4668 = vmatmul.mubr.bf16.gmra.mrb[44].mxu0 %v3474_v33  ;;  %v3421_v40 = vmax.f32 %v3221_v50, 0.0 }
 0x4c0   : > { %v3216_v59 = vadd.f32 %v7566_v49, %v3215_v51  ;;  %v3419_v63 = vmax.f32 %v3213_v57, 0.0 }
 0x4c1   : > { %v3422_v35 = vmax.f32 %v3224_v46, 0.0 }
 0x4c2   : > { %v3420_v41 = vmax.f32 %v3216_v59, 0.0 }
 0x4c3   : > { %v3476_v31 = vpack.c.bf16 %v3422_v35, %v3421_v40 }
 0x4c4   : > { %v3475_v3 = vpack.c.bf16 %v3420_v41, %v3419_v63  ;;  %v4597_v38 = vpop.f32.mrb[52].mxu1 }
 0x4c5   : > { %v3237_v42 = vadd.f32 %v4597_v38, %v7566_v49  ;;  %v3228_v53 = vpop.f32.mrb[53].mxu1 }
 0x4c6   : > { %v3229_v29 = vadd.f32 %v7566_v49, %v3228_v53  ;;  %v4598_v9 = vpop.f32.mrb[54].mxu1  ;;  %4671 = vmatprep.mubr.bf16.mxu0 %v3475_v3 }
 0x4c7   : > { %v3240_v13 = vadd.f32 %v4598_v9, %v7566_v49  ;;  %v3231_v1 = vpop.f32.mrb[55].mxu1  ;;  %4672 = vmatmul.mubr.bf16.gmra.mrb[48].mxu0 %v3476_v31  ;;  %v3425_v5 = vmax.f32 %v3237_v42, 0.0 }
 0x4c8   : > { %v3232_v62 = vadd.f32 %v7566_v49, %v3231_v1  ;;  %v3423_v18 = vmax.f32 %v3229_v29, 0.0 }
 0x4c9   : > { %v3426_v52 = vmax.f32 %v3240_v13, 0.0 }
 0x4ca   : > { %v3424_v34 = vmax.f32 %v3232_v62, 0.0 }
 0x4cb   : > { %v3478_v32 = vpack.c.bf16 %v3426_v52, %v3425_v5 }
 0x4cc   : > { %v3477_v22 = vpack.c.bf16 %v3424_v34, %v3423_v18  ;;  %v4601_v19 = vpop.f32.mrb[56].mxu1 }
 0x4cd   : > { %v3253_v28 = vadd.f32 %v4601_v19, %v7566_v49  ;;  %v3244_v0 = vpop.f32.mrb[57].mxu1 }
 0x4ce   : > { %v3245_v45 = vadd.f32 %v7566_v49, %v3244_v0  ;;  %v4602_v7 = vpop.f32.mrb[58].mxu1  ;;  %4675 = vmatprep.mubr.bf16.mxu0 %v3477_v22 }
 0x4cf   : > { %v3256_v15 = vadd.f32 %v4602_v7, %v7566_v49  ;;  %v3247_v48 = vpop.f32.mrb[59].mxu1  ;;  %4676 = vmatmul.mubr.bf16.gmra.mrb[52].mxu0 %v3478_v32  ;;  %v3429_v14 = vmax.f32 %v3253_v28, 0.0 }
 0x4d0   : > { %v3248_v17 = vadd.f32 %v7566_v49, %v3247_v48  ;;  %v3427_v4 = vmax.f32 %v3245_v45, 0.0 }
 0x4d1   : > { %v3430_v58 = vmax.f32 %v3256_v15, 0.0 }
 0x4d2   : > { %v3428_v8 = vmax.f32 %v3248_v17, 0.0 }
 0x4d3   : > { %v3480_v21 = vpack.c.bf16 %v3430_v58, %v3429_v14 }
 0x4d4   : > { %v3479_v61 = vpack.c.bf16 %v3428_v8, %v3427_v4  ;;  %v4605_v47 = vpop.f32.mrb[60].mxu1 }
 0x4d5   : > { %v3269_v23 = vadd.f32 %v4605_v47, %v7566_v49  ;;  %v3260_v27 = vpop.f32.mrb[61].mxu1 }
 0x4d6   : > { %v3261_v43 = vadd.f32 %v7566_v49, %v3260_v27  ;;  %v4606_v26 = vpop.f32.mrb[62].mxu1  ;;  %4679 = vmatprep.mubr.bf16.mxu0 %v3479_v61 }
 0x4d7   : > { %v3272_v12 = vadd.f32 %v4606_v26, %v7566_v49  ;;  %v3263_v39 = vpop.f32.mrb[63].mxu1  ;;  %4680 = vmatmul.mubr.bf16.gmra.mrb[56].mxu0 %v3480_v21  ;;  %v3433_v56 = vmax.f32 %v3269_v23, 0.0 }
 0x4d8   : > { %v3264_v6 = vadd.f32 %v7566_v49, %v3263_v39  ;;  %v3431_v60 = vmax.f32 %v3261_v43, 0.0 }
 0x4d9   : > { %v3434_v44 = vmax.f32 %v3272_v12, 0.0 }
 0x4da   : > { %v3432_v36 = vmax.f32 %v3264_v6, 0.0 }
 0x4db   : > { %v3482_v16 = vpack.c.bf16 %v3434_v44, %v3433_v56 }
 0x4dc   : > { %v3481_v30 = vpack.c.bf16 %v3432_v36, %v3431_v60  ;;  %v4609_v37 = vpop.f32.mrb[64].mxu1 }
 0x4dd   : > { %v3285_v11 = vadd.f32 %v4609_v37, %v7566_v49  ;;  %v3276_v2 = vpop.f32.mrb[65].mxu1 }
 0x4de   : > { %v3277_v20 = vadd.f32 %v7566_v49, %v3276_v2  ;;  %v4610_v24 = vpop.f32.mrb[66].mxu1  ;;  %4683 = vmatprep.mubr.bf16.mxu0 %v3481_v30 }
 0x4df   : > { %v3288_v33 = vadd.f32 %v4610_v24, %v7566_v49  ;;  %v3279_v55 = vpop.f32.mrb[67].mxu1  ;;  %4684 = vmatmul.mubr.bf16.gmra.mrb[60].mxu0 %v3482_v16  ;;  %v3437_v50 = vmax.f32 %v3285_v11, 0.0 }
 0x4e0   : > { %v3280_v10 = vadd.f32 %v7566_v49, %v3279_v55  ;;  %v3435_v57 = vmax.f32 %v3277_v20, 0.0 }
 0x4e1   : > { %v3438_v25 = vmax.f32 %v3288_v33, 0.0 }
 0x4e2   : > { %v3436_v54 = vmax.f32 %v3280_v10, 0.0 }
 0x4e3   : > { %v3484_v46 = vpack.c.bf16 %v3438_v25, %v3437_v50 }
 0x4e4   : > { %v3483_v51 = vpack.c.bf16 %v3436_v54, %v3435_v57  ;;  %v4613_v59 = vpop.f32.mrb[68].mxu1 }
 0x4e5   : > { %v3301_v40 = vadd.f32 %v4613_v59, %v7566_v49  ;;  %v3292_v35 = vpop.f32.mrb[69].mxu1 }
 0x4e6   : > { %v3293_v63 = vadd.f32 %v7566_v49, %v3292_v35  ;;  %v4614_v41 = vpop.f32.mrb[70].mxu1  ;;  %4687 = vmatprep.mubr.bf16.mxu0 %v3483_v51 }
 0x4e7   : > { %v3304_v31 = vadd.f32 %v4614_v41, %v7566_v49  ;;  %v3295_v3 = vpop.f32.mrb[71].mxu1  ;;  %4688 = vmatmul.mubr.bf16.gmra.mrb[64].mxu0 %v3484_v46  ;;  %v3441_v42 = vmax.f32 %v3301_v40, 0.0 }
 0x4e8   : > { %v3296_v38 = vadd.f32 %v7566_v49, %v3295_v3  ;;  %v3439_v29 = vmax.f32 %v3293_v63, 0.0 }
 0x4e9   : > { %v3442_v53 = vmax.f32 %v3304_v31, 0.0 }
 0x4ea   : > { %v3440_v9 = vmax.f32 %v3296_v38, 0.0 }
 0x4eb   : > { %v3486_v13 = vpack.c.bf16 %v3442_v53, %v3441_v42 }
 0x4ec   : > { %v3485_v1 = vpack.c.bf16 %v3440_v9, %v3439_v29  ;;  %v4617_v62 = vpop.f32.mrb[72].mxu1 }
 0x4ed   : > { %v3317_v5 = vadd.f32 %v4617_v62, %v7566_v49  ;;  %v3308_v52 = vpop.f32.mrb[73].mxu1 }
 0x4ee   : > { %v3309_v18 = vadd.f32 %v7566_v49, %v3308_v52  ;;  %v4618_v34 = vpop.f32.mrb[74].mxu1  ;;  %4691 = vmatprep.mubr.bf16.mxu0 %v3485_v1 }
 0x4ef   : > { %v3320_v32 = vadd.f32 %v4618_v34, %v7566_v49  ;;  %v3311_v22 = vpop.f32.mrb[75].mxu1  ;;  %4692 = vmatmul.mubr.bf16.gmra.mrb[68].mxu0 %v3486_v13  ;;  %v3445_v28 = vmax.f32 %v3317_v5, 0.0 }
 0x4f0   : > { %v3312_v19 = vadd.f32 %v7566_v49, %v3311_v22  ;;  %v3443_v45 = vmax.f32 %v3309_v18, 0.0 }
 0x4f1   : > { %v3446_v0 = vmax.f32 %v3320_v32, 0.0 }
 0x4f2   : > { %v3444_v7 = vmax.f32 %v3312_v19, 0.0 }
 0x4f3   : > { %v3488_v15 = vpack.c.bf16 %v3446_v0, %v3445_v28 }
 0x4f4   : > { %v3487_v48 = vpack.c.bf16 %v3444_v7, %v3443_v45  ;;  %v4621_v17 = vpop.f32.mrb[76].mxu1 }
 0x4f5   : > { %v3333_v14 = vadd.f32 %v4621_v17, %v7566_v49  ;;  %v3324_v58 = vpop.f32.mrb[77].mxu1 }
 0x4f6   : > { %v3325_v4 = vadd.f32 %v7566_v49, %v3324_v58  ;;  %v4622_v8 = vpop.f32.mrb[78].mxu1  ;;  %4695 = vmatprep.mubr.bf16.mxu0 %v3487_v48 }
 0x4f7   : > { %v3336_v21 = vadd.f32 %v4622_v8, %v7566_v49  ;;  %v3327_v61 = vpop.f32.mrb[79].mxu1  ;;  %4696 = vmatmul.mubr.bf16.gmra.mrb[72].mxu0 %v3488_v15  ;;  %v3449_v23 = vmax.f32 %v3333_v14, 0.0 }
 0x4f8   : > { %v3328_v47 = vadd.f32 %v7566_v49, %v3327_v61  ;;  %v3447_v43 = vmax.f32 %v3325_v4, 0.0 }
 0x4f9   : > { %v3450_v27 = vmax.f32 %v3336_v21, 0.0  ;;  %v7638_v21 = vld [vmem:[%s7828_s6] ss:$0 sm:$0xff] }
 0x4fa   : > { %v3448_v26 = vmax.f32 %v3328_v47, 0.0 }
 0x4fb   : > { %v3490_v12 = vpack.c.bf16 %v3450_v27, %v3449_v23 }
 0x4fc   : > { %v3489_v39 = vpack.c.bf16 %v3448_v26, %v3447_v43  ;;  %v4625_v6 = vpop.f32.mrb[80].mxu1 }
 0x4fd   : > { %v3349_v56 = vadd.f32 %v4625_v6, %v7566_v49  ;;  %v3340_v44 = vpop.f32.mrb[81].mxu1 }
 0x4fe   : > { %v3341_v60 = vadd.f32 %v7566_v49, %v3340_v44  ;;  %v4626_v36 = vpop.f32.mrb[82].mxu1  ;;  %4699 = vmatprep.mubr.bf16.mxu0 %v3489_v39 }
 0x4ff   : > { %v3352_v16 = vadd.f32 %v4626_v36, %v7566_v49  ;;  %v3343_v30 = vpop.f32.mrb[83].mxu1  ;;  %4700 = vmatmul.mubr.bf16.gmra.mrb[76].mxu0 %v3490_v12  ;;  %v3453_v11 = vmax.f32 %v3349_v56, 0.0 }
 0x500   : > { %v3344_v37 = vadd.f32 %v7566_v49, %v3343_v30  ;;  %v3451_v20 = vmax.f32 %v3341_v60, 0.0 }
 0x501   : > { %v3454_v2 = vmax.f32 %v3352_v16, 0.0 }
 0x502   : > { %v3452_v24 = vmax.f32 %v3344_v37, 0.0 }
 0x503   : > { %v3492_v33 = vpack.c.bf16 %v3454_v2, %v3453_v11 }
 0x504   : > { %v3491_v55 = vpack.c.bf16 %v3452_v24, %v3451_v20 }
 0x506   : > { %4703 = vmatprep.mubr.bf16.mxu0 %v3491_v55 }
 0x507   : > { %4704 = vmatmul.mubr.bf16.gmra.mrb[80].mxu0 %v3492_v33 }
 0x51a   : > { %v4629_v10 = vpop.f32.mrb[84].mxu1 }
 0x51b   : > { %v3365_v50 = vadd.f32 %v4629_v10, %v7566_v49  ;;  %v3356_v25 = vpop.f32.mrb[85].mxu1 }
 0x51c   : > { %v3357_v57 = vadd.f32 %v7566_v49, %v3356_v25  ;;  %v4630_v54 = vpop.f32.mrb[86].mxu1 }
 0x51d   : > { %v3368_v46 = vadd.f32 %v4630_v54, %v7566_v49  ;;  %v3359_v51 = vpop.f32.mrb[87].mxu1  ;;  %v3457_v40 = vmax.f32 %v3365_v50, 0.0 }
 0x51e   : > { %v3360_v59 = vadd.f32 %v7566_v49, %v3359_v51  ;;  %v3455_v63 = vmax.f32 %v3357_v57, 0.0 }
 0x51f   : > { %v3458_v35 = vmax.f32 %v3368_v46, 0.0 }
 0x520   : > { %v3456_v41 = vmax.f32 %v3360_v59, 0.0 }
 0x521   : > { %v3494_v31 = vpack.c.bf16 %v3458_v35, %v3457_v40 }
 0x522   : > { %v3493_v3 = vpack.c.bf16 %v3456_v41, %v3455_v63 }
 0x524   : > { %4707 = vmatprep.mubr.bf16.mxu0 %v3493_v3 }
 0x525   : > { %4708 = vmatmul.mubr.bf16.gmra.mrb[84].mxu0 %v3494_v31 }
 0x546   : > { %v4633_v38 = vpop.f32.mrb[88].mxu1 }
 0x547   : > { %v3381_v42 = vadd.f32 %v4633_v38, %v7566_v49  ;;  %v3372_v53 = vpop.f32.mrb[89].mxu1 }
 0x548   : > { %v3373_v29 = vadd.f32 %v7566_v49, %v3372_v53  ;;  %v4634_v9 = vpop.f32.mrb[90].mxu1 }
 0x549   : > { %v3384_v13 = vadd.f32 %v4634_v9, %v7566_v49  ;;  %v3375_v1 = vpop.f32.mrb[91].mxu1  ;;  %v3461_v5 = vmax.f32 %v3381_v42, 0.0 }
 0x54a   : > { %v3376_v62 = vadd.f32 %v7566_v49, %v3375_v1  ;;  %v3459_v18 = vmax.f32 %v3373_v29, 0.0 }
 0x54b   : > { %v3462_v52 = vmax.f32 %v3384_v13, 0.0 }
 0x54c   : > { %v3460_v34 = vmax.f32 %v3376_v62, 0.0 }
 0x54d   : > { %v3496_v32 = vpack.c.bf16 %v3462_v52, %v3461_v5 }
 0x54e   : > { %v3495_v22 = vpack.c.bf16 %v3460_v34, %v3459_v18 }
 0x550   : > { %4711 = vmatprep.mubr.bf16.mxu0 %v3495_v22 }
 0x551   : > { %4712 = vmatmul.mubr.bf16.gmra.mrb[88].mxu0 %v3496_v32 }
 0x572   : > { %v4637_v19 = vpop.f32.mrb[92].mxu1 }
 0x573   : > { %v3397_v28 = vadd.f32 %v4637_v19, %v7566_v49  ;;  %v3388_v0 = vpop.f32.mrb[93].mxu1 }
 0x574   : > { %v3389_v45 = vadd.f32 %v7566_v49, %v3388_v0  ;;  %v4638_v7 = vpop.f32.mrb[94].mxu1 }
 0x575   : > { %v3400_v15 = vadd.f32 %v4638_v7, %v7566_v49  ;;  %v3391_v48 = vpop.f32.mrb[95].mxu1  ;;  %v3465_v14 = vmax.f32 %v3397_v28, 0.0 }
 0x576   : > { %v3392_v17 = vadd.f32 %v7566_v49, %v3391_v48  ;;  %v3463_v4 = vmax.f32 %v3389_v45, 0.0 }
 0x577   : > { %v3466_v58 = vmax.f32 %v3400_v15, 0.0 }
 0x578   : > { %v3464_v8 = vmax.f32 %v3392_v17, 0.0 }
 0x579   : > { %v3498_v61 = vpack.c.bf16 %v3466_v58, %v3465_v14 }
 0x57a   : > { %v3497_v47 = vpack.c.bf16 %v3464_v8, %v3463_v4  ;;  %v4657_v23 = vpop.f32.mrb[32].mxu0 }
 0x57b   : > { %v3613_v27 = vadd.f32 %v4657_v23, %v7638_v21  ;;  %v3604_v43 = vpop.f32.mrb[33].mxu0 }
 0x57c   : > { %v3605_v26 = vadd.f32 %v7638_v21, %v3604_v43  ;;  %v4658_v49 = vpop.f32.mrb[34].mxu0  ;;  %4715 = vmatprep.mubr.bf16.mxu0 %v3497_v47 }
 0x57d   : > { %3861 = vst [vmem:[%s7642_s21 + $0x10] sm:$0xff] %v3613_v27  ;;  %v3616_v12 = vadd.f32 %v4658_v49, %v7638_v21  ;;  %v3607_v39 = vpop.f32.mrb[35].mxu0  ;;  %4716 = vmatmul.mubr.bf16.gmra.mrb[92].mxu0 %v3498_v61 }
 0x57e   : > { %3859 = vst [vmem:[%s7642_s21] sm:$0xff] %v3605_v26  ;;  %v3608_v6 = vadd.f32 %v7638_v21, %v3607_v39 }
 0x57f   : > { %3862 = vst [vmem:[%s7642_s21 + $0x18] sm:$0xff] %v3616_v12 }
 0x580   : > { %3860 = vst [vmem:[%s7642_s21 + $0x8] sm:$0xff] %v3608_v6 }
 0x582   : > { %v4661_v56 = vpop.f32.mrb[36].mxu0 }
 0x583   : > { %v3629_v44 = vadd.f32 %v4661_v56, %v7638_v21  ;;  %v3620_v60 = vpop.f32.mrb[37].mxu0 }
 0x584   : > { %v3621_v36 = vadd.f32 %v7638_v21, %v3620_v60  ;;  %v4662_v16 = vpop.f32.mrb[38].mxu0 }
 0x585   : > { %3865 = vst [vmem:[%s7642_s21 + $0x30] sm:$0xff] %v3629_v44  ;;  %v3632_v30 = vadd.f32 %v4662_v16, %v7638_v21  ;;  %v3623_v37 = vpop.f32.mrb[39].mxu0 }
 0x586   : > { %3863 = vst [vmem:[%s7642_s21 + $0x20] sm:$0xff] %v3621_v36  ;;  %v3624_v11 = vadd.f32 %v7638_v21, %v3623_v37 }
 0x587   : > { %3866 = vst [vmem:[%s7642_s21 + $0x38] sm:$0xff] %v3632_v30 }
 0x588   : > { %3864 = vst [vmem:[%s7642_s21 + $0x28] sm:$0xff] %v3624_v11 }
 0x58a   : > { %v4665_v2 = vpop.f32.mrb[40].mxu0 }
 0x58b   : > { %v3645_v20 = vadd.f32 %v4665_v2, %v7638_v21  ;;  %v3636_v24 = vpop.f32.mrb[41].mxu0 }
 0x58c   : > { %v3637_v33 = vadd.f32 %v7638_v21, %v3636_v24  ;;  %v4666_v55 = vpop.f32.mrb[42].mxu0 }
 0x58d   : > { %3869 = vst [vmem:[%s7642_s21 + $0x50] sm:$0xff] %v3645_v20  ;;  %v3648_v10 = vadd.f32 %v4666_v55, %v7638_v21  ;;  %v3639_v50 = vpop.f32.mrb[43].mxu0 }
 0x58e   : > { %3867 = vst [vmem:[%s7642_s21 + $0x40] sm:$0xff] %v3637_v33  ;;  %v3640_v25 = vadd.f32 %v7638_v21, %v3639_v50 }
 0x58f   : > { %3870 = vst [vmem:[%s7642_s21 + $0x58] sm:$0xff] %v3648_v10 }
 0x590   : > { %3868 = vst [vmem:[%s7642_s21 + $0x48] sm:$0xff] %v3640_v25 }
 0x592   : > { %v4669_v57 = vpop.f32.mrb[44].mxu0 }
 0x593   : > { %v3661_v54 = vadd.f32 %v4669_v57, %v7638_v21  ;;  %v3652_v46 = vpop.f32.mrb[45].mxu0 }
 0x594   : > { %v3653_v51 = vadd.f32 %v7638_v21, %v3652_v46  ;;  %v4670_v59 = vpop.f32.mrb[46].mxu0 }
 0x595   : > { %3873 = vst [vmem:[%s7642_s21 + $0x70] sm:$0xff] %v3661_v54  ;;  %v3664_v40 = vadd.f32 %v4670_v59, %v7638_v21  ;;  %v3655_v35 = vpop.f32.mrb[47].mxu0 }
 0x596   : > { %3871 = vst [vmem:[%s7642_s21 + $0x60] sm:$0xff] %v3653_v51  ;;  %v3656_v63 = vadd.f32 %v7638_v21, %v3655_v35 }
 0x597   : > { %3874 = vst [vmem:[%s7642_s21 + $0x78] sm:$0xff] %v3664_v40 }
 0x598   : > { %3872 = vst [vmem:[%s7642_s21 + $0x68] sm:$0xff] %v3656_v63 }
 0x59a   : > { %v4673_v41 = vpop.f32.mrb[48].mxu0 }
 0x59b   : > { %v3677_v31 = vadd.f32 %v4673_v41, %v7638_v21  ;;  %v3668_v3 = vpop.f32.mrb[49].mxu0 }
 0x59c   : > { %v3669_v38 = vadd.f32 %v7638_v21, %v3668_v3  ;;  %v4674_v42 = vpop.f32.mrb[50].mxu0 }
 0x59d   : > { %3877 = vst [vmem:[%s7642_s21 + $0x90] sm:$0xff] %v3677_v31  ;;  %v3680_v53 = vadd.f32 %v4674_v42, %v7638_v21  ;;  %v3671_v29 = vpop.f32.mrb[51].mxu0 }
 0x59e   : > { %3875 = vst [vmem:[%s7642_s21 + $0x80] sm:$0xff] %v3669_v38  ;;  %v3672_v9 = vadd.f32 %v7638_v21, %v3671_v29 }
 0x59f   : > { %3878 = vst [vmem:[%s7642_s21 + $0x98] sm:$0xff] %v3680_v53 }
 0x5a0   : > { %3876 = vst [vmem:[%s7642_s21 + $0x88] sm:$0xff] %v3672_v9 }
 0x5a2   : > { %v4677_v13 = vpop.f32.mrb[52].mxu0 }
 0x5a3   : > { %v3693_v1 = vadd.f32 %v4677_v13, %v7638_v21  ;;  %v3684_v62 = vpop.f32.mrb[53].mxu0 }
 0x5a4   : > { %v3685_v5 = vadd.f32 %v7638_v21, %v3684_v62  ;;  %v4678_v52 = vpop.f32.mrb[54].mxu0 }
 0x5a5   : > { %3881 = vst [vmem:[%s7642_s21 + $0xb0] sm:$0xff] %v3693_v1  ;;  %v3696_v18 = vadd.f32 %v4678_v52, %v7638_v21  ;;  %v3687_v34 = vpop.f32.mrb[55].mxu0 }
 0x5a6   : > { %3879 = vst [vmem:[%s7642_s21 + $0xa0] sm:$0xff] %v3685_v5  ;;  %v3688_v32 = vadd.f32 %v7638_v21, %v3687_v34 }
 0x5a7   : > { %3882 = vst [vmem:[%s7642_s21 + $0xb8] sm:$0xff] %v3696_v18 }
 0x5a8   : > { %3880 = vst [vmem:[%s7642_s21 + $0xa8] sm:$0xff] %v3688_v32 }
 0x5aa   : > { %v4681_v22 = vpop.f32.mrb[56].mxu0 }
 0x5ab   : > { %v3709_v19 = vadd.f32 %v4681_v22, %v7638_v21  ;;  %v3700_v28 = vpop.f32.mrb[57].mxu0 }
 0x5ac   : > { %v3701_v0 = vadd.f32 %v7638_v21, %v3700_v28  ;;  %v4682_v45 = vpop.f32.mrb[58].mxu0 }
 0x5ad   : > { %3885 = vst [vmem:[%s7642_s21 + $0xd0] sm:$0xff] %v3709_v19  ;;  %v3712_v7 = vadd.f32 %v4682_v45, %v7638_v21  ;;  %v3703_v15 = vpop.f32.mrb[59].mxu0 }
 0x5ae   : > { %3883 = vst [vmem:[%s7642_s21 + $0xc0] sm:$0xff] %v3701_v0  ;;  %v3704_v48 = vadd.f32 %v7638_v21, %v3703_v15 }
 0x5af   : > { %3886 = vst [vmem:[%s7642_s21 + $0xd8] sm:$0xff] %v3712_v7 }
 0x5b0   : > { %3884 = vst [vmem:[%s7642_s21 + $0xc8] sm:$0xff] %v3704_v48 }
 0x5b2   : > { %v4685_v17 = vpop.f32.mrb[60].mxu0 }
 0x5b3   : > { %v3725_v14 = vadd.f32 %v4685_v17, %v7638_v21  ;;  %v3716_v58 = vpop.f32.mrb[61].mxu0 }
 0x5b4   : > { %v3717_v4 = vadd.f32 %v7638_v21, %v3716_v58  ;;  %v4686_v8 = vpop.f32.mrb[62].mxu0 }
 0x5b5   : > { %3889 = vst [vmem:[%s7642_s21 + $0xf0] sm:$0xff] %v3725_v14  ;;  %v3728_v61 = vadd.f32 %v4686_v8, %v7638_v21  ;;  %v3719_v47 = vpop.f32.mrb[63].mxu0 }
 0x5b6   : > { %3887 = vst [vmem:[%s7642_s21 + $0xe0] sm:$0xff] %v3717_v4  ;;  %v3720_v23 = vadd.f32 %v7638_v21, %v3719_v47 }
 0x5b7   : > { %3890 = vst [vmem:[%s7642_s21 + $0xf8] sm:$0xff] %v3728_v61 }
 0x5b8   : > { %3888 = vst [vmem:[%s7642_s21 + $0xe8] sm:$0xff] %v3720_v23 }
 0x5ba   : > { %v4689_v27 = vpop.f32.mrb[64].mxu0 }
 0x5bb   : > { %v3741_v43 = vadd.f32 %v4689_v27, %v7638_v21  ;;  %v3732_v26 = vpop.f32.mrb[65].mxu0 }
 0x5bc   : > { %v3733_v49 = vadd.f32 %v7638_v21, %v3732_v26  ;;  %v4690_v12 = vpop.f32.mrb[66].mxu0 }
 0x5bd   : > { %3893 = vst [vmem:[%s7642_s21 + $0x110] sm:$0xff] %v3741_v43  ;;  %v3744_v39 = vadd.f32 %v4690_v12, %v7638_v21  ;;  %v3735_v6 = vpop.f32.mrb[67].mxu0 }
 0x5be   : > { %3891 = vst [vmem:[%s7642_s21 + $0x100] sm:$0xff] %v3733_v49  ;;  %v3736_v56 = vadd.f32 %v7638_v21, %v3735_v6 }
 0x5bf   : > { %3894 = vst [vmem:[%s7642_s21 + $0x118] sm:$0xff] %v3744_v39 }
 0x5c0   : > { %3892 = vst [vmem:[%s7642_s21 + $0x108] sm:$0xff] %v3736_v56 }
 0x5c2   : > { %v4693_v44 = vpop.f32.mrb[68].mxu0 }
 0x5c3   : > { %v3757_v60 = vadd.f32 %v4693_v44, %v7638_v21  ;;  %v3748_v36 = vpop.f32.mrb[69].mxu0 }
 0x5c4   : > { %v3749_v16 = vadd.f32 %v7638_v21, %v3748_v36  ;;  %v4694_v30 = vpop.f32.mrb[70].mxu0 }
 0x5c5   : > { %3897 = vst [vmem:[%s7642_s21 + $0x130] sm:$0xff] %v3757_v60  ;;  %v3760_v37 = vadd.f32 %v4694_v30, %v7638_v21  ;;  %v3751_v11 = vpop.f32.mrb[71].mxu0 }
 0x5c6   : > { %3895 = vst [vmem:[%s7642_s21 + $0x120] sm:$0xff] %v3749_v16  ;;  %v3752_v2 = vadd.f32 %v7638_v21, %v3751_v11 }
 0x5c7   : > { %3898 = vst [vmem:[%s7642_s21 + $0x138] sm:$0xff] %v3760_v37 }
 0x5c8   : > { %3896 = vst [vmem:[%s7642_s21 + $0x128] sm:$0xff] %v3752_v2 }
 0x5ca   : > { %v4697_v20 = vpop.f32.mrb[72].mxu0 }
 0x5cb   : > { %v3773_v24 = vadd.f32 %v4697_v20, %v7638_v21  ;;  %v3764_v33 = vpop.f32.mrb[73].mxu0 }
 0x5cc   : > { %v3765_v55 = vadd.f32 %v7638_v21, %v3764_v33  ;;  %v4698_v10 = vpop.f32.mrb[74].mxu0 }
 0x5cd   : > { %3901 = vst [vmem:[%s7642_s21 + $0x150] sm:$0xff] %v3773_v24  ;;  %v3776_v50 = vadd.f32 %v4698_v10, %v7638_v21  ;;  %v3767_v25 = vpop.f32.mrb[75].mxu0 }
 0x5ce   : > { %3899 = vst [vmem:[%s7642_s21 + $0x140] sm:$0xff] %v3765_v55  ;;  %v3768_v57 = vadd.f32 %v7638_v21, %v3767_v25 }
 0x5cf   : > { %3902 = vst [vmem:[%s7642_s21 + $0x158] sm:$0xff] %v3776_v50 }
 0x5d0   : > { %3900 = vst [vmem:[%s7642_s21 + $0x148] sm:$0xff] %v3768_v57 }
 0x5d2   : > { %v4701_v54 = vpop.f32.mrb[76].mxu0 }
 0x5d3   : > { %v3789_v46 = vadd.f32 %v4701_v54, %v7638_v21  ;;  %v3780_v51 = vpop.f32.mrb[77].mxu0 }
 0x5d4   : > { %v3781_v59 = vadd.f32 %v7638_v21, %v3780_v51  ;;  %v4702_v40 = vpop.f32.mrb[78].mxu0 }
 0x5d5   : > { %3905 = vst [vmem:[%s7642_s21 + $0x170] sm:$0xff] %v3789_v46  ;;  %v3792_v35 = vadd.f32 %v4702_v40, %v7638_v21  ;;  %v3783_v63 = vpop.f32.mrb[79].mxu0 }
 0x5d6   : > { %3903 = vst [vmem:[%s7642_s21 + $0x160] sm:$0xff] %v3781_v59  ;;  %v3784_v41 = vadd.f32 %v7638_v21, %v3783_v63 }
 0x5d7   : > { %3906 = vst [vmem:[%s7642_s21 + $0x178] sm:$0xff] %v3792_v35 }
 0x5d8   : > { %3904 = vst [vmem:[%s7642_s21 + $0x168] sm:$0xff] %v3784_v41 }
 0x5da   : > { %v4705_v31 = vpop.f32.mrb[80].mxu0 }
 0x5db   : > { %v3805_v3 = vadd.f32 %v4705_v31, %v7638_v21  ;;  %v3796_v38 = vpop.f32.mrb[81].mxu0 }
 0x5dc   : > { %v3797_v42 = vadd.f32 %v7638_v21, %v3796_v38  ;;  %v4706_v53 = vpop.f32.mrb[82].mxu0 }
 0x5dd   : > { %3909 = vst [vmem:[%s7642_s21 + $0x190] sm:$0xff] %v3805_v3  ;;  %v3808_v29 = vadd.f32 %v4706_v53, %v7638_v21  ;;  %v3799_v9 = vpop.f32.mrb[83].mxu0 }
 0x5de   : > { %3907 = vst [vmem:[%s7642_s21 + $0x180] sm:$0xff] %v3797_v42  ;;  %v3800_v13 = vadd.f32 %v7638_v21, %v3799_v9 }
 0x5df   : > { %3910 = vst [vmem:[%s7642_s21 + $0x198] sm:$0xff] %v3808_v29 }
 0x5e0   : > { %3908 = vst [vmem:[%s7642_s21 + $0x188] sm:$0xff] %v3800_v13 }
 0x5f8   : > { %v4709_v1 = vpop.f32.mrb[84].mxu0 }
 0x5f9   : > { %v3821_v62 = vadd.f32 %v4709_v1, %v7638_v21  ;;  %v3812_v5 = vpop.f32.mrb[85].mxu0 }
 0x5fa   : > { %v3813_v52 = vadd.f32 %v7638_v21, %v3812_v5  ;;  %v4710_v18 = vpop.f32.mrb[86].mxu0 }
 0x5fb   : > { %3913 = vst [vmem:[%s7642_s21 + $0x1b0] sm:$0xff] %v3821_v62  ;;  %v3824_v34 = vadd.f32 %v4710_v18, %v7638_v21  ;;  %v3815_v32 = vpop.f32.mrb[87].mxu0 }
 0x5fc   : > { %3911 = vst [vmem:[%s7642_s21 + $0x1a0] sm:$0xff] %v3813_v52  ;;  %v3816_v22 = vadd.f32 %v7638_v21, %v3815_v32 }
 0x5fd   : > { %3914 = vst [vmem:[%s7642_s21 + $0x1b8] sm:$0xff] %v3824_v34 }
 0x5fe   : > { %3912 = vst [vmem:[%s7642_s21 + $0x1a8] sm:$0xff] %v3816_v22 }
 0x624   : > { %v4713_v19 = vpop.f32.mrb[88].mxu0 }
 0x625   : > { %v3837_v28 = vadd.f32 %v4713_v19, %v7638_v21  ;;  %v3828_v0 = vpop.f32.mrb[89].mxu0 }
 0x626   : > { %v3829_v45 = vadd.f32 %v7638_v21, %v3828_v0  ;;  %v4714_v7 = vpop.f32.mrb[90].mxu0 }
 0x627   : > { %3917 = vst [vmem:[%s7642_s21 + $0x1d0] sm:$0xff] %v3837_v28  ;;  %v3840_v15 = vadd.f32 %v4714_v7, %v7638_v21  ;;  %v3831_v48 = vpop.f32.mrb[91].mxu0 }
 0x628   : > { %3915 = vst [vmem:[%s7642_s21 + $0x1c0] sm:$0xff] %v3829_v45  ;;  %v3832_v17 = vadd.f32 %v7638_v21, %v3831_v48 }
 0x629   : > { %3918 = vst [vmem:[%s7642_s21 + $0x1d8] sm:$0xff] %v3840_v15 }
 0x62a   : > { %3916 = vst [vmem:[%s7642_s21 + $0x1c8] sm:$0xff] %v3832_v17 }
 0x650   : > { %v4717_v14 = vpop.f32.mrb[92].mxu0 }
 0x651   : > { %v3853_v58 = vadd.f32 %v4717_v14, %v7638_v21  ;;  %v3844_v4 = vpop.f32.mrb[93].mxu0 }
 0x652   : > { %v3845_v8 = vadd.f32 %v7638_v21, %v3844_v4  ;;  %v4718_v61 = vpop.f32.mrb[94].mxu0 }
 0x653   : > { %3921 = vst [vmem:[%s7642_s21 + $0x1f0] sm:$0xff] %v3853_v58  ;;  %v3856_v47 = vadd.f32 %v4718_v61, %v7638_v21  ;;  %v3847_v23 = vpop.f32.mrb[95].mxu0 }
 0x654   : > { %3919 = vst [vmem:[%s7642_s21 + $0x1e0] sm:$0xff] %v3845_v8  ;;  %v3848_v27 = vadd.f32 %v7638_v21, %v3847_v23 }
 0x655   : > { %3922 = vst [vmem:[%s7642_s21 + $0x1f8] sm:$0xff] %v3856_v47 }
 0x656   : > { %3920 = vst [vmem:[%s7642_s21 + $0x1e8] sm:$0xff] %v3848_v27 }
 0x657   : > { %4922 = shalt.err (!%p4919_p3)
}
 0x658   : > { %s4923_s16 = scalar_lea.hbm %s7771_s8, 8192  ;;  %s4927_s20 = scalar_lea.hbm %s7829_s7, 16384 }
 0x659   : > { %p4924_p4 = scmp.ne.s32.totalorder %s7771_s8, %s4923_s16  ;;  %p4928_p9 = scmp.lt.u32.totalorder %s7771_s8, %s7829_s7 }
 0x65a   : > { %p4929_p10 = scmp.lt.u32.totalorder %s4927_s20, %s4923_s16  ;;  %p4931_p12 = scmp.lt.u32.totalorder %s4923_s16, %s7771_s8 }
 0x65b   : > { %p4925_p7 = pnand %p4924_p4, %p5060_p5 }
 0x65c   : > { %p4930_p11 = por %p4929_p10, %p4928_p9 }
 0x65d   : > { %p4926_p8 = pneg %p4925_p7 }
 0x65e   : > { %p4932_p13 = por %p4931_p12, %p4930_p11 }
 0x660   : > { %p4933_p0 = pnand %p4932_p13, %p4926_p8 }
 0x662   : > { %4936 = shalt.err (!%p4933_p0)
}
 0x663   : > { %s4980_s23 = smov 128   ;;  %s4981_s29 = smov 8  }
 0x664   : > { %4735 = dma.vmem_to_hbm [thread:$0]  (%p5060_p5), %s7773_s17, 8192, %s7771_s8, %s7781_s28, %s4980_s23, %s4980_s23, %s4981_s29  }
 0x665 PF: > { %p4741_p1 = scmp.ge.s32.totalorder %s4971_s27, 2  ;;  %s3952_s9 = sand.u32 1, %s4959_s24  }
 0x666   : > { %s3953_s13 = scalar_lea.sflag [#allocation3], %s3952_s9 }
 0x667   : > { %p4738_p2 = pnand %p4741_p1, %p5064_p6 }
 0x669   : > { %4954 = dma.done.wait (!%p4738_p2), %s3953_s13, 8192  }
 0x66a   : > { %4956 = vsyncadd (!%p4738_p2), %s3953_s13, 4294959104  ;;  %p17_p3 = scmp.ge.s32.totalorder %s5047_s30, 4   ;;  %s8244_s24 = smov %s4963_s25 }
 0x66b   : > { %s8245_s25 = smov %s4967_s26  ;;  %s8246_s26 = smov %s5058_s10 }
 0x66c   : > { %s8247_s27 = smov %s5047_s30  ;;  %19 = sbr.rel (!%p17_p3) target bundleno = 3 (0x3), region = 83 }
 0x673   :  { %3958 = vsyncpa [#allocation3], 1 }
 0x674   :  { %3960 = vsyncpa [#allocation3 + $0x1], 1 }

</bundles_post_ra>
